<compile_context>
chip_gen: v5e
topology: v5e:2x2
jax: 0.10.0
libtpu: 0.0.40
codegen_flags: <defaults>
</compile_context>

<pallas_src>
import functools
import math

import jax
import jax.numpy as jnp
from jax.experimental import pallas as pl
from jax.experimental.pallas import tpu as pltpu

_CDT = jnp.bfloat16      # MXU feed dtype (accumulation always f32)
_MASK_NEG = -1e30        # finite stand-in for -inf in masked_fill


# ----------------------------------------------------------------------------
# Tiled linear kernel:  y = x @ W + b
# ----------------------------------------------------------------------------
def _linear_kernel(x_ref, w_ref, b_ref, o_ref, acc_ref):
    @pl.when(pl.program_id(2) == 0)
    def _():
        acc_ref[...] = jnp.zeros_like(acc_ref)

    acc_ref[...] += jnp.dot(x_ref[...].astype(_CDT), w_ref[...],
                            preferred_element_type=jnp.float32)

    @pl.when(pl.program_id(2) == pl.num_programs(2) - 1)
    def _():
        o_ref[...] = acc_ref[...] + b_ref[...]


def _pick_tile(dim, candidates):
    for t in candidates:
        if dim % t == 0:
            return t
    return dim  # single full block along this axis (legal: block dim == array dim)


def linear(x, p):
    """Apply y = x @ W + b over the last dim of x (FCNet with drop=0, no activation)."""
    orig_shape = x.shape
    K = orig_shape[-1]
    M = int(math.prod(orig_shape[:-1]))
    N = p["w"].shape[1]
    x2 = x.reshape(M, K)
    b2 = p["b"].reshape(1, N)

    tm = _pick_tile(M, (512, 256, 128))
    tn = _pick_tile(N, (512, 256, 128))
    tk = _pick_tile(K, (256, 128))
    grid = (M // tm, N // tn, K // tk)

    y = pl.pallas_call(
        _linear_kernel,
        grid=grid,
        in_specs=[
            pl.BlockSpec((tm, tk), lambda i, j, k: (i, k)),
            pl.BlockSpec((tk, tn), lambda i, j, k: (k, j)),
            pl.BlockSpec((1, tn), lambda i, j, k: (0, j)),
        ],
        out_specs=pl.BlockSpec((tm, tn), lambda i, j, k: (i, j)),
        out_shape=jax.ShapeDtypeStruct((M, N), jnp.float32),
        scratch_shapes=[pltpu.VMEM((tm, tn), jnp.float32)],
        compiler_params=pltpu.CompilerParams(
            dimension_semantics=("parallel", "parallel", "arbitrary"),
            # Tiles above keep double-buffered live VMEM far below v7x's 64 MiB physical cap.
            vmem_limit_bytes=48 * 1024 * 1024,
        ),
    )(x2, p["w"], b2)
    return y.reshape(orig_shape[:-1] + (N,))


# ----------------------------------------------------------------------------
# Fused multi-head attention (+ gating + query mask + output projection) kernels
# ----------------------------------------------------------------------------
def _mha_heads(q, k, v, kmask, *, num_head, scale):
    """Multi-head attention for one batch element.

    Heads are contiguous feature chunks (matches torch.split along the feature dim).
    q: (Lq, O) f32 (already gated / query-masked), k, v: (Lk, O) f32, kmask: (1, Lk) f32.
    Returns (merged update (Lq, O) f32, last-head scores (Lq, Lk), last-head probs (Lq, Lk)).
    """
    _, O = q.shape
    d = O // num_head
    outs = []
    s = p = None
    for h in range(num_head):
        lo = h * d
        qh = q[:, lo:lo + d].astype(_CDT)
        kh = k[:, lo:lo + d].astype(_CDT)
        vh = v[:, lo:lo + d].astype(_CDT)
        s = jnp.dot(qh, kh.T, preferred_element_type=jnp.float32) * scale
        s = jnp.where(kmask > 0.0, s, _MASK_NEG)          # masked_fill(mask == 0, -inf)
        m = jnp.max(s, axis=-1, keepdims=True)
        e = jnp.exp(s - m)                                # f32 elementwise (v5e-safe)
        l = jnp.sum(e, axis=-1, keepdims=True)
        p = e * pl.reciprocal(l, approx=True)             # EUP slot -> ~free
        outs.append(jnp.dot(p.astype(_CDT), vh, preferred_element_type=jnp.float32))
    upd = jnp.concatenate(outs, axis=-1)                  # lane-dense (Lq, O)
    return upd, s, p


def _inter_attn_kernel(tgtq_ref, srckv_ref, qmask_ref, kmask_ref, tgt_ref,
                       w_ref, b_ref, out_ref, logits_ref, *, num_head, O, scale):
    # One batch element per grid step; heads handled inside.
    q = tgtq_ref[0] * qmask_ref[0]            # tgt_trans * tgt_mask (query side)
    kv = srckv_ref[0]                         # packed [key | val] = src_lin(src)
    k = kv[:, :O]
    v = kv[:, O:2 * O]
    upd, s_last, _ = _mha_heads(q, k, v, kmask_ref[0], num_head=num_head, scale=scale)
    logits_ref[0] = s_last                    # only the last head is consumed downstream
    # tgt_output(cat([tgt, tgt_update])) fused here: result is still in VMEM.
    cat = jnp.concatenate([tgt_ref[0], upd], axis=-1).astype(_CDT)
    out_ref[0] = jnp.dot(cat, w_ref[...], preferred_element_type=jnp.float32) + b_ref[...]


def _intra_attn_kernel(qkv_ref, gate_ref, qmask_ref, kmask_ref, res_ref,
                       w_ref, b_ref, out_ref, probs_ref, *, num_head, O, scale):
    g = 1.0 + gate_ref[0]                     # (1, O); same gate for key/qry/val
    qkv = qkv_ref[0]                          # packed [key | qry | val]
    k = qkv[:, :O] * g
    q = qkv[:, O:2 * O] * g * qmask_ref[0]    # query-side mask (x_trans * x_mask in torch)
    v = qkv[:, 2 * O:3 * O] * g
    upd, _, p_last = _mha_heads(q, k, v, kmask_ref[0], num_head=num_head, scale=scale)
    probs_ref[0] = p_last                     # only the last head feeds trans_mat
    # x_output(x + x_update) fused here.
    res = res_ref[0] + upd
    out_ref[0] = jnp.dot(res.astype(_CDT), w_ref[...],
                         preferred_element_type=jnp.float32) + b_ref[...]


def _fused_inter_attention(tgt_qry, src_kv, src_mask, tgt_mask, tgt, out_lin,
                           num_head, output_size):
    B, Lt, O = tgt_qry.shape
    Ls = src_kv.shape[1]
    Tsz = tgt.shape[2]
    scale = 1.0 / math.sqrt(output_size // num_head)
    qm = tgt_mask[:, :, None].astype(jnp.float32)
    km = src_mask[:, None, :].astype(jnp.float32)
    b2 = out_lin["b"].reshape(1, O)

    out, logits = pl.pallas_call(
        functools.partial(_inter_attn_kernel, num_head=num_head, O=O, scale=scale),
        grid=(B,),
        in_specs=[
            pl.BlockSpec((1, Lt, O), lambda i: (i, 0, 0)),
            pl.BlockSpec((1, Ls, 2 * O), lambda i: (i, 0, 0)),
            pl.BlockSpec((1, Lt, 1), lambda i: (i, 0, 0)),
            pl.BlockSpec((1, 1, Ls), lambda i: (i, 0, 0)),
            pl.BlockSpec((1, Lt, Tsz), lambda i: (i, 0, 0)),
            pl.BlockSpec((Tsz + O, O), lambda i: (0, 0)),   # weights stay VMEM-resident
            pl.BlockSpec((1, O), lambda i: (0, 0)),
        ],
        out_specs=[
            pl.BlockSpec((1, Lt, O), lambda i: (i, 0, 0)),
            pl.BlockSpec((1, Lt, Ls), lambda i: (i, 0, 0)),
        ],
        out_shape=[
            jax.ShapeDtypeStruct((B, Lt, O), jnp.float32),
            jax.ShapeDtypeStruct((B, Lt, Ls), jnp.float32),
        ],
        compiler_params=pltpu.CompilerParams(dimension_semantics=("parallel",)),
    )(tgt_qry, src_kv, qm, km, tgt, out_lin["w"], b2)
    return out, logits


def _fused_intra_attention(qkv, gate, mask, residual, out_lin, num_head, output_size):
    B, L, _ = qkv.shape
    O = output_size
    scale = 1.0 / math.sqrt(output_size // num_head)
    qm = mask[:, :, None].astype(jnp.float32)
    km = mask[:, None, :].astype(jnp.float32)
    b2 = out_lin["b"].reshape(1, O)

    out, probs = pl.pallas_call(
        functools.partial(_intra_attn_kernel, num_head=num_head, O=O, scale=scale),
        grid=(B,),
        in_specs=[
            pl.BlockSpec((1, L, 3 * O), lambda i: (i, 0, 0)),
            pl.BlockSpec((1, 1, O), lambda i: (i, 0, 0)),
            pl.BlockSpec((1, L, 1), lambda i: (i, 0, 0)),
            pl.BlockSpec((1, 1, L), lambda i: (i, 0, 0)),
            pl.BlockSpec((1, L, O), lambda i: (i, 0, 0)),
            pl.BlockSpec((O, O), lambda i: (0, 0)),
            pl.BlockSpec((1, O), lambda i: (0, 0)),
        ],
        out_specs=[
            pl.BlockSpec((1, L, O), lambda i: (i, 0, 0)),
            pl.BlockSpec((1, L, L), lambda i: (i, 0, 0)),
        ],
        out_shape=[
            jax.ShapeDtypeStruct((B, L, O), jnp.float32),
            jax.ShapeDtypeStruct((B, L, L), jnp.float32),
        ],
        compiler_params=pltpu.CompilerParams(dimension_semantics=("parallel",)),
    )(qkv, gate, qm, km, residual, out_lin["w"], b2)
    return out, probs


# ----------------------------------------------------------------------------
# Module-level forward functions (parameters = plain dicts of jnp arrays)
# ----------------------------------------------------------------------------
def one_side_inter_forward(p, src, tgt, src_mask, tgt_mask, num_head, output_size):
    """OneSideInterModalityUpdate.forward"""
    src_kv = linear(src, p["src_lin"])    # (B, Ns, 2*O) packed [key | val]
    tgt_qry = linear(tgt, p["tgt_lin"])   # (B, Nt, O)
    # src_mask multiply on key/val is absorbed by the in-kernel score mask (masked key
    # columns get prob exactly 0); tgt_mask multiply is applied in-kernel to the query.
    update_tgt, src2tgt_last = _fused_inter_attention(
        tgt_qry, src_kv, src_mask, tgt_mask, tgt, p["tgt_output"],
        num_head, output_size)
    return update_tgt, src2tgt_last


def dy_intra_forward(p, v, q, v_mask, q_mask, q_trans, num_head, output_size):
    """DyIntraModalityUpdate.forward (APPLY_MASK=True path)."""
    v_mean = (v * v_mask[:, :, None]).sum(1) / v_mask.sum(1, keepdims=True)
    q_mean = (q * q_mask[:, :, None]).sum(1) / q_mask.sum(1, keepdims=True)
    if q_trans is not None:
        q_mean = q_trans

    v4q_gate = jax.nn.sigmoid(linear(v_mean, p["v4q_gate_lin"]))[:, None, :]   # (B,1,O)
    q4v_gate = jax.nn.sigmoid(linear(q_mean, p["q4v_gate_lin"]))[:, None, :]   # (B,1,O)

    v_qkv = linear(v, p["v_lin"])   # (B, No, 3*O) packed [key | qry | val]
    q_qkv = linear(q, p["q_lin"])   # (B, Lq, 3*O)

    updated_v, v_probs_last = _fused_intra_attention(
        v_qkv, q4v_gate, v_mask, v, p["v_output"], num_head, output_size)
    updated_q, _ = _fused_intra_attention(
        q_qkv, v4q_gate, q_mask, q, p["q_output"], num_head, output_size)

    # torch: F.softmax(v2v, dim=2).transpose(-1, -2) of the last head
    trans_mat = jnp.swapaxes(v_probs_last, -1, -2)
    return updated_v, updated_q, trans_mat


def multi_block_forward(params, cfg, v, q, v_mask, q_mask, hidden_trans):
    """MultiBlock.forward"""
    num_block = cfg["num_block"]
    output_size = cfg["output_size"]
    n_inter = cfg["num_inter_head"]
    n_intra = cfg["num_intra_head"]

    if hidden_trans is not None:
        max_len = hidden_trans.shape[0]
        ht = linear(hidden_trans, params["trans_lin"])  # (max_len, B, O)
    else:
        max_len = 0
        ht = None

    v = linear(v, params["v_lin"])
    q = linear(q, params["q_lin"])

    v_container = [v]
    q_container = [q]
    result_v = [v]
    result_q = [q]
    logist_seq = []
    transmat_seq = []

    for i in range(num_block):
        bp = params["blocks"][i]
        q1, _q_logits = one_side_inter_forward(
            bp["inter_vq"], v_container[-1], q_container[-1], v_mask, q_mask,
            n_inter, output_size)
        q_container.append(q1)

        v1, v_logits = one_side_inter_forward(
            bp["inter_qv"], q_container[-1] + q_container[-2], v_container[-1],
            q_mask, v_mask, n_inter, output_size)
        v_container.append(v1)

        q_trans_i = ht[i] if (hidden_trans is not None and i < max_len) else None
        v2, q2, trans_mat = dy_intra_forward(
            bp["intra"], v_container[-1] + v_container[-2],
            q_container[-1] + q_container[-2], v_mask, q_mask, q_trans_i,
            n_intra, output_size)
        v_container.append(v2)
        q_container.append(q2)

        result_v += [v1, v2]
        result_q += [q1, q2]

        v_container.append(v_container[-1] + v_container[-2] + v_container[-3])
        q_container.append(q_container[-1] + q_container[-2] + q_container[-3])
        logist_seq.append(v_logits)
        transmat_seq.append(trans_mat)

    return sum(result_v), sum(result_q), logist_seq, transmat_seq


# ----------------------------------------------------------------------------
# Deterministic parameter initialization (weight_norm(Linear) == plain Linear).
# Weights are stored bf16 (MXU feed, halves weight HBM traffic); biases/accum in f32.
# ----------------------------------------------------------------------------
def init_linear(key, in_size, out_size):
    k1, k2 = jax.random.split(key)
    w = jax.random.normal(k1, (in_size, out_size), jnp.float32) * 0.05
    b = jax.random.normal(k2, (out_size,), jnp.float32) * 0.05
    return {"w": w.astype(jnp.bfloat16), "b": b}


def init_one_side_inter(key, src_size, tgt_size, output_size):
    k1, k2, k3 = jax.random.split(key, 3)
    return {
        "src_lin": init_linear(k1, src_size, output_size * 2),
        "tgt_lin": init_linear(k2, tgt_size, output_size),
        "tgt_output": init_linear(k3, output_size + tgt_size, output_size),
    }


def init_dy_intra(key, v_size, q_size, output_size):
    ks = jax.random.split(key, 6)
    return {
        "v4q_gate_lin": init_linear(ks[0], v_size, output_size),
        "q4v_gate_lin": init_linear(ks[1], q_size, output_size),
        "v_lin": init_linear(ks[2], v_size, output_size * 3),
        "q_lin": init_linear(ks[3], q_size, output_size * 3),
        "v_output": init_linear(ks[4], output_size, output_size),
        "q_output": init_linear(ks[5], output_size, output_size),
    }


def init_multi_block(key, num_block, v_size, q_size, output_size):
    ks = jax.random.split(key, 3 + num_block)
    params = {
        "v_lin": init_linear(ks[0], v_size, output_size),
        "q_lin": init_linear(ks[1], q_size, output_size),
        "trans_lin": init_linear(ks[2], q_size, output_size),
        "blocks": [],
    }
    for i in range(num_block):
        b1, b2, b3 = jax.random.split(ks[3 + i], 3)
        params["blocks"].append({
            "inter_vq": init_one_side_inter(b1, output_size, output_size, output_size),
            "inter_qv": init_one_side_inter(b2, output_size, output_size, output_size),
            "intra": init_dy_intra(b3, output_size, output_size, output_size),
        })
    return params


# ----------------------------------------------------------------------------
# Demo
# ----------------------------------------------------------------------------
if __name__ == "__main__":
    batch = 2
    num_obj = 8       # visual objects
    max_len = 8       # question tokens
    v_size = 32
    q_size = 32
    output_size = 32
    num_inter_head = 4
    num_intra_head = 4
    num_block = 2

    cfg = dict(num_block=num_block, output_size=output_size,
               num_inter_head=num_inter_head, num_intra_head=num_intra_head)

    root = jax.random.PRNGKey(0)
    kp, kv, kq, kh = jax.random.split(root, 4)

    params = init_multi_block(kp, num_block, v_size, q_size, output_size)

    v = jax.random.normal(kv, (batch, num_obj, v_size), jnp.float32)
    q = jax.random.normal(kq, (batch, max_len, q_size), jnp.float32)
    hidden_trans = jax.random.normal(kh, (num_block, batch, q_size), jnp.float32)

    v_mask = jnp.ones((batch, num_obj), jnp.float32)
    q_mask = jnp.ones((batch, max_len), jnp.float32).at[1, -1].set(0.0)  # exercise masking

    fwd = jax.jit(lambda p_, v_, q_, vm_, qm_, ht_: multi_block_forward(
        p_, cfg, v_, q_, vm_, qm_, ht_))

    out_v, out_q, logist_seq, transmat_seq = fwd(params, v, q, v_mask, q_mask, hidden_trans)

    jax.block_until_ready(out_v)
    jax.block_until_ready(out_q)
    for a in logist_seq + transmat_seq:
        jax.block_until_ready(a)

    assert out_v.shape == (batch, num_obj, output_size)
    assert out_q.shape == (batch, max_len, output_size)
    assert len(logist_seq) == num_block and len(transmat_seq) == num_block
    assert logist_seq[0].shape == (batch, num_obj, max_len)
    assert transmat_seq[0].shape == (batch, num_obj, num_obj)
    assert bool(jnp.all(jnp.isfinite(out_v))) and bool(jnp.all(jnp.isfinite(out_q)))

    print("KERNEL_OK")
</pallas_src>

<mosaic_0001>
module attributes {stable_mosaic.version = 11 : i64} {
  func.func @_linear_kernel(%arg0: i32, %arg1: i32, %arg2: i32, %arg3: memref<16x32xf32, #tpu.memory_space<vmem>>, %arg4: memref<32x64xbf16, #tpu.memory_space<vmem>>, %arg5: memref<1x64xf32, #tpu.memory_space<vmem>>, %arg6: memref<16x64xf32, #tpu.memory_space<vmem>>, %arg7: memref<16x64xf32, #tpu.memory_space<vmem>>) attributes {dimension_semantics = [#tpu.dimension_semantics<parallel>, #tpu.dimension_semantics<parallel>, #tpu.dimension_semantics<arbitrary>], iteration_bounds = array<i64: 1, 1, 1>, scalar_prefetch = 0 : i64, scratch_operands = 1 : i64, tpu.core_type = #tpu.core_type<tc>, window_params = [{transform_indices = @transform_0, window_bounds = array<i64: 16, 32>}, {transform_indices = @transform_1, window_bounds = array<i64: 32, 64>}, {transform_indices = @transform_2, window_bounds = array<i64: 1, 64>}, {transform_indices = @transform_3, window_bounds = array<i64: 16, 64>}]} {
    %c0_i32 = arith.constant 0 : i32
    %0 = arith.cmpi eq, %arg2, %c0_i32 : i32
    %1 = arith.extui %0 : i1 to i32
    %c0_i32_0 = arith.constant 0 : i32
    %2 = arith.cmpi ne, %1, %c0_i32_0 : i32
    scf.if %2 {
      %cst_10 = arith.constant 0.000000e+00 : f32
      %13 = vector.broadcast %cst_10 : f32 to vector<16x64xf32>
      %c0_11 = arith.constant 0 : index
      %c0_12 = arith.constant 0 : index
      %14 = vector.load %arg7[%c0_11, %c0_12] : memref<16x64xf32, #tpu.memory_space<vmem>>, vector<16x64xf32>
      tpu.vector_store %arg7[%c0_11, %c0_12], %13 {strides = array<i32>} : memref<16x64xf32, #tpu.memory_space<vmem>>, vector<16x64xf32>,
    } else {
    }
    %c0 = arith.constant 0 : index
    %c0_1 = arith.constant 0 : index
    %3 = vector.load %arg7[%c0, %c0_1] : memref<16x64xf32, #tpu.memory_space<vmem>>, vector<16x64xf32>
    %c0_2 = arith.constant 0 : index
    %c0_3 = arith.constant 0 : index
    %4 = vector.load %arg3[%c0_2, %c0_3] : memref<16x32xf32, #tpu.memory_space<vmem>>, vector<16x32xf32>
    %5 = arith.truncf %4 : vector<16x32xf32> to vector<16x32xbf16>
    %c0_4 = arith.constant 0 : index
    %c0_5 = arith.constant 0 : index
    %6 = vector.load %arg4[%c0_4, %c0_5] : memref<32x64xbf16, #tpu.memory_space<vmem>>, vector<32x64xbf16>
    %cst = arith.constant dense<0.000000e+00> : vector<16x64xf32>
    %7 = tpu.matmul %5, %6, %cst {dimension_numbers = #tpu.dot_dimension_numbers<[1], [0], [0], [1], [0, 0, 1, 1], [], []>} : vector<16x32xbf16>, vector<32x64xbf16>, vector<16x64xf32> -> vector<16x64xf32>
    %8 = arith.addf %3, %7 : vector<16x64xf32>
    %c0_6 = arith.constant 0 : index
    %c0_7 = arith.constant 0 : index
    %9 = vector.load %arg7[%c0_6, %c0_7] : memref<16x64xf32, #tpu.memory_space<vmem>>, vector<16x64xf32>
    tpu.vector_store %arg7[%c0_6, %c0_7], %8 {strides = array<i32>} : memref<16x64xf32, #tpu.memory_space<vmem>>, vector<16x64xf32>,
    %c0_i32_8 = arith.constant 0 : i32
    %10 = arith.cmpi eq, %arg2, %c0_i32_8 : i32
    %11 = arith.extui %10 : i1 to i32
    %c0_i32_9 = arith.constant 0 : i32
    %12 = arith.cmpi ne, %11, %c0_i32_9 : i32
    scf.if %12 {
      %c0_10 = arith.constant 0 : index
      %c0_11 = arith.constant 0 : index
      %13 = vector.load %arg7[%c0_10, %c0_11] : memref<16x64xf32, #tpu.memory_space<vmem>>, vector<16x64xf32>
      %c0_12 = arith.constant 0 : index
      %c0_13 = arith.constant 0 : index
      %14 = vector.load %arg5[%c0_12, %c0_13] : memref<1x64xf32, #tpu.memory_space<vmem>>, vector<1x64xf32>
      %15 = vector.broadcast %14 : vector<1x64xf32> to vector<16x64xf32>
      %16 = arith.addf %13, %15 : vector<16x64xf32>
      %c0_14 = arith.constant 0 : index
      %c0_15 = arith.constant 0 : index
      %17 = vector.load %arg6[%c0_14, %c0_15] : memref<16x64xf32, #tpu.memory_space<vmem>>, vector<16x64xf32>
      tpu.vector_store %arg6[%c0_14, %c0_15], %16 {strides = array<i32>} : memref<16x64xf32, #tpu.memory_space<vmem>>, vector<16x64xf32>,
    } else {
    }
    return
  }
  func.func @transform_0(%arg0: i32, %arg1: i32, %arg2: i32) -> (i32, i32) {
    %c0_i32 = arith.constant 0 : i32
    return %arg0, %arg2 : i32, i32
  }
  func.func @transform_1(%arg0: i32, %arg1: i32, %arg2: i32) -> (i32, i32) {
    %c0_i32 = arith.constant 0 : i32
    return %arg2, %arg1 : i32, i32
  }
  func.func @transform_2(%arg0: i32, %arg1: i32, %arg2: i32) -> (i32, i32) {
    %c0_i32 = arith.constant 0 : i32
    %c0_i32_0 = arith.constant 0 : i32
    return %c0_i32, %arg1 : i32, i32
  }
  func.func @transform_3(%arg0: i32, %arg1: i32, %arg2: i32) -> (i32, i32) {
    %c0_i32 = arith.constant 0 : i32
    return %arg0, %arg1 : i32, i32
  }
}

module attributes {stable_mosaic.version = 11 : i64} {
  func.func @_linear_kernel(%arg0: i32, %arg1: i32, %arg2: i32, %arg3: memref<16x32xf32, #tpu.memory_space<vmem>>, %arg4: memref<32x32xbf16, #tpu.memory_space<vmem>>, %arg5: memref<1x32xf32, #tpu.memory_space<vmem>>, %arg6: memref<16x32xf32, #tpu.memory_space<vmem>>, %arg7: memref<16x32xf32, #tpu.memory_space<vmem>>) attributes {dimension_semantics = [#tpu.dimension_semantics<parallel>, #tpu.dimension_semantics<parallel>, #tpu.dimension_semantics<arbitrary>], iteration_bounds = array<i64: 1, 1, 1>, scalar_prefetch = 0 : i64, scratch_operands = 1 : i64, tpu.core_type = #tpu.core_type<tc>, window_params = [{transform_indices = @transform_0, window_bounds = array<i64: 16, 32>}, {transform_indices = @transform_1, window_bounds = array<i64: 32, 32>}, {transform_indices = @transform_2, window_bounds = array<i64: 1, 32>}, {transform_indices = @transform_3, window_bounds = array<i64: 16, 32>}]} {
    %c0_i32 = arith.constant 0 : i32
    %0 = arith.cmpi eq, %arg2, %c0_i32 : i32
    %1 = arith.extui %0 : i1 to i32
    %c0_i32_0 = arith.constant 0 : i32
    %2 = arith.cmpi ne, %1, %c0_i32_0 : i32
    scf.if %2 {
      %cst_10 = arith.constant 0.000000e+00 : f32
      %13 = vector.broadcast %cst_10 : f32 to vector<16x32xf32>
      %c0_11 = arith.constant 0 : index
      %c0_12 = arith.constant 0 : index
      %14 = vector.load %arg7[%c0_11, %c0_12] : memref<16x32xf32, #tpu.memory_space<vmem>>, vector<16x32xf32>
      tpu.vector_store %arg7[%c0_11, %c0_12], %13 {strides = array<i32>} : memref<16x32xf32, #tpu.memory_space<vmem>>, vector<16x32xf32>,
    } else {
    }
    %c0 = arith.constant 0 : index
    %c0_1 = arith.constant 0 : index
    %3 = vector.load %arg7[%c0, %c0_1] : memref<16x32xf32, #tpu.memory_space<vmem>>, vector<16x32xf32>
    %c0_2 = arith.constant 0 : index
    %c0_3 = arith.constant 0 : index
    %4 = vector.load %arg3[%c0_2, %c0_3] : memref<16x32xf32, #tpu.memory_space<vmem>>, vector<16x32xf32>
    %5 = arith.truncf %4 : vector<16x32xf32> to vector<16x32xbf16>
    %c0_4 = arith.constant 0 : index
    %c0_5 = arith.constant 0 : index
    %6 = vector.load %arg4[%c0_4, %c0_5] : memref<32x32xbf16, #tpu.memory_space<vmem>>, vector<32x32xbf16>
    %cst = arith.constant dense<0.000000e+00> : vector<16x32xf32>
    %7 = tpu.matmul %5, %6, %cst {dimension_numbers = #tpu.dot_dimension_numbers<[1], [0], [0], [1], [0, 0, 1, 1], [], []>} : vector<16x32xbf16>, vector<32x32xbf16>, vector<16x32xf32> -> vector<16x32xf32>
    %8 = arith.addf %3, %7 : vector<16x32xf32>
    %c0_6 = arith.constant 0 : index
    %c0_7 = arith.constant 0 : index
    %9 = vector.load %arg7[%c0_6, %c0_7] : memref<16x32xf32, #tpu.memory_space<vmem>>, vector<16x32xf32>
    tpu.vector_store %arg7[%c0_6, %c0_7], %8 {strides = array<i32>} : memref<16x32xf32, #tpu.memory_space<vmem>>, vector<16x32xf32>,
    %c0_i32_8 = arith.constant 0 : i32
    %10 = arith.cmpi eq, %arg2, %c0_i32_8 : i32
    %11 = arith.extui %10 : i1 to i32
    %c0_i32_9 = arith.constant 0 : i32
    %12 = arith.cmpi ne, %11, %c0_i32_9 : i32
    scf.if %12 {
      %c0_10 = arith.constant 0 : index
      %c0_11 = arith.constant 0 : index
      %13 = vector.load %arg7[%c0_10, %c0_11] : memref<16x32xf32, #tpu.memory_space<vmem>>, vector<16x32xf32>
      %c0_12 = arith.constant 0 : index
      %c0_13 = arith.constant 0 : index
      %14 = vector.load %arg5[%c0_12, %c0_13] : memref<1x32xf32, #tpu.memory_space<vmem>>, vector<1x32xf32>
      %15 = vector.broadcast %14 : vector<1x32xf32> to vector<16x32xf32>
      %16 = arith.addf %13, %15 : vector<16x32xf32>
      %c0_14 = arith.constant 0 : index
      %c0_15 = arith.constant 0 : index
      %17 = vector.load %arg6[%c0_14, %c0_15] : memref<16x32xf32, #tpu.memory_space<vmem>>, vector<16x32xf32>
      tpu.vector_store %arg6[%c0_14, %c0_15], %16 {strides = array<i32>} : memref<16x32xf32, #tpu.memory_space<vmem>>, vector<16x32xf32>,
    } else {
    }
    return
  }
  func.func @transform_0(%arg0: i32, %arg1: i32, %arg2: i32) -> (i32, i32) {
    %c0_i32 = arith.constant 0 : i32
    return %arg0, %arg2 : i32, i32
  }
  func.func @transform_1(%arg0: i32, %arg1: i32, %arg2: i32) -> (i32, i32) {
    %c0_i32 = arith.constant 0 : i32
    return %arg2, %arg1 : i32, i32
  }
  func.func @transform_2(%arg0: i32, %arg1: i32, %arg2: i32) -> (i32, i32) {
    %c0_i32 = arith.constant 0 : i32
    %c0_i32_0 = arith.constant 0 : i32
    return %c0_i32, %arg1 : i32, i32
  }
  func.func @transform_3(%arg0: i32, %arg1: i32, %arg2: i32) -> (i32, i32) {
    %c0_i32 = arith.constant 0 : i32
    return %arg0, %arg1 : i32, i32
  }
}

module attributes {stable_mosaic.version = 11 : i64} {
  func.func @_linear_kernel(%arg0: i32, %arg1: i32, %arg2: i32, %arg3: memref<16x32xf32, #tpu.memory_space<vmem>>, %arg4: memref<32x32xbf16, #tpu.memory_space<vmem>>, %arg5: memref<1x32xf32, #tpu.memory_space<vmem>>, %arg6: memref<16x32xf32, #tpu.memory_space<vmem>>, %arg7: memref<16x32xf32, #tpu.memory_space<vmem>>) attributes {dimension_semantics = [#tpu.dimension_semantics<parallel>, #tpu.dimension_semantics<parallel>, #tpu.dimension_semantics<arbitrary>], iteration_bounds = array<i64: 1, 1, 1>, scalar_prefetch = 0 : i64, scratch_operands = 1 : i64, tpu.core_type = #tpu.core_type<tc>, window_params = [{transform_indices = @transform_0, window_bounds = array<i64: 16, 32>}, {transform_indices = @transform_1, window_bounds = array<i64: 32, 32>}, {transform_indices = @transform_2, window_bounds = array<i64: 1, 32>}, {transform_indices = @transform_3, window_bounds = array<i64: 16, 32>}]} {
    %c0_i32 = arith.constant 0 : i32
    %0 = arith.cmpi eq, %arg2, %c0_i32 : i32
    %1 = arith.extui %0 : i1 to i32
    %c0_i32_0 = arith.constant 0 : i32
    %2 = arith.cmpi ne, %1, %c0_i32_0 : i32
    scf.if %2 {
      %cst_10 = arith.constant 0.000000e+00 : f32
      %13 = vector.broadcast %cst_10 : f32 to vector<16x32xf32>
      %c0_11 = arith.constant 0 : index
      %c0_12 = arith.constant 0 : index
      %14 = vector.load %arg7[%c0_11, %c0_12] : memref<16x32xf32, #tpu.memory_space<vmem>>, vector<16x32xf32>
      tpu.vector_store %arg7[%c0_11, %c0_12], %13 {strides = array<i32>} : memref<16x32xf32, #tpu.memory_space<vmem>>, vector<16x32xf32>,
    } else {
    }
    %c0 = arith.constant 0 : index
    %c0_1 = arith.constant 0 : index
    %3 = vector.load %arg7[%c0, %c0_1] : memref<16x32xf32, #tpu.memory_space<vmem>>, vector<16x32xf32>
    %c0_2 = arith.constant 0 : index
    %c0_3 = arith.constant 0 : index
    %4 = vector.load %arg3[%c0_2, %c0_3] : memref<16x32xf32, #tpu.memory_space<vmem>>, vector<16x32xf32>
    %5 = arith.truncf %4 : vector<16x32xf32> to vector<16x32xbf16>
    %c0_4 = arith.constant 0 : index
    %c0_5 = arith.constant 0 : index
    %6 = vector.load %arg4[%c0_4, %c0_5] : memref<32x32xbf16, #tpu.memory_space<vmem>>, vector<32x32xbf16>
    %cst = arith.constant dense<0.000000e+00> : vector<16x32xf32>
    %7 = tpu.matmul %5, %6, %cst {dimension_numbers = #tpu.dot_dimension_numbers<[1], [0], [0], [1], [0, 0, 1, 1], [], []>} : vector<16x32xbf16>, vector<32x32xbf16>, vector<16x32xf32> -> vector<16x32xf32>
    %8 = arith.addf %3, %7 : vector<16x32xf32>
    %c0_6 = arith.constant 0 : index
    %c0_7 = arith.constant 0 : index
    %9 = vector.load %arg7[%c0_6, %c0_7] : memref<16x32xf32, #tpu.memory_space<vmem>>, vector<16x32xf32>
    tpu.vector_store %arg7[%c0_6, %c0_7], %8 {strides = array<i32>} : memref<16x32xf32, #tpu.memory_space<vmem>>, vector<16x32xf32>,
    %c0_i32_8 = arith.constant 0 : i32
    %10 = arith.cmpi eq, %arg2, %c0_i32_8 : i32
    %11 = arith.extui %10 : i1 to i32
    %c0_i32_9 = arith.constant 0 : i32
    %12 = arith.cmpi ne, %11, %c0_i32_9 : i32
    scf.if %12 {
      %c0_10 = arith.constant 0 : index
      %c0_11 = arith.constant 0 : index
      %13 = vector.load %arg7[%c0_10, %c0_11] : memref<16x32xf32, #tpu.memory_space<vmem>>, vector<16x32xf32>
      %c0_12 = arith.constant 0 : index
      %c0_13 = arith.constant 0 : index
      %14 = vector.load %arg5[%c0_12, %c0_13] : memref<1x32xf32, #tpu.memory_space<vmem>>, vector<1x32xf32>
      %15 = vector.broadcast %14 : vector<1x32xf32> to vector<16x32xf32>
      %16 = arith.addf %13, %15 : vector<16x32xf32>
      %c0_14 = arith.constant 0 : index
      %c0_15 = arith.constant 0 : index
      %17 = vector.load %arg6[%c0_14, %c0_15] : memref<16x32xf32, #tpu.memory_space<vmem>>, vector<16x32xf32>
      tpu.vector_store %arg6[%c0_14, %c0_15], %16 {strides = array<i32>} : memref<16x32xf32, #tpu.memory_space<vmem>>, vector<16x32xf32>,
    } else {
    }
    return
  }
  func.func @transform_0(%arg0: i32, %arg1: i32, %arg2: i32) -> (i32, i32) {
    %c0_i32 = arith.constant 0 : i32
    return %arg0, %arg2 : i32, i32
  }
  func.func @transform_1(%arg0: i32, %arg1: i32, %arg2: i32) -> (i32, i32) {
    %c0_i32 = arith.constant 0 : i32
    return %arg2, %arg1 : i32, i32
  }
  func.func @transform_2(%arg0: i32, %arg1: i32, %arg2: i32) -> (i32, i32) {
    %c0_i32 = arith.constant 0 : i32
    %c0_i32_0 = arith.constant 0 : i32
    return %c0_i32, %arg1 : i32, i32
  }
  func.func @transform_3(%arg0: i32, %arg1: i32, %arg2: i32) -> (i32, i32) {
    %c0_i32 = arith.constant 0 : i32
    return %arg0, %arg1 : i32, i32
  }
}

module attributes {stable_mosaic.version = 11 : i64} {
  func.func @_inter_attn_kernel(%arg0: i32, %arg1: memref<1x8x32xf32, #tpu.memory_space<vmem>>, %arg2: memref<1x8x64xf32, #tpu.memory_space<vmem>>, %arg3: memref<1x8x1xf32, #tpu.memory_space<vmem>>, %arg4: memref<1x1x8xf32, #tpu.memory_space<vmem>>, %arg5: memref<1x8x32xf32, #tpu.memory_space<vmem>>, %arg6: memref<64x32xbf16, #tpu.memory_space<vmem>>, %arg7: memref<1x32xf32, #tpu.memory_space<vmem>>, %arg8: memref<1x8x32xf32, #tpu.memory_space<vmem>>, %arg9: memref<1x8x8xf32, #tpu.memory_space<vmem>>) attributes {dimension_semantics = [#tpu.dimension_semantics<parallel>], iteration_bounds = array<i64: 2>, scalar_prefetch = 0 : i64, scratch_operands = 0 : i64, tpu.core_type = #tpu.core_type<tc>, window_params = [{transform_indices = @transform_0, window_bounds = array<i64: 1, 8, 32>}, {transform_indices = @transform_1, window_bounds = array<i64: 1, 8, 64>}, {transform_indices = @transform_2, window_bounds = array<i64: 1, 8, 1>}, {transform_indices = @transform_3, window_bounds = array<i64: 1, 1, 8>}, {transform_indices = @transform_4, window_bounds = array<i64: 1, 8, 32>}, {pipeline_mode = #tpu.pipeline_mode<synchronous>, transform_indices = @transform_5, window_bounds = array<i64: 64, 32>}, {pipeline_mode = #tpu.pipeline_mode<synchronous>, transform_indices = @transform_6, window_bounds = array<i64: 1, 32>}, {transform_indices = @transform_7, window_bounds = array<i64: 1, 8, 32>}, {transform_indices = @transform_8, window_bounds = array<i64: 1, 8, 8>}]} {
    %c0 = arith.constant 0 : index
    %c0_0 = arith.constant 0 : index
    %c0_1 = arith.constant 0 : index
    %0 = vector.load %arg1[%c0, %c0_0, %c0_1] : memref<1x8x32xf32, #tpu.memory_space<vmem>>, vector<1x8x32xf32>
    %1 = vector.shape_cast %0 : vector<1x8x32xf32> to vector<8x32xf32>
    %c0_2 = arith.constant 0 : index
    %c0_3 = arith.constant 0 : index
    %c0_4 = arith.constant 0 : index
    %2 = vector.load %arg3[%c0_2, %c0_3, %c0_4] : memref<1x8x1xf32, #tpu.memory_space<vmem>>, vector<1x8x1xf32>
    %3 = vector.shape_cast %2 : vector<1x8x1xf32> to vector<8x1xf32>
    %4 = vector.broadcast %3 : vector<8x1xf32> to vector<8x32xf32>
    %5 = arith.mulf %1, %4 : vector<8x32xf32>
    %c0_5 = arith.constant 0 : index
    %c0_6 = arith.constant 0 : index
    %c0_7 = arith.constant 0 : index
    %6 = vector.load %arg2[%c0_5, %c0_6, %c0_7] : memref<1x8x64xf32, #tpu.memory_space<vmem>>, vector<1x8x64xf32>
    %7 = vector.shape_cast %6 : vector<1x8x64xf32> to vector<8x64xf32>
    %8 = vector.extract_strided_slice %7 {offsets = [0, 0], sizes = [8, 32], strides = [1, 1]} : vector<8x64xf32> to vector<8x32xf32>
    %9 = vector.extract_strided_slice %7 {offsets = [0, 32], sizes = [8, 32], strides = [1, 1]} : vector<8x64xf32> to vector<8x32xf32>
    %c0_8 = arith.constant 0 : index
    %c0_9 = arith.constant 0 : index
    %c0_10 = arith.constant 0 : index
    %10 = vector.load %arg4[%c0_8, %c0_9, %c0_10] : memref<1x1x8xf32, #tpu.memory_space<vmem>>, vector<1x1x8xf32>
    %11 = vector.shape_cast %10 : vector<1x1x8xf32> to vector<1x8xf32>
    %12 = vector.extract_strided_slice %5 {offsets = [0, 0], sizes = [8, 8], strides = [1, 1]} : vector<8x32xf32> to vector<8x8xf32>
    %13 = arith.truncf %12 : vector<8x8xf32> to vector<8x8xbf16>
    %14 = vector.extract_strided_slice %8 {offsets = [0, 0], sizes = [8, 8], strides = [1, 1]} : vector<8x32xf32> to vector<8x8xf32>
    %15 = arith.truncf %14 : vector<8x8xf32> to vector<8x8xbf16>
    %16 = vector.extract_strided_slice %9 {offsets = [0, 0], sizes = [8, 8], strides = [1, 1]} : vector<8x32xf32> to vector<8x8xf32>
    %17 = arith.truncf %16 : vector<8x8xf32> to vector<8x8xbf16>
    %18 = tpu.transpose %15, [1, 0] : vector<8x8xbf16> -> vector<8x8xbf16>
    %cst = arith.constant dense<0.000000e+00> : vector<8x8xf32>
    %19 = tpu.matmul %13, %18, %cst {dimension_numbers = #tpu.dot_dimension_numbers<[1], [0], [0], [1], [0, 0, 1, 1], [], []>} : vector<8x8xbf16>, vector<8x8xbf16>, vector<8x8xf32> -> vector<8x8xf32>
    %cst_11 = arith.constant 0.353553385 : f32
    %20 = vector.broadcast %cst_11 : f32 to vector<8x8xf32>
    %21 = arith.mulf %19, %20 : vector<8x8xf32>
    %cst_12 = arith.constant 0.000000e+00 : f32
    %22 = vector.broadcast %cst_12 : f32 to vector<1x8xf32>
    %23 = arith.cmpf ogt, %11, %22 : vector<1x8xf32>
    %cst_13 = arith.constant -1.000000e+30 : f32
    %24 = vector.shape_cast %23 : vector<1x8xi1> to vector<1x8xi1>
    %25 = vector.broadcast %24 : vector<1x8xi1> to vector<8x8xi1>
    %26 = vector.broadcast %cst_13 : f32 to vector<8x8xf32>
    %27 = arith.select %25, %21, %26 : vector<8x8xi1>, vector<8x8xf32>
    %cst_14 = arith.constant dense<0xFF800000> : vector<8xf32>
    %28 = vector.multi_reduction <maximumf>, %27, %cst_14 [1] : vector<8x8xf32> to vector<8xf32>
    %29 = vector.shape_cast %28 : vector<8xf32> to vector<8x1xf32>
    %30 = vector.broadcast %29 : vector<8x1xf32> to vector<8x8xf32>
    %31 = arith.subf %27, %30 : vector<8x8xf32>
    %32 = math.exp %31 : vector<8x8xf32>
    %cst_15 = arith.constant dense<0.000000e+00> : vector<8xf32>
    %33 = vector.multi_reduction <add>, %32, %cst_15 [1] : vector<8x8xf32> to vector<8xf32>
    %34 = vector.shape_cast %33 : vector<8xf32> to vector<8x1xf32>
    %35 = tpu.reciprocal %34 {approx = true} : vector<8x1xf32> -> vector<8x1xf32>
    %36 = vector.broadcast %35 : vector<8x1xf32> to vector<8x8xf32>
    %37 = arith.mulf %32, %36 : vector<8x8xf32>
    %38 = arith.truncf %37 : vector<8x8xf32> to vector<8x8xbf16>
    %cst_16 = arith.constant dense<0.000000e+00> : vector<8x8xf32>
    %39 = tpu.matmul %38, %17, %cst_16 {dimension_numbers = #tpu.dot_dimension_numbers<[1], [0], [0], [1], [0, 0, 1, 1], [], []>} : vector<8x8xbf16>, vector<8x8xbf16>, vector<8x8xf32> -> vector<8x8xf32>
    %40 = vector.extract_strided_slice %5 {offsets = [0, 8], sizes = [8, 8], strides = [1, 1]} : vector<8x32xf32> to vector<8x8xf32>
    %41 = arith.truncf %40 : vector<8x8xf32> to vector<8x8xbf16>
    %42 = vector.extract_strided_slice %8 {offsets = [0, 8], sizes = [8, 8], strides = [1, 1]} : vector<8x32xf32> to vector<8x8xf32>
    %43 = arith.truncf %42 : vector<8x8xf32> to vector<8x8xbf16>
    %44 = vector.extract_strided_slice %9 {offsets = [0, 8], sizes = [8, 8], strides = [1, 1]} : vector<8x32xf32> to vector<8x8xf32>
    %45 = arith.truncf %44 : vector<8x8xf32> to vector<8x8xbf16>
    %46 = tpu.transpose %43, [1, 0] : vector<8x8xbf16> -> vector<8x8xbf16>
    %cst_17 = arith.constant dense<0.000000e+00> : vector<8x8xf32>
    %47 = tpu.matmul %41, %46, %cst_17 {dimension_numbers = #tpu.dot_dimension_numbers<[1], [0], [0], [1], [0, 0, 1, 1], [], []>} : vector<8x8xbf16>, vector<8x8xbf16>, vector<8x8xf32> -> vector<8x8xf32>
    %cst_18 = arith.constant 0.353553385 : f32
    %48 = vector.broadcast %cst_18 : f32 to vector<8x8xf32>
    %49 = arith.mulf %47, %48 : vector<8x8xf32>
    %cst_19 = arith.constant 0.000000e+00 : f32
    %50 = vector.broadcast %cst_19 : f32 to vector<1x8xf32>
    %51 = arith.cmpf ogt, %11, %50 : vector<1x8xf32>
    %cst_20 = arith.constant -1.000000e+30 : f32
    %52 = vector.shape_cast %51 : vector<1x8xi1> to vector<1x8xi1>
    %53 = vector.broadcast %52 : vector<1x8xi1> to vector<8x8xi1>
    %54 = vector.broadcast %cst_20 : f32 to vector<8x8xf32>
    %55 = arith.select %53, %49, %54 : vector<8x8xi1>, vector<8x8xf32>
    %cst_21 = arith.constant dense<0xFF800000> : vector<8xf32>
    %56 = vector.multi_reduction <maximumf>, %55, %cst_21 [1] : vector<8x8xf32> to vector<8xf32>
    %57 = vector.shape_cast %56 : vector<8xf32> to vector<8x1xf32>
    %58 = vector.broadcast %57 : vector<8x1xf32> to vector<8x8xf32>
    %59 = arith.subf %55, %58 : vector<8x8xf32>
    %60 = math.exp %59 : vector<8x8xf32>
    %cst_22 = arith.constant dense<0.000000e+00> : vector<8xf32>
    %61 = vector.multi_reduction <add>, %60, %cst_22 [1] : vector<8x8xf32> to vector<8xf32>
    %62 = vector.shape_cast %61 : vector<8xf32> to vector<8x1xf32>
    %63 = tpu.reciprocal %62 {approx = true} : vector<8x1xf32> -> vector<8x1xf32>
    %64 = vector.broadcast %63 : vector<8x1xf32> to vector<8x8xf32>
    %65 = arith.mulf %60, %64 : vector<8x8xf32>
    %66 = arith.truncf %65 : vector<8x8xf32> to vector<8x8xbf16>
    %cst_23 = arith.constant dense<0.000000e+00> : vector<8x8xf32>
    %67 = tpu.matmul %66, %45, %cst_23 {dimension_numbers = #tpu.dot_dimension_numbers<[1], [0], [0], [1], [0, 0, 1, 1], [], []>} : vector<8x8xbf16>, vector<8x8xbf16>, vector<8x8xf32> -> vector<8x8xf32>
    %68 = vector.extract_strided_slice %5 {offsets = [0, 16], sizes = [8, 8], strides = [1, 1]} : vector<8x32xf32> to vector<8x8xf32>
    %69 = arith.truncf %68 : vector<8x8xf32> to vector<8x8xbf16>
    %70 = vector.extract_strided_slice %8 {offsets = [0, 16], sizes = [8, 8], strides = [1, 1]} : vector<8x32xf32> to vector<8x8xf32>
    %71 = arith.truncf %70 : vector<8x8xf32> to vector<8x8xbf16>
    %72 = vector.extract_strided_slice %9 {offsets = [0, 16], sizes = [8, 8], strides = [1, 1]} : vector<8x32xf32> to vector<8x8xf32>
    %73 = arith.truncf %72 : vector<8x8xf32> to vector<8x8xbf16>
    %74 = tpu.transpose %71, [1, 0] : vector<8x8xbf16> -> vector<8x8xbf16>
    %cst_24 = arith.constant dense<0.000000e+00> : vector<8x8xf32>
    %75 = tpu.matmul %69, %74, %cst_24 {dimension_numbers = #tpu.dot_dimension_numbers<[1], [0], [0], [1], [0, 0, 1, 1], [], []>} : vector<8x8xbf16>, vector<8x8xbf16>, vector<8x8xf32> -> vector<8x8xf32>
    %cst_25 = arith.constant 0.353553385 : f32
    %76 = vector.broadcast %cst_25 : f32 to vector<8x8xf32>
    %77 = arith.mulf %75, %76 : vector<8x8xf32>
    %cst_26 = arith.constant 0.000000e+00 : f32
    %78 = vector.broadcast %cst_26 : f32 to vector<1x8xf32>
    %79 = arith.cmpf ogt, %11, %78 : vector<1x8xf32>
    %cst_27 = arith.constant -1.000000e+30 : f32
    %80 = vector.shape_cast %79 : vector<1x8xi1> to vector<1x8xi1>
    %81 = vector.broadcast %80 : vector<1x8xi1> to vector<8x8xi1>
    %82 = vector.broadcast %cst_27 : f32 to vector<8x8xf32>
    %83 = arith.select %81, %77, %82 : vector<8x8xi1>, vector<8x8xf32>
    %cst_28 = arith.constant dense<0xFF800000> : vector<8xf32>
    %84 = vector.multi_reduction <maximumf>, %83, %cst_28 [1] : vector<8x8xf32> to vector<8xf32>
    %85 = vector.shape_cast %84 : vector<8xf32> to vector<8x1xf32>
    %86 = vector.broadcast %85 : vector<8x1xf32> to vector<8x8xf32>
    %87 = arith.subf %83, %86 : vector<8x8xf32>
    %88 = math.exp %87 : vector<8x8xf32>
    %cst_29 = arith.constant dense<0.000000e+00> : vector<8xf32>
    %89 = vector.multi_reduction <add>, %88, %cst_29 [1] : vector<8x8xf32> to vector<8xf32>
    %90 = vector.shape_cast %89 : vector<8xf32> to vector<8x1xf32>
    %91 = tpu.reciprocal %90 {approx = true} : vector<8x1xf32> -> vector<8x1xf32>
    %92 = vector.broadcast %91 : vector<8x1xf32> to vector<8x8xf32>
    %93 = arith.mulf %88, %92 : vector<8x8xf32>
    %94 = arith.truncf %93 : vector<8x8xf32> to vector<8x8xbf16>
    %cst_30 = arith.constant dense<0.000000e+00> : vector<8x8xf32>
    %95 = tpu.matmul %94, %73, %cst_30 {dimension_numbers = #tpu.dot_dimension_numbers<[1], [0], [0], [1], [0, 0, 1, 1], [], []>} : vector<8x8xbf16>, vector<8x8xbf16>, vector<8x8xf32> -> vector<8x8xf32>
    %96 = vector.extract_strided_slice %5 {offsets = [0, 24], sizes = [8, 8], strides = [1, 1]} : vector<8x32xf32> to vector<8x8xf32>
    %97 = arith.truncf %96 : vector<8x8xf32> to vector<8x8xbf16>
    %98 = vector.extract_strided_slice %8 {offsets = [0, 24], sizes = [8, 8], strides = [1, 1]} : vector<8x32xf32> to vector<8x8xf32>
    %99 = arith.truncf %98 : vector<8x8xf32> to vector<8x8xbf16>
    %100 = vector.extract_strided_slice %9 {offsets = [0, 24], sizes = [8, 8], strides = [1, 1]} : vector<8x32xf32> to vector<8x8xf32>
    %101 = arith.truncf %100 : vector<8x8xf32> to vector<8x8xbf16>
    %102 = tpu.transpose %99, [1, 0] : vector<8x8xbf16> -> vector<8x8xbf16>
    %cst_31 = arith.constant dense<0.000000e+00> : vector<8x8xf32>
    %103 = tpu.matmul %97, %102, %cst_31 {dimension_numbers = #tpu.dot_dimension_numbers<[1], [0], [0], [1], [0, 0, 1, 1], [], []>} : vector<8x8xbf16>, vector<8x8xbf16>, vector<8x8xf32> -> vector<8x8xf32>
    %cst_32 = arith.constant 0.353553385 : f32
    %104 = vector.broadcast %cst_32 : f32 to vector<8x8xf32>
    %105 = arith.mulf %103, %104 : vector<8x8xf32>
    %cst_33 = arith.constant 0.000000e+00 : f32
    %106 = vector.broadcast %cst_33 : f32 to vector<1x8xf32>
    %107 = arith.cmpf ogt, %11, %106 : vector<1x8xf32>
    %cst_34 = arith.constant -1.000000e+30 : f32
    %108 = vector.shape_cast %107 : vector<1x8xi1> to vector<1x8xi1>
    %109 = vector.broadcast %108 : vector<1x8xi1> to vector<8x8xi1>
    %110 = vector.broadcast %cst_34 : f32 to vector<8x8xf32>
    %111 = arith.select %109, %105, %110 : vector<8x8xi1>, vector<8x8xf32>
    %cst_35 = arith.constant dense<0xFF800000> : vector<8xf32>
    %112 = vector.multi_reduction <maximumf>, %111, %cst_35 [1] : vector<8x8xf32> to vector<8xf32>
    %113 = vector.shape_cast %112 : vector<8xf32> to vector<8x1xf32>
    %114 = vector.broadcast %113 : vector<8x1xf32> to vector<8x8xf32>
    %115 = arith.subf %111, %114 : vector<8x8xf32>
    %116 = math.exp %115 : vector<8x8xf32>
    %cst_36 = arith.constant dense<0.000000e+00> : vector<8xf32>
    %117 = vector.multi_reduction <add>, %116, %cst_36 [1] : vector<8x8xf32> to vector<8xf32>
    %118 = vector.shape_cast %117 : vector<8xf32> to vector<8x1xf32>
    %119 = tpu.reciprocal %118 {approx = true} : vector<8x1xf32> -> vector<8x1xf32>
    %120 = vector.broadcast %119 : vector<8x1xf32> to vector<8x8xf32>
    %121 = arith.mulf %116, %120 : vector<8x8xf32>
    %122 = arith.truncf %121 : vector<8x8xf32> to vector<8x8xbf16>
    %cst_37 = arith.constant dense<0.000000e+00> : vector<8x8xf32>
    %123 = tpu.matmul %122, %101, %cst_37 {dimension_numbers = #tpu.dot_dimension_numbers<[1], [0], [0], [1], [0, 0, 1, 1], [], []>} : vector<8x8xbf16>, vector<8x8xbf16>, vector<8x8xf32> -> vector<8x8xf32>
    %124 = tpu.concatenate %39, %67, %95, %123 in 1 : vector<8x8xf32>, vector<8x8xf32>, vector<8x8xf32>, vector<8x8xf32> -> vector<8x32xf32>
    %c0_38 = arith.constant 0 : index
    %c0_39 = arith.constant 0 : index
    %c0_40 = arith.constant 0 : index
    %125 = vector.load %arg9[%c0_38, %c0_39, %c0_40] : memref<1x8x8xf32, #tpu.memory_space<vmem>>, vector<1x8x8xf32>
    %126 = vector.shape_cast %125 : vector<1x8x8xf32> to vector<8x8xf32>
    %127 = vector.shape_cast %111 : vector<8x8xf32> to vector<1x8x8xf32>
    tpu.vector_store %arg9[%c0_38, %c0_39, %c0_40], %127 {strides = array<i32>} : memref<1x8x8xf32, #tpu.memory_space<vmem>>, vector<1x8x8xf32>,
    %c0_41 = arith.constant 0 : index
    %c0_42 = arith.constant 0 : index
    %c0_43 = arith.constant 0 : index
    %128 = vector.load %arg5[%c0_41, %c0_42, %c0_43] : memref<1x8x32xf32, #tpu.memory_space<vmem>>, vector<1x8x32xf32>
    %129 = vector.shape_cast %128 : vector<1x8x32xf32> to vector<8x32xf32>
    %130 = tpu.concatenate %129, %124 in 1 : vector<8x32xf32>, vector<8x32xf32> -> vector<8x64xf32>
    %131 = arith.truncf %130 : vector<8x64xf32> to vector<8x64xbf16>
    %c0_44 = arith.constant 0 : index
    %c0_45 = arith.constant 0 : index
    %132 = vector.load %arg6[%c0_44, %c0_45] : memref<64x32xbf16, #tpu.memory_space<vmem>>, vector<64x32xbf16>
    %cst_46 = arith.constant dense<0.000000e+00> : vector<8x32xf32>
    %133 = tpu.matmul %131, %132, %cst_46 {dimension_numbers = #tpu.dot_dimension_numbers<[1], [0], [0], [1], [0, 0, 1, 1], [], []>} : vector<8x64xbf16>, vector<64x32xbf16>, vector<8x32xf32> -> vector<8x32xf32>
    %c0_47 = arith.constant 0 : index
    %c0_48 = arith.constant 0 : index
    %134 = vector.load %arg7[%c0_47, %c0_48] : memref<1x32xf32, #tpu.memory_space<vmem>>, vector<1x32xf32>
    %135 = vector.broadcast %134 : vector<1x32xf32> to vector<8x32xf32>
    %136 = arith.addf %133, %135 : vector<8x32xf32>
    %c0_49 = arith.constant 0 : index
    %c0_50 = arith.constant 0 : index
    %c0_51 = arith.constant 0 : index
    %137 = vector.load %arg8[%c0_49, %c0_50, %c0_51] : memref<1x8x32xf32, #tpu.memory_space<vmem>>, vector<1x8x32xf32>
    %138 = vector.shape_cast %137 : vector<1x8x32xf32> to vector<8x32xf32>
    %139 = vector.shape_cast %136 : vector<8x32xf32> to vector<1x8x32xf32>
    tpu.vector_store %arg8[%c0_49, %c0_50, %c0_51], %139 {strides = array<i32>} : memref<1x8x32xf32, #tpu.memory_space<vmem>>, vector<1x8x32xf32>,
    return
  }
  func.func @transform_0(%arg0: i32) -> (i32, i32, i32) {
    %c0_i32 = arith.constant 0 : i32
    %c0_i32_0 = arith.constant 0 : i32
    %c0_i32_1 = arith.constant 0 : i32
    return %arg0, %c0_i32, %c0_i32_0 : i32, i32, i32
  }
  func.func @transform_1(%arg0: i32) -> (i32, i32, i32) {
    %c0_i32 = arith.constant 0 : i32
    %c0_i32_0 = arith.constant 0 : i32
    %c0_i32_1 = arith.constant 0 : i32
    return %arg0, %c0_i32, %c0_i32_0 : i32, i32, i32
  }
  func.func @transform_2(%arg0: i32) -> (i32, i32, i32) {
    %c0_i32 = arith.constant 0 : i32
    %c0_i32_0 = arith.constant 0 : i32
    %c0_i32_1 = arith.constant 0 : i32
    return %arg0, %c0_i32, %c0_i32_0 : i32, i32, i32
  }
  func.func @transform_3(%arg0: i32) -> (i32, i32, i32) {
    %c0_i32 = arith.constant 0 : i32
    %c0_i32_0 = arith.constant 0 : i32
    %c0_i32_1 = arith.constant 0 : i32
    return %arg0, %c0_i32, %c0_i32_0 : i32, i32, i32
  }
  func.func @transform_4(%arg0: i32) -> (i32, i32, i32) {
    %c0_i32 = arith.constant 0 : i32
    %c0_i32_0 = arith.constant 0 : i32
    %c0_i32_1 = arith.constant 0 : i32
    return %arg0, %c0_i32, %c0_i32_0 : i32, i32, i32
  }
  func.func @transform_5(%arg0: i32) -> (i32, i32) {
    %c0_i32 = arith.constant 0 : i32
    %c0_i32_0 = arith.constant 0 : i32
    %c0_i32_1 = arith.constant 0 : i32
    return %c0_i32, %c0_i32_0 : i32, i32
  }
  func.func @transform_6(%arg0: i32) -> (i32, i32) {
    %c0_i32 = arith.constant 0 : i32
    %c0_i32_0 = arith.constant 0 : i32
    %c0_i32_1 = arith.constant 0 : i32
    return %c0_i32, %c0_i32_0 : i32, i32
  }
  func.func @transform_7(%arg0: i32) -> (i32, i32, i32) {
    %c0_i32 = arith.constant 0 : i32
    %c0_i32_0 = arith.constant 0 : i32
    %c0_i32_1 = arith.constant 0 : i32
    return %arg0, %c0_i32, %c0_i32_0 : i32, i32, i32
  }
  func.func @transform_8(%arg0: i32) -> (i32, i32, i32) {
    %c0_i32 = arith.constant 0 : i32
    %c0_i32_0 = arith.constant 0 : i32
    %c0_i32_1 = arith.constant 0 : i32
    return %arg0, %c0_i32, %c0_i32_0 : i32, i32, i32
  }
}

module attributes {stable_mosaic.version = 11 : i64} {
  func.func @_linear_kernel(%arg0: i32, %arg1: i32, %arg2: i32, %arg3: memref<16x32xf32, #tpu.memory_space<vmem>>, %arg4: memref<32x64xbf16, #tpu.memory_space<vmem>>, %arg5: memref<1x64xf32, #tpu.memory_space<vmem>>, %arg6: memref<16x64xf32, #tpu.memory_space<vmem>>, %arg7: memref<16x64xf32, #tpu.memory_space<vmem>>) attributes {dimension_semantics = [#tpu.dimension_semantics<parallel>, #tpu.dimension_semantics<parallel>, #tpu.dimension_semantics<arbitrary>], iteration_bounds = array<i64: 1, 1, 1>, scalar_prefetch = 0 : i64, scratch_operands = 1 : i64, tpu.core_type = #tpu.core_type<tc>, window_params = [{transform_indices = @transform_0, window_bounds = array<i64: 16, 32>}, {transform_indices = @transform_1, window_bounds = array<i64: 32, 64>}, {transform_indices = @transform_2, window_bounds = array<i64: 1, 64>}, {transform_indices = @transform_3, window_bounds = array<i64: 16, 64>}]} {
    %c0_i32 = arith.constant 0 : i32
    %0 = arith.cmpi eq, %arg2, %c0_i32 : i32
    %1 = arith.extui %0 : i1 to i32
    %c0_i32_0 = arith.constant 0 : i32
    %2 = arith.cmpi ne, %1, %c0_i32_0 : i32
    scf.if %2 {
      %cst_10 = arith.constant 0.000000e+00 : f32
      %13 = vector.broadcast %cst_10 : f32 to vector<16x64xf32>
      %c0_11 = arith.constant 0 : index
      %c0_12 = arith.constant 0 : index
      %14 = vector.load %arg7[%c0_11, %c0_12] : memref<16x64xf32, #tpu.memory_space<vmem>>, vector<16x64xf32>
      tpu.vector_store %arg7[%c0_11, %c0_12], %13 {strides = array<i32>} : memref<16x64xf32, #tpu.memory_space<vmem>>, vector<16x64xf32>,
    } else {
    }
    %c0 = arith.constant 0 : index
    %c0_1 = arith.constant 0 : index
    %3 = vector.load %arg7[%c0, %c0_1] : memref<16x64xf32, #tpu.memory_space<vmem>>, vector<16x64xf32>
    %c0_2 = arith.constant 0 : index
    %c0_3 = arith.constant 0 : index
    %4 = vector.load %arg3[%c0_2, %c0_3] : memref<16x32xf32, #tpu.memory_space<vmem>>, vector<16x32xf32>
    %5 = arith.truncf %4 : vector<16x32xf32> to vector<16x32xbf16>
    %c0_4 = arith.constant 0 : index
    %c0_5 = arith.constant 0 : index
    %6 = vector.load %arg4[%c0_4, %c0_5] : memref<32x64xbf16, #tpu.memory_space<vmem>>, vector<32x64xbf16>
    %cst = arith.constant dense<0.000000e+00> : vector<16x64xf32>
    %7 = tpu.matmul %5, %6, %cst {dimension_numbers = #tpu.dot_dimension_numbers<[1], [0], [0], [1], [0, 0, 1, 1], [], []>} : vector<16x32xbf16>, vector<32x64xbf16>, vector<16x64xf32> -> vector<16x64xf32>
    %8 = arith.addf %3, %7 : vector<16x64xf32>
    %c0_6 = arith.constant 0 : index
    %c0_7 = arith.constant 0 : index
    %9 = vector.load %arg7[%c0_6, %c0_7] : memref<16x64xf32, #tpu.memory_space<vmem>>, vector<16x64xf32>
    tpu.vector_store %arg7[%c0_6, %c0_7], %8 {strides = array<i32>} : memref<16x64xf32, #tpu.memory_space<vmem>>, vector<16x64xf32>,
    %c0_i32_8 = arith.constant 0 : i32
    %10 = arith.cmpi eq, %arg2, %c0_i32_8 : i32
    %11 = arith.extui %10 : i1 to i32
    %c0_i32_9 = arith.constant 0 : i32
    %12 = arith.cmpi ne, %11, %c0_i32_9 : i32
    scf.if %12 {
      %c0_10 = arith.constant 0 : index
      %c0_11 = arith.constant 0 : index
      %13 = vector.load %arg7[%c0_10, %c0_11] : memref<16x64xf32, #tpu.memory_space<vmem>>, vector<16x64xf32>
      %c0_12 = arith.constant 0 : index
      %c0_13 = arith.constant 0 : index
      %14 = vector.load %arg5[%c0_12, %c0_13] : memref<1x64xf32, #tpu.memory_space<vmem>>, vector<1x64xf32>
      %15 = vector.broadcast %14 : vector<1x64xf32> to vector<16x64xf32>
      %16 = arith.addf %13, %15 : vector<16x64xf32>
      %c0_14 = arith.constant 0 : index
      %c0_15 = arith.constant 0 : index
      %17 = vector.load %arg6[%c0_14, %c0_15] : memref<16x64xf32, #tpu.memory_space<vmem>>, vector<16x64xf32>
      tpu.vector_store %arg6[%c0_14, %c0_15], %16 {strides = array<i32>} : memref<16x64xf32, #tpu.memory_space<vmem>>, vector<16x64xf32>,
    } else {
    }
    return
  }
  func.func @transform_0(%arg0: i32, %arg1: i32, %arg2: i32) -> (i32, i32) {
    %c0_i32 = arith.constant 0 : i32
    return %arg0, %arg2 : i32, i32
  }
  func.func @transform_1(%arg0: i32, %arg1: i32, %arg2: i32) -> (i32, i32) {
    %c0_i32 = arith.constant 0 : i32
    return %arg2, %arg1 : i32, i32
  }
  func.func @transform_2(%arg0: i32, %arg1: i32, %arg2: i32) -> (i32, i32) {
    %c0_i32 = arith.constant 0 : i32
    %c0_i32_0 = arith.constant 0 : i32
    return %c0_i32, %arg1 : i32, i32
  }
  func.func @transform_3(%arg0: i32, %arg1: i32, %arg2: i32) -> (i32, i32) {
    %c0_i32 = arith.constant 0 : i32
    return %arg0, %arg1 : i32, i32
  }
}

module attributes {stable_mosaic.version = 11 : i64} {
  func.func @_linear_kernel(%arg0: i32, %arg1: i32, %arg2: i32, %arg3: memref<4x32xf32, #tpu.memory_space<vmem>>, %arg4: memref<32x32xbf16, #tpu.memory_space<vmem>>, %arg5: memref<1x32xf32, #tpu.memory_space<vmem>>, %arg6: memref<4x32xf32, #tpu.memory_space<vmem>>, %arg7: memref<4x32xf32, #tpu.memory_space<vmem>>) attributes {dimension_semantics = [#tpu.dimension_semantics<parallel>, #tpu.dimension_semantics<parallel>, #tpu.dimension_semantics<arbitrary>], iteration_bounds = array<i64: 1, 1, 1>, scalar_prefetch = 0 : i64, scratch_operands = 1 : i64, tpu.core_type = #tpu.core_type<tc>, window_params = [{transform_indices = @transform_0, window_bounds = array<i64: 4, 32>}, {transform_indices = @transform_1, window_bounds = array<i64: 32, 32>}, {transform_indices = @transform_2, window_bounds = array<i64: 1, 32>}, {transform_indices = @transform_3, window_bounds = array<i64: 4, 32>}]} {
    %c0_i32 = arith.constant 0 : i32
    %0 = arith.cmpi eq, %arg2, %c0_i32 : i32
    %1 = arith.extui %0 : i1 to i32
    %c0_i32_0 = arith.constant 0 : i32
    %2 = arith.cmpi ne, %1, %c0_i32_0 : i32
    scf.if %2 {
      %cst_10 = arith.constant 0.000000e+00 : f32
      %13 = vector.broadcast %cst_10 : f32 to vector<4x32xf32>
      %c0_11 = arith.constant 0 : index
      %c0_12 = arith.constant 0 : index
      %14 = vector.load %arg7[%c0_11, %c0_12] : memref<4x32xf32, #tpu.memory_space<vmem>>, vector<4x32xf32>
      tpu.vector_store %arg7[%c0_11, %c0_12], %13 {strides = array<i32>} : memref<4x32xf32, #tpu.memory_space<vmem>>, vector<4x32xf32>,
    } else {
    }
    %c0 = arith.constant 0 : index
    %c0_1 = arith.constant 0 : index
    %3 = vector.load %arg7[%c0, %c0_1] : memref<4x32xf32, #tpu.memory_space<vmem>>, vector<4x32xf32>
    %c0_2 = arith.constant 0 : index
    %c0_3 = arith.constant 0 : index
    %4 = vector.load %arg3[%c0_2, %c0_3] : memref<4x32xf32, #tpu.memory_space<vmem>>, vector<4x32xf32>
    %5 = arith.truncf %4 : vector<4x32xf32> to vector<4x32xbf16>
    %c0_4 = arith.constant 0 : index
    %c0_5 = arith.constant 0 : index
    %6 = vector.load %arg4[%c0_4, %c0_5] : memref<32x32xbf16, #tpu.memory_space<vmem>>, vector<32x32xbf16>
    %cst = arith.constant dense<0.000000e+00> : vector<4x32xf32>
    %7 = tpu.matmul %5, %6, %cst {dimension_numbers = #tpu.dot_dimension_numbers<[1], [0], [0], [1], [0, 0, 1, 1], [], []>} : vector<4x32xbf16>, vector<32x32xbf16>, vector<4x32xf32> -> vector<4x32xf32>
    %8 = arith.addf %3, %7 : vector<4x32xf32>
    %c0_6 = arith.constant 0 : index
    %c0_7 = arith.constant 0 : index
    %9 = vector.load %arg7[%c0_6, %c0_7] : memref<4x32xf32, #tpu.memory_space<vmem>>, vector<4x32xf32>
    tpu.vector_store %arg7[%c0_6, %c0_7], %8 {strides = array<i32>} : memref<4x32xf32, #tpu.memory_space<vmem>>, vector<4x32xf32>,
    %c0_i32_8 = arith.constant 0 : i32
    %10 = arith.cmpi eq, %arg2, %c0_i32_8 : i32
    %11 = arith.extui %10 : i1 to i32
    %c0_i32_9 = arith.constant 0 : i32
    %12 = arith.cmpi ne, %11, %c0_i32_9 : i32
    scf.if %12 {
      %c0_10 = arith.constant 0 : index
      %c0_11 = arith.constant 0 : index
      %13 = vector.load %arg7[%c0_10, %c0_11] : memref<4x32xf32, #tpu.memory_space<vmem>>, vector<4x32xf32>
      %c0_12 = arith.constant 0 : index
      %c0_13 = arith.constant 0 : index
      %14 = vector.load %arg5[%c0_12, %c0_13] : memref<1x32xf32, #tpu.memory_space<vmem>>, vector<1x32xf32>
      %15 = vector.broadcast %14 : vector<1x32xf32> to vector<4x32xf32>
      %16 = arith.addf %13, %15 : vector<4x32xf32>
      %c0_14 = arith.constant 0 : index
      %c0_15 = arith.constant 0 : index
      %17 = vector.load %arg6[%c0_14, %c0_15] : memref<4x32xf32, #tpu.memory_space<vmem>>, vector<4x32xf32>
      tpu.vector_store %arg6[%c0_14, %c0_15], %16 {strides = array<i32>} : memref<4x32xf32, #tpu.memory_space<vmem>>, vector<4x32xf32>,
    } else {
    }
    return
  }
  func.func @transform_0(%arg0: i32, %arg1: i32, %arg2: i32) -> (i32, i32) {
    %c0_i32 = arith.constant 0 : i32
    return %arg0, %arg2 : i32, i32
  }
  func.func @transform_1(%arg0: i32, %arg1: i32, %arg2: i32) -> (i32, i32) {
    %c0_i32 = arith.constant 0 : i32
    return %arg2, %arg1 : i32, i32
  }
  func.func @transform_2(%arg0: i32, %arg1: i32, %arg2: i32) -> (i32, i32) {
    %c0_i32 = arith.constant 0 : i32
    %c0_i32_0 = arith.constant 0 : i32
    return %c0_i32, %arg1 : i32, i32
  }
  func.func @transform_3(%arg0: i32, %arg1: i32, %arg2: i32) -> (i32, i32) {
    %c0_i32 = arith.constant 0 : i32
    return %arg0, %arg1 : i32, i32
  }
}

module attributes {stable_mosaic.version = 11 : i64} {
  func.func @_linear_kernel(%arg0: i32, %arg1: i32, %arg2: i32, %arg3: memref<16x32xf32, #tpu.memory_space<vmem>>, %arg4: memref<32x96xbf16, #tpu.memory_space<vmem>>, %arg5: memref<1x96xf32, #tpu.memory_space<vmem>>, %arg6: memref<16x96xf32, #tpu.memory_space<vmem>>, %arg7: memref<16x96xf32, #tpu.memory_space<vmem>>) attributes {dimension_semantics = [#tpu.dimension_semantics<parallel>, #tpu.dimension_semantics<parallel>, #tpu.dimension_semantics<arbitrary>], iteration_bounds = array<i64: 1, 1, 1>, scalar_prefetch = 0 : i64, scratch_operands = 1 : i64, tpu.core_type = #tpu.core_type<tc>, window_params = [{transform_indices = @transform_0, window_bounds = array<i64: 16, 32>}, {transform_indices = @transform_1, window_bounds = array<i64: 32, 96>}, {transform_indices = @transform_2, window_bounds = array<i64: 1, 96>}, {transform_indices = @transform_3, window_bounds = array<i64: 16, 96>}]} {
    %c0_i32 = arith.constant 0 : i32
    %0 = arith.cmpi eq, %arg2, %c0_i32 : i32
    %1 = arith.extui %0 : i1 to i32
    %c0_i32_0 = arith.constant 0 : i32
    %2 = arith.cmpi ne, %1, %c0_i32_0 : i32
    scf.if %2 {
      %cst_10 = arith.constant 0.000000e+00 : f32
      %13 = vector.broadcast %cst_10 : f32 to vector<16x96xf32>
      %c0_11 = arith.constant 0 : index
      %c0_12 = arith.constant 0 : index
      %14 = vector.load %arg7[%c0_11, %c0_12] : memref<16x96xf32, #tpu.memory_space<vmem>>, vector<16x96xf32>
      tpu.vector_store %arg7[%c0_11, %c0_12], %13 {strides = array<i32>} : memref<16x96xf32, #tpu.memory_space<vmem>>, vector<16x96xf32>,
    } else {
    }
    %c0 = arith.constant 0 : index
    %c0_1 = arith.constant 0 : index
    %3 = vector.load %arg7[%c0, %c0_1] : memref<16x96xf32, #tpu.memory_space<vmem>>, vector<16x96xf32>
    %c0_2 = arith.constant 0 : index
    %c0_3 = arith.constant 0 : index
    %4 = vector.load %arg3[%c0_2, %c0_3] : memref<16x32xf32, #tpu.memory_space<vmem>>, vector<16x32xf32>
    %5 = arith.truncf %4 : vector<16x32xf32> to vector<16x32xbf16>
    %c0_4 = arith.constant 0 : index
    %c0_5 = arith.constant 0 : index
    %6 = vector.load %arg4[%c0_4, %c0_5] : memref<32x96xbf16, #tpu.memory_space<vmem>>, vector<32x96xbf16>
    %cst = arith.constant dense<0.000000e+00> : vector<16x96xf32>
    %7 = tpu.matmul %5, %6, %cst {dimension_numbers = #tpu.dot_dimension_numbers<[1], [0], [0], [1], [0, 0, 1, 1], [], []>} : vector<16x32xbf16>, vector<32x96xbf16>, vector<16x96xf32> -> vector<16x96xf32>
    %8 = arith.addf %3, %7 : vector<16x96xf32>
    %c0_6 = arith.constant 0 : index
    %c0_7 = arith.constant 0 : index
    %9 = vector.load %arg7[%c0_6, %c0_7] : memref<16x96xf32, #tpu.memory_space<vmem>>, vector<16x96xf32>
    tpu.vector_store %arg7[%c0_6, %c0_7], %8 {strides = array<i32>} : memref<16x96xf32, #tpu.memory_space<vmem>>, vector<16x96xf32>,
    %c0_i32_8 = arith.constant 0 : i32
    %10 = arith.cmpi eq, %arg2, %c0_i32_8 : i32
    %11 = arith.extui %10 : i1 to i32
    %c0_i32_9 = arith.constant 0 : i32
    %12 = arith.cmpi ne, %11, %c0_i32_9 : i32
    scf.if %12 {
      %c0_10 = arith.constant 0 : index
      %c0_11 = arith.constant 0 : index
      %13 = vector.load %arg7[%c0_10, %c0_11] : memref<16x96xf32, #tpu.memory_space<vmem>>, vector<16x96xf32>
      %c0_12 = arith.constant 0 : index
      %c0_13 = arith.constant 0 : index
      %14 = vector.load %arg5[%c0_12, %c0_13] : memref<1x96xf32, #tpu.memory_space<vmem>>, vector<1x96xf32>
      %15 = vector.broadcast %14 : vector<1x96xf32> to vector<16x96xf32>
      %16 = arith.addf %13, %15 : vector<16x96xf32>
      %c0_14 = arith.constant 0 : index
      %c0_15 = arith.constant 0 : index
      %17 = vector.load %arg6[%c0_14, %c0_15] : memref<16x96xf32, #tpu.memory_space<vmem>>, vector<16x96xf32>
      tpu.vector_store %arg6[%c0_14, %c0_15], %16 {strides = array<i32>} : memref<16x96xf32, #tpu.memory_space<vmem>>, vector<16x96xf32>,
    } else {
    }
    return
  }
  func.func @transform_0(%arg0: i32, %arg1: i32, %arg2: i32) -> (i32, i32) {
    %c0_i32 = arith.constant 0 : i32
    return %arg0, %arg2 : i32, i32
  }
  func.func @transform_1(%arg0: i32, %arg1: i32, %arg2: i32) -> (i32, i32) {
    %c0_i32 = arith.constant 0 : i32
    return %arg2, %arg1 : i32, i32
  }
  func.func @transform_2(%arg0: i32, %arg1: i32, %arg2: i32) -> (i32, i32) {
    %c0_i32 = arith.constant 0 : i32
    %c0_i32_0 = arith.constant 0 : i32
    return %c0_i32, %arg1 : i32, i32
  }
  func.func @transform_3(%arg0: i32, %arg1: i32, %arg2: i32) -> (i32, i32) {
    %c0_i32 = arith.constant 0 : i32
    return %arg0, %arg1 : i32, i32
  }
}

module attributes {stable_mosaic.version = 11 : i64} {
  func.func @_linear_kernel(%arg0: i32, %arg1: i32, %arg2: i32, %arg3: memref<2x32xf32, #tpu.memory_space<vmem>>, %arg4: memref<32x32xbf16, #tpu.memory_space<vmem>>, %arg5: memref<1x32xf32, #tpu.memory_space<vmem>>, %arg6: memref<2x32xf32, #tpu.memory_space<vmem>>, %arg7: memref<2x32xf32, #tpu.memory_space<vmem>>) attributes {dimension_semantics = [#tpu.dimension_semantics<parallel>, #tpu.dimension_semantics<parallel>, #tpu.dimension_semantics<arbitrary>], iteration_bounds = array<i64: 1, 1, 1>, scalar_prefetch = 0 : i64, scratch_operands = 1 : i64, tpu.core_type = #tpu.core_type<tc>, window_params = [{transform_indices = @transform_0, window_bounds = array<i64: 2, 32>}, {transform_indices = @transform_1, window_bounds = array<i64: 32, 32>}, {transform_indices = @transform_2, window_bounds = array<i64: 1, 32>}, {transform_indices = @transform_3, window_bounds = array<i64: 2, 32>}]} {
    %c0_i32 = arith.constant 0 : i32
    %0 = arith.cmpi eq, %arg2, %c0_i32 : i32
    %1 = arith.extui %0 : i1 to i32
    %c0_i32_0 = arith.constant 0 : i32
    %2 = arith.cmpi ne, %1, %c0_i32_0 : i32
    scf.if %2 {
      %cst_10 = arith.constant 0.000000e+00 : f32
      %13 = vector.broadcast %cst_10 : f32 to vector<2x32xf32>
      %c0_11 = arith.constant 0 : index
      %c0_12 = arith.constant 0 : index
      %14 = vector.load %arg7[%c0_11, %c0_12] : memref<2x32xf32, #tpu.memory_space<vmem>>, vector<2x32xf32>
      tpu.vector_store %arg7[%c0_11, %c0_12], %13 {strides = array<i32>} : memref<2x32xf32, #tpu.memory_space<vmem>>, vector<2x32xf32>,
    } else {
    }
    %c0 = arith.constant 0 : index
    %c0_1 = arith.constant 0 : index
    %3 = vector.load %arg7[%c0, %c0_1] : memref<2x32xf32, #tpu.memory_space<vmem>>, vector<2x32xf32>
    %c0_2 = arith.constant 0 : index
    %c0_3 = arith.constant 0 : index
    %4 = vector.load %arg3[%c0_2, %c0_3] : memref<2x32xf32, #tpu.memory_space<vmem>>, vector<2x32xf32>
    %5 = arith.truncf %4 : vector<2x32xf32> to vector<2x32xbf16>
    %c0_4 = arith.constant 0 : index
    %c0_5 = arith.constant 0 : index
    %6 = vector.load %arg4[%c0_4, %c0_5] : memref<32x32xbf16, #tpu.memory_space<vmem>>, vector<32x32xbf16>
    %cst = arith.constant dense<0.000000e+00> : vector<2x32xf32>
    %7 = tpu.matmul %5, %6, %cst {dimension_numbers = #tpu.dot_dimension_numbers<[1], [0], [0], [1], [0, 0, 1, 1], [], []>} : vector<2x32xbf16>, vector<32x32xbf16>, vector<2x32xf32> -> vector<2x32xf32>
    %8 = arith.addf %3, %7 : vector<2x32xf32>
    %c0_6 = arith.constant 0 : index
    %c0_7 = arith.constant 0 : index
    %9 = vector.load %arg7[%c0_6, %c0_7] : memref<2x32xf32, #tpu.memory_space<vmem>>, vector<2x32xf32>
    tpu.vector_store %arg7[%c0_6, %c0_7], %8 {strides = array<i32>} : memref<2x32xf32, #tpu.memory_space<vmem>>, vector<2x32xf32>,
    %c0_i32_8 = arith.constant 0 : i32
    %10 = arith.cmpi eq, %arg2, %c0_i32_8 : i32
    %11 = arith.extui %10 : i1 to i32
    %c0_i32_9 = arith.constant 0 : i32
    %12 = arith.cmpi ne, %11, %c0_i32_9 : i32
    scf.if %12 {
      %c0_10 = arith.constant 0 : index
      %c0_11 = arith.constant 0 : index
      %13 = vector.load %arg7[%c0_10, %c0_11] : memref<2x32xf32, #tpu.memory_space<vmem>>, vector<2x32xf32>
      %c0_12 = arith.constant 0 : index
      %c0_13 = arith.constant 0 : index
      %14 = vector.load %arg5[%c0_12, %c0_13] : memref<1x32xf32, #tpu.memory_space<vmem>>, vector<1x32xf32>
      %15 = vector.broadcast %14 : vector<1x32xf32> to vector<2x32xf32>
      %16 = arith.addf %13, %15 : vector<2x32xf32>
      %c0_14 = arith.constant 0 : index
      %c0_15 = arith.constant 0 : index
      %17 = vector.load %arg6[%c0_14, %c0_15] : memref<2x32xf32, #tpu.memory_space<vmem>>, vector<2x32xf32>
      tpu.vector_store %arg6[%c0_14, %c0_15], %16 {strides = array<i32>} : memref<2x32xf32, #tpu.memory_space<vmem>>, vector<2x32xf32>,
    } else {
    }
    return
  }
  func.func @transform_0(%arg0: i32, %arg1: i32, %arg2: i32) -> (i32, i32) {
    %c0_i32 = arith.constant 0 : i32
    return %arg0, %arg2 : i32, i32
  }
  func.func @transform_1(%arg0: i32, %arg1: i32, %arg2: i32) -> (i32, i32) {
    %c0_i32 = arith.constant 0 : i32
    return %arg2, %arg1 : i32, i32
  }
  func.func @transform_2(%arg0: i32, %arg1: i32, %arg2: i32) -> (i32, i32) {
    %c0_i32 = arith.constant 0 : i32
    %c0_i32_0 = arith.constant 0 : i32
    return %c0_i32, %arg1 : i32, i32
  }
  func.func @transform_3(%arg0: i32, %arg1: i32, %arg2: i32) -> (i32, i32) {
    %c0_i32 = arith.constant 0 : i32
    return %arg0, %arg1 : i32, i32
  }
}

module attributes {stable_mosaic.version = 11 : i64} {
  func.func @_intra_attn_kernel(%arg0: i32, %arg1: memref<1x8x96xf32, #tpu.memory_space<vmem>>, %arg2: memref<1x1x32xf32, #tpu.memory_space<vmem>>, %arg3: memref<1x8x1xf32, #tpu.memory_space<vmem>>, %arg4: memref<1x1x8xf32, #tpu.memory_space<vmem>>, %arg5: memref<1x8x32xf32, #tpu.memory_space<vmem>>, %arg6: memref<32x32xbf16, #tpu.memory_space<vmem>>, %arg7: memref<1x32xf32, #tpu.memory_space<vmem>>, %arg8: memref<1x8x32xf32, #tpu.memory_space<vmem>>, %arg9: memref<1x8x8xf32, #tpu.memory_space<vmem>>) attributes {dimension_semantics = [#tpu.dimension_semantics<parallel>], iteration_bounds = array<i64: 2>, scalar_prefetch = 0 : i64, scratch_operands = 0 : i64, tpu.core_type = #tpu.core_type<tc>, window_params = [{transform_indices = @transform_0, window_bounds = array<i64: 1, 8, 96>}, {transform_indices = @transform_1, window_bounds = array<i64: 1, 1, 32>}, {transform_indices = @transform_2, window_bounds = array<i64: 1, 8, 1>}, {transform_indices = @transform_3, window_bounds = array<i64: 1, 1, 8>}, {transform_indices = @transform_4, window_bounds = array<i64: 1, 8, 32>}, {pipeline_mode = #tpu.pipeline_mode<synchronous>, transform_indices = @transform_5, window_bounds = array<i64: 32, 32>}, {pipeline_mode = #tpu.pipeline_mode<synchronous>, transform_indices = @transform_6, window_bounds = array<i64: 1, 32>}, {transform_indices = @transform_7, window_bounds = array<i64: 1, 8, 32>}, {transform_indices = @transform_8, window_bounds = array<i64: 1, 8, 8>}]} {
    %c0 = arith.constant 0 : index
    %c0_0 = arith.constant 0 : index
    %c0_1 = arith.constant 0 : index
    %0 = vector.load %arg2[%c0, %c0_0, %c0_1] : memref<1x1x32xf32, #tpu.memory_space<vmem>>, vector<1x1x32xf32>
    %1 = vector.shape_cast %0 : vector<1x1x32xf32> to vector<1x32xf32>
    %cst = arith.constant 1.000000e+00 : f32
    %2 = vector.broadcast %cst : f32 to vector<1x32xf32>
    %3 = arith.addf %2, %1 : vector<1x32xf32>
    %c0_2 = arith.constant 0 : index
    %c0_3 = arith.constant 0 : index
    %c0_4 = arith.constant 0 : index
    %4 = vector.load %arg1[%c0_2, %c0_3, %c0_4] : memref<1x8x96xf32, #tpu.memory_space<vmem>>, vector<1x8x96xf32>
    %5 = vector.shape_cast %4 : vector<1x8x96xf32> to vector<8x96xf32>
    %6 = vector.extract_strided_slice %5 {offsets = [0, 0], sizes = [8, 32], strides = [1, 1]} : vector<8x96xf32> to vector<8x32xf32>
    %7 = vector.broadcast %3 : vector<1x32xf32> to vector<8x32xf32>
    %8 = arith.mulf %6, %7 : vector<8x32xf32>
    %9 = vector.extract_strided_slice %5 {offsets = [0, 32], sizes = [8, 32], strides = [1, 1]} : vector<8x96xf32> to vector<8x32xf32>
    %10 = vector.broadcast %3 : vector<1x32xf32> to vector<8x32xf32>
    %11 = arith.mulf %9, %10 : vector<8x32xf32>
    %c0_5 = arith.constant 0 : index
    %c0_6 = arith.constant 0 : index
    %c0_7 = arith.constant 0 : index
    %12 = vector.load %arg3[%c0_5, %c0_6, %c0_7] : memref<1x8x1xf32, #tpu.memory_space<vmem>>, vector<1x8x1xf32>
    %13 = vector.shape_cast %12 : vector<1x8x1xf32> to vector<8x1xf32>
    %14 = vector.broadcast %13 : vector<8x1xf32> to vector<8x32xf32>
    %15 = arith.mulf %11, %14 : vector<8x32xf32>
    %16 = vector.extract_strided_slice %5 {offsets = [0, 64], sizes = [8, 32], strides = [1, 1]} : vector<8x96xf32> to vector<8x32xf32>
    %17 = vector.broadcast %3 : vector<1x32xf32> to vector<8x32xf32>
    %18 = arith.mulf %16, %17 : vector<8x32xf32>
    %c0_8 = arith.constant 0 : index
    %c0_9 = arith.constant 0 : index
    %c0_10 = arith.constant 0 : index
    %19 = vector.load %arg4[%c0_8, %c0_9, %c0_10] : memref<1x1x8xf32, #tpu.memory_space<vmem>>, vector<1x1x8xf32>
    %20 = vector.shape_cast %19 : vector<1x1x8xf32> to vector<1x8xf32>
    %21 = vector.extract_strided_slice %15 {offsets = [0, 0], sizes = [8, 8], strides = [1, 1]} : vector<8x32xf32> to vector<8x8xf32>
    %22 = arith.truncf %21 : vector<8x8xf32> to vector<8x8xbf16>
    %23 = vector.extract_strided_slice %8 {offsets = [0, 0], sizes = [8, 8], strides = [1, 1]} : vector<8x32xf32> to vector<8x8xf32>
    %24 = arith.truncf %23 : vector<8x8xf32> to vector<8x8xbf16>
    %25 = vector.extract_strided_slice %18 {offsets = [0, 0], sizes = [8, 8], strides = [1, 1]} : vector<8x32xf32> to vector<8x8xf32>
    %26 = arith.truncf %25 : vector<8x8xf32> to vector<8x8xbf16>
    %27 = tpu.transpose %24, [1, 0] : vector<8x8xbf16> -> vector<8x8xbf16>
    %cst_11 = arith.constant dense<0.000000e+00> : vector<8x8xf32>
    %28 = tpu.matmul %22, %27, %cst_11 {dimension_numbers = #tpu.dot_dimension_numbers<[1], [0], [0], [1], [0, 0, 1, 1], [], []>} : vector<8x8xbf16>, vector<8x8xbf16>, vector<8x8xf32> -> vector<8x8xf32>
    %cst_12 = arith.constant 0.353553385 : f32
    %29 = vector.broadcast %cst_12 : f32 to vector<8x8xf32>
    %30 = arith.mulf %28, %29 : vector<8x8xf32>
    %cst_13 = arith.constant 0.000000e+00 : f32
    %31 = vector.broadcast %cst_13 : f32 to vector<1x8xf32>
    %32 = arith.cmpf ogt, %20, %31 : vector<1x8xf32>
    %cst_14 = arith.constant -1.000000e+30 : f32
    %33 = vector.shape_cast %32 : vector<1x8xi1> to vector<1x8xi1>
    %34 = vector.broadcast %33 : vector<1x8xi1> to vector<8x8xi1>
    %35 = vector.broadcast %cst_14 : f32 to vector<8x8xf32>
    %36 = arith.select %34, %30, %35 : vector<8x8xi1>, vector<8x8xf32>
    %cst_15 = arith.constant dense<0xFF800000> : vector<8xf32>
    %37 = vector.multi_reduction <maximumf>, %36, %cst_15 [1] : vector<8x8xf32> to vector<8xf32>
    %38 = vector.shape_cast %37 : vector<8xf32> to vector<8x1xf32>
    %39 = vector.broadcast %38 : vector<8x1xf32> to vector<8x8xf32>
    %40 = arith.subf %36, %39 : vector<8x8xf32>
    %41 = math.exp %40 : vector<8x8xf32>
    %cst_16 = arith.constant dense<0.000000e+00> : vector<8xf32>
    %42 = vector.multi_reduction <add>, %41, %cst_16 [1] : vector<8x8xf32> to vector<8xf32>
    %43 = vector.shape_cast %42 : vector<8xf32> to vector<8x1xf32>
    %44 = tpu.reciprocal %43 {approx = true} : vector<8x1xf32> -> vector<8x1xf32>
    %45 = vector.broadcast %44 : vector<8x1xf32> to vector<8x8xf32>
    %46 = arith.mulf %41, %45 : vector<8x8xf32>
    %47 = arith.truncf %46 : vector<8x8xf32> to vector<8x8xbf16>
    %cst_17 = arith.constant dense<0.000000e+00> : vector<8x8xf32>
    %48 = tpu.matmul %47, %26, %cst_17 {dimension_numbers = #tpu.dot_dimension_numbers<[1], [0], [0], [1], [0, 0, 1, 1], [], []>} : vector<8x8xbf16>, vector<8x8xbf16>, vector<8x8xf32> -> vector<8x8xf32>
    %49 = vector.extract_strided_slice %15 {offsets = [0, 8], sizes = [8, 8], strides = [1, 1]} : vector<8x32xf32> to vector<8x8xf32>
    %50 = arith.truncf %49 : vector<8x8xf32> to vector<8x8xbf16>
    %51 = vector.extract_strided_slice %8 {offsets = [0, 8], sizes = [8, 8], strides = [1, 1]} : vector<8x32xf32> to vector<8x8xf32>
    %52 = arith.truncf %51 : vector<8x8xf32> to vector<8x8xbf16>
    %53 = vector.extract_strided_slice %18 {offsets = [0, 8], sizes = [8, 8], strides = [1, 1]} : vector<8x32xf32> to vector<8x8xf32>
    %54 = arith.truncf %53 : vector<8x8xf32> to vector<8x8xbf16>
    %55 = tpu.transpose %52, [1, 0] : vector<8x8xbf16> -> vector<8x8xbf16>
    %cst_18 = arith.constant dense<0.000000e+00> : vector<8x8xf32>
    %56 = tpu.matmul %50, %55, %cst_18 {dimension_numbers = #tpu.dot_dimension_numbers<[1], [0], [0], [1], [0, 0, 1, 1], [], []>} : vector<8x8xbf16>, vector<8x8xbf16>, vector<8x8xf32> -> vector<8x8xf32>
    %cst_19 = arith.constant 0.353553385 : f32
    %57 = vector.broadcast %cst_19 : f32 to vector<8x8xf32>
    %58 = arith.mulf %56, %57 : vector<8x8xf32>
    %cst_20 = arith.constant 0.000000e+00 : f32
    %59 = vector.broadcast %cst_20 : f32 to vector<1x8xf32>
    %60 = arith.cmpf ogt, %20, %59 : vector<1x8xf32>
    %cst_21 = arith.constant -1.000000e+30 : f32
    %61 = vector.shape_cast %60 : vector<1x8xi1> to vector<1x8xi1>
    %62 = vector.broadcast %61 : vector<1x8xi1> to vector<8x8xi1>
    %63 = vector.broadcast %cst_21 : f32 to vector<8x8xf32>
    %64 = arith.select %62, %58, %63 : vector<8x8xi1>, vector<8x8xf32>
    %cst_22 = arith.constant dense<0xFF800000> : vector<8xf32>
    %65 = vector.multi_reduction <maximumf>, %64, %cst_22 [1] : vector<8x8xf32> to vector<8xf32>
    %66 = vector.shape_cast %65 : vector<8xf32> to vector<8x1xf32>
    %67 = vector.broadcast %66 : vector<8x1xf32> to vector<8x8xf32>
    %68 = arith.subf %64, %67 : vector<8x8xf32>
    %69 = math.exp %68 : vector<8x8xf32>
    %cst_23 = arith.constant dense<0.000000e+00> : vector<8xf32>
    %70 = vector.multi_reduction <add>, %69, %cst_23 [1] : vector<8x8xf32> to vector<8xf32>
    %71 = vector.shape_cast %70 : vector<8xf32> to vector<8x1xf32>
    %72 = tpu.reciprocal %71 {approx = true} : vector<8x1xf32> -> vector<8x1xf32>
    %73 = vector.broadcast %72 : vector<8x1xf32> to vector<8x8xf32>
    %74 = arith.mulf %69, %73 : vector<8x8xf32>
    %75 = arith.truncf %74 : vector<8x8xf32> to vector<8x8xbf16>
    %cst_24 = arith.constant dense<0.000000e+00> : vector<8x8xf32>
    %76 = tpu.matmul %75, %54, %cst_24 {dimension_numbers = #tpu.dot_dimension_numbers<[1], [0], [0], [1], [0, 0, 1, 1], [], []>} : vector<8x8xbf16>, vector<8x8xbf16>, vector<8x8xf32> -> vector<8x8xf32>
    %77 = vector.extract_strided_slice %15 {offsets = [0, 16], sizes = [8, 8], strides = [1, 1]} : vector<8x32xf32> to vector<8x8xf32>
    %78 = arith.truncf %77 : vector<8x8xf32> to vector<8x8xbf16>
    %79 = vector.extract_strided_slice %8 {offsets = [0, 16], sizes = [8, 8], strides = [1, 1]} : vector<8x32xf32> to vector<8x8xf32>
    %80 = arith.truncf %79 : vector<8x8xf32> to vector<8x8xbf16>
    %81 = vector.extract_strided_slice %18 {offsets = [0, 16], sizes = [8, 8], strides = [1, 1]} : vector<8x32xf32> to vector<8x8xf32>
    %82 = arith.truncf %81 : vector<8x8xf32> to vector<8x8xbf16>
    %83 = tpu.transpose %80, [1, 0] : vector<8x8xbf16> -> vector<8x8xbf16>
    %cst_25 = arith.constant dense<0.000000e+00> : vector<8x8xf32>
    %84 = tpu.matmul %78, %83, %cst_25 {dimension_numbers = #tpu.dot_dimension_numbers<[1], [0], [0], [1], [0, 0, 1, 1], [], []>} : vector<8x8xbf16>, vector<8x8xbf16>, vector<8x8xf32> -> vector<8x8xf32>
    %cst_26 = arith.constant 0.353553385 : f32
    %85 = vector.broadcast %cst_26 : f32 to vector<8x8xf32>
    %86 = arith.mulf %84, %85 : vector<8x8xf32>
    %cst_27 = arith.constant 0.000000e+00 : f32
    %87 = vector.broadcast %cst_27 : f32 to vector<1x8xf32>
    %88 = arith.cmpf ogt, %20, %87 : vector<1x8xf32>
    %cst_28 = arith.constant -1.000000e+30 : f32
    %89 = vector.shape_cast %88 : vector<1x8xi1> to vector<1x8xi1>
    %90 = vector.broadcast %89 : vector<1x8xi1> to vector<8x8xi1>
    %91 = vector.broadcast %cst_28 : f32 to vector<8x8xf32>
    %92 = arith.select %90, %86, %91 : vector<8x8xi1>, vector<8x8xf32>
    %cst_29 = arith.constant dense<0xFF800000> : vector<8xf32>
    %93 = vector.multi_reduction <maximumf>, %92, %cst_29 [1] : vector<8x8xf32> to vector<8xf32>
    %94 = vector.shape_cast %93 : vector<8xf32> to vector<8x1xf32>
    %95 = vector.broadcast %94 : vector<8x1xf32> to vector<8x8xf32>
    %96 = arith.subf %92, %95 : vector<8x8xf32>
    %97 = math.exp %96 : vector<8x8xf32>
    %cst_30 = arith.constant dense<0.000000e+00> : vector<8xf32>
    %98 = vector.multi_reduction <add>, %97, %cst_30 [1] : vector<8x8xf32> to vector<8xf32>
    %99 = vector.shape_cast %98 : vector<8xf32> to vector<8x1xf32>
    %100 = tpu.reciprocal %99 {approx = true} : vector<8x1xf32> -> vector<8x1xf32>
    %101 = vector.broadcast %100 : vector<8x1xf32> to vector<8x8xf32>
    %102 = arith.mulf %97, %101 : vector<8x8xf32>
    %103 = arith.truncf %102 : vector<8x8xf32> to vector<8x8xbf16>
    %cst_31 = arith.constant dense<0.000000e+00> : vector<8x8xf32>
    %104 = tpu.matmul %103, %82, %cst_31 {dimension_numbers = #tpu.dot_dimension_numbers<[1], [0], [0], [1], [0, 0, 1, 1], [], []>} : vector<8x8xbf16>, vector<8x8xbf16>, vector<8x8xf32> -> vector<8x8xf32>
    %105 = vector.extract_strided_slice %15 {offsets = [0, 24], sizes = [8, 8], strides = [1, 1]} : vector<8x32xf32> to vector<8x8xf32>
    %106 = arith.truncf %105 : vector<8x8xf32> to vector<8x8xbf16>
    %107 = vector.extract_strided_slice %8 {offsets = [0, 24], sizes = [8, 8], strides = [1, 1]} : vector<8x32xf32> to vector<8x8xf32>
    %108 = arith.truncf %107 : vector<8x8xf32> to vector<8x8xbf16>
    %109 = vector.extract_strided_slice %18 {offsets = [0, 24], sizes = [8, 8], strides = [1, 1]} : vector<8x32xf32> to vector<8x8xf32>
    %110 = arith.truncf %109 : vector<8x8xf32> to vector<8x8xbf16>
    %111 = tpu.transpose %108, [1, 0] : vector<8x8xbf16> -> vector<8x8xbf16>
    %cst_32 = arith.constant dense<0.000000e+00> : vector<8x8xf32>
    %112 = tpu.matmul %106, %111, %cst_32 {dimension_numbers = #tpu.dot_dimension_numbers<[1], [0], [0], [1], [0, 0, 1, 1], [], []>} : vector<8x8xbf16>, vector<8x8xbf16>, vector<8x8xf32> -> vector<8x8xf32>
    %cst_33 = arith.constant 0.353553385 : f32
    %113 = vector.broadcast %cst_33 : f32 to vector<8x8xf32>
    %114 = arith.mulf %112, %113 : vector<8x8xf32>
    %cst_34 = arith.constant 0.000000e+00 : f32
    %115 = vector.broadcast %cst_34 : f32 to vector<1x8xf32>
    %116 = arith.cmpf ogt, %20, %115 : vector<1x8xf32>
    %cst_35 = arith.constant -1.000000e+30 : f32
    %117 = vector.shape_cast %116 : vector<1x8xi1> to vector<1x8xi1>
    %118 = vector.broadcast %117 : vector<1x8xi1> to vector<8x8xi1>
    %119 = vector.broadcast %cst_35 : f32 to vector<8x8xf32>
    %120 = arith.select %118, %114, %119 : vector<8x8xi1>, vector<8x8xf32>
    %cst_36 = arith.constant dense<0xFF800000> : vector<8xf32>
    %121 = vector.multi_reduction <maximumf>, %120, %cst_36 [1] : vector<8x8xf32> to vector<8xf32>
    %122 = vector.shape_cast %121 : vector<8xf32> to vector<8x1xf32>
    %123 = vector.broadcast %122 : vector<8x1xf32> to vector<8x8xf32>
    %124 = arith.subf %120, %123 : vector<8x8xf32>
    %125 = math.exp %124 : vector<8x8xf32>
    %cst_37 = arith.constant dense<0.000000e+00> : vector<8xf32>
    %126 = vector.multi_reduction <add>, %125, %cst_37 [1] : vector<8x8xf32> to vector<8xf32>
    %127 = vector.shape_cast %126 : vector<8xf32> to vector<8x1xf32>
    %128 = tpu.reciprocal %127 {approx = true} : vector<8x1xf32> -> vector<8x1xf32>
    %129 = vector.broadcast %128 : vector<8x1xf32> to vector<8x8xf32>
    %130 = arith.mulf %125, %129 : vector<8x8xf32>
    %131 = arith.truncf %130 : vector<8x8xf32> to vector<8x8xbf16>
    %cst_38 = arith.constant dense<0.000000e+00> : vector<8x8xf32>
    %132 = tpu.matmul %131, %110, %cst_38 {dimension_numbers = #tpu.dot_dimension_numbers<[1], [0], [0], [1], [0, 0, 1, 1], [], []>} : vector<8x8xbf16>, vector<8x8xbf16>, vector<8x8xf32> -> vector<8x8xf32>
    %133 = tpu.concatenate %48, %76, %104, %132 in 1 : vector<8x8xf32>, vector<8x8xf32>, vector<8x8xf32>, vector<8x8xf32> -> vector<8x32xf32>
    %c0_39 = arith.constant 0 : index
    %c0_40 = arith.constant 0 : index
    %c0_41 = arith.constant 0 : index
    %134 = vector.load %arg9[%c0_39, %c0_40, %c0_41] : memref<1x8x8xf32, #tpu.memory_space<vmem>>, vector<1x8x8xf32>
    %135 = vector.shape_cast %134 : vector<1x8x8xf32> to vector<8x8xf32>
    %136 = vector.shape_cast %130 : vector<8x8xf32> to vector<1x8x8xf32>
    tpu.vector_store %arg9[%c0_39, %c0_40, %c0_41], %136 {strides = array<i32>} : memref<1x8x8xf32, #tpu.memory_space<vmem>>, vector<1x8x8xf32>,
    %c0_42 = arith.constant 0 : index
    %c0_43 = arith.constant 0 : index
    %c0_44 = arith.constant 0 : index
    %137 = vector.load %arg5[%c0_42, %c0_43, %c0_44] : memref<1x8x32xf32, #tpu.memory_space<vmem>>, vector<1x8x32xf32>
    %138 = vector.shape_cast %137 : vector<1x8x32xf32> to vector<8x32xf32>
    %139 = arith.addf %138, %133 : vector<8x32xf32>
    %140 = arith.truncf %139 : vector<8x32xf32> to vector<8x32xbf16>
    %c0_45 = arith.constant 0 : index
    %c0_46 = arith.constant 0 : index
    %141 = vector.load %arg6[%c0_45, %c0_46] : memref<32x32xbf16, #tpu.memory_space<vmem>>, vector<32x32xbf16>
    %cst_47 = arith.constant dense<0.000000e+00> : vector<8x32xf32>
    %142 = tpu.matmul %140, %141, %cst_47 {dimension_numbers = #tpu.dot_dimension_numbers<[1], [0], [0], [1], [0, 0, 1, 1], [], []>} : vector<8x32xbf16>, vector<32x32xbf16>, vector<8x32xf32> -> vector<8x32xf32>
    %c0_48 = arith.constant 0 : index
    %c0_49 = arith.constant 0 : index
    %143 = vector.load %arg7[%c0_48, %c0_49] : memref<1x32xf32, #tpu.memory_space<vmem>>, vector<1x32xf32>
    %144 = vector.broadcast %143 : vector<1x32xf32> to vector<8x32xf32>
    %145 = arith.addf %142, %144 : vector<8x32xf32>
    %c0_50 = arith.constant 0 : index
    %c0_51 = arith.constant 0 : index
    %c0_52 = arith.constant 0 : index
    %146 = vector.load %arg8[%c0_50, %c0_51, %c0_52] : memref<1x8x32xf32, #tpu.memory_space<vmem>>, vector<1x8x32xf32>
    %147 = vector.shape_cast %146 : vector<1x8x32xf32> to vector<8x32xf32>
    %148 = vector.shape_cast %145 : vector<8x32xf32> to vector<1x8x32xf32>
    tpu.vector_store %arg8[%c0_50, %c0_51, %c0_52], %148 {strides = array<i32>} : memref<1x8x32xf32, #tpu.memory_space<vmem>>, vector<1x8x32xf32>,
    return
  }
  func.func @transform_0(%arg0: i32) -> (i32, i32, i32) {
    %c0_i32 = arith.constant 0 : i32
    %c0_i32_0 = arith.constant 0 : i32
    %c0_i32_1 = arith.constant 0 : i32
    return %arg0, %c0_i32, %c0_i32_0 : i32, i32, i32
  }
  func.func @transform_1(%arg0: i32) -> (i32, i32, i32) {
    %c0_i32 = arith.constant 0 : i32
    %c0_i32_0 = arith.constant 0 : i32
    %c0_i32_1 = arith.constant 0 : i32
    return %arg0, %c0_i32, %c0_i32_0 : i32, i32, i32
  }
  func.func @transform_2(%arg0: i32) -> (i32, i32, i32) {
    %c0_i32 = arith.constant 0 : i32
    %c0_i32_0 = arith.constant 0 : i32
    %c0_i32_1 = arith.constant 0 : i32
    return %arg0, %c0_i32, %c0_i32_0 : i32, i32, i32
  }
  func.func @transform_3(%arg0: i32) -> (i32, i32, i32) {
    %c0_i32 = arith.constant 0 : i32
    %c0_i32_0 = arith.constant 0 : i32
    %c0_i32_1 = arith.constant 0 : i32
    return %arg0, %c0_i32, %c0_i32_0 : i32, i32, i32
  }
  func.func @transform_4(%arg0: i32) -> (i32, i32, i32) {
    %c0_i32 = arith.constant 0 : i32
    %c0_i32_0 = arith.constant 0 : i32
    %c0_i32_1 = arith.constant 0 : i32
    return %arg0, %c0_i32, %c0_i32_0 : i32, i32, i32
  }
  func.func @transform_5(%arg0: i32) -> (i32, i32) {
    %c0_i32 = arith.constant 0 : i32
    %c0_i32_0 = arith.constant 0 : i32
    %c0_i32_1 = arith.constant 0 : i32
    return %c0_i32, %c0_i32_0 : i32, i32
  }
  func.func @transform_6(%arg0: i32) -> (i32, i32) {
    %c0_i32 = arith.constant 0 : i32
    %c0_i32_0 = arith.constant 0 : i32
    %c0_i32_1 = arith.constant 0 : i32
    return %c0_i32, %c0_i32_0 : i32, i32
  }
  func.func @transform_7(%arg0: i32) -> (i32, i32, i32) {
    %c0_i32 = arith.constant 0 : i32
    %c0_i32_0 = arith.constant 0 : i32
    %c0_i32_1 = arith.constant 0 : i32
    return %arg0, %c0_i32, %c0_i32_0 : i32, i32, i32
  }
  func.func @transform_8(%arg0: i32) -> (i32, i32, i32) {
    %c0_i32 = arith.constant 0 : i32
    %c0_i32_0 = arith.constant 0 : i32
    %c0_i32_1 = arith.constant 0 : i32
    return %arg0, %c0_i32, %c0_i32_0 : i32, i32, i32
  }
}

module attributes {stable_mosaic.version = 11 : i64} {
  func.func @_intra_attn_kernel(%arg0: i32, %arg1: memref<1x8x96xf32, #tpu.memory_space<vmem>>, %arg2: memref<1x1x32xf32, #tpu.memory_space<vmem>>, %arg3: memref<1x8x1xf32, #tpu.memory_space<vmem>>, %arg4: memref<1x1x8xf32, #tpu.memory_space<vmem>>, %arg5: memref<1x8x32xf32, #tpu.memory_space<vmem>>, %arg6: memref<32x32xbf16, #tpu.memory_space<vmem>>, %arg7: memref<1x32xf32, #tpu.memory_space<vmem>>, %arg8: memref<1x8x32xf32, #tpu.memory_space<vmem>>, %arg9: memref<1x8x8xf32, #tpu.memory_space<vmem>>) attributes {dimension_semantics = [#tpu.dimension_semantics<parallel>], iteration_bounds = array<i64: 2>, scalar_prefetch = 0 : i64, scratch_operands = 0 : i64, tpu.core_type = #tpu.core_type<tc>, window_params = [{transform_indices = @transform_0, window_bounds = array<i64: 1, 8, 96>}, {transform_indices = @transform_1, window_bounds = array<i64: 1, 1, 32>}, {transform_indices = @transform_2, window_bounds = array<i64: 1, 8, 1>}, {transform_indices = @transform_3, window_bounds = array<i64: 1, 1, 8>}, {transform_indices = @transform_4, window_bounds = array<i64: 1, 8, 32>}, {pipeline_mode = #tpu.pipeline_mode<synchronous>, transform_indices = @transform_5, window_bounds = array<i64: 32, 32>}, {pipeline_mode = #tpu.pipeline_mode<synchronous>, transform_indices = @transform_6, window_bounds = array<i64: 1, 32>}, {transform_indices = @transform_7, window_bounds = array<i64: 1, 8, 32>}, {transform_indices = @transform_8, window_bounds = array<i64: 1, 8, 8>}]} {
    %c0 = arith.constant 0 : index
    %c0_0 = arith.constant 0 : index
    %c0_1 = arith.constant 0 : index
    %0 = vector.load %arg2[%c0, %c0_0, %c0_1] : memref<1x1x32xf32, #tpu.memory_space<vmem>>, vector<1x1x32xf32>
    %1 = vector.shape_cast %0 : vector<1x1x32xf32> to vector<1x32xf32>
    %cst = arith.constant 1.000000e+00 : f32
    %2 = vector.broadcast %cst : f32 to vector<1x32xf32>
    %3 = arith.addf %2, %1 : vector<1x32xf32>
    %c0_2 = arith.constant 0 : index
    %c0_3 = arith.constant 0 : index
    %c0_4 = arith.constant 0 : index
    %4 = vector.load %arg1[%c0_2, %c0_3, %c0_4] : memref<1x8x96xf32, #tpu.memory_space<vmem>>, vector<1x8x96xf32>
    %5 = vector.shape_cast %4 : vector<1x8x96xf32> to vector<8x96xf32>
    %6 = vector.extract_strided_slice %5 {offsets = [0, 0], sizes = [8, 32], strides = [1, 1]} : vector<8x96xf32> to vector<8x32xf32>
    %7 = vector.broadcast %3 : vector<1x32xf32> to vector<8x32xf32>
    %8 = arith.mulf %6, %7 : vector<8x32xf32>
    %9 = vector.extract_strided_slice %5 {offsets = [0, 32], sizes = [8, 32], strides = [1, 1]} : vector<8x96xf32> to vector<8x32xf32>
    %10 = vector.broadcast %3 : vector<1x32xf32> to vector<8x32xf32>
    %11 = arith.mulf %9, %10 : vector<8x32xf32>
    %c0_5 = arith.constant 0 : index
    %c0_6 = arith.constant 0 : index
    %c0_7 = arith.constant 0 : index
    %12 = vector.load %arg3[%c0_5, %c0_6, %c0_7] : memref<1x8x1xf32, #tpu.memory_space<vmem>>, vector<1x8x1xf32>
    %13 = vector.shape_cast %12 : vector<1x8x1xf32> to vector<8x1xf32>
    %14 = vector.broadcast %13 : vector<8x1xf32> to vector<8x32xf32>
    %15 = arith.mulf %11, %14 : vector<8x32xf32>
    %16 = vector.extract_strided_slice %5 {offsets = [0, 64], sizes = [8, 32], strides = [1, 1]} : vector<8x96xf32> to vector<8x32xf32>
    %17 = vector.broadcast %3 : vector<1x32xf32> to vector<8x32xf32>
    %18 = arith.mulf %16, %17 : vector<8x32xf32>
    %c0_8 = arith.constant 0 : index
    %c0_9 = arith.constant 0 : index
    %c0_10 = arith.constant 0 : index
    %19 = vector.load %arg4[%c0_8, %c0_9, %c0_10] : memref<1x1x8xf32, #tpu.memory_space<vmem>>, vector<1x1x8xf32>
    %20 = vector.shape_cast %19 : vector<1x1x8xf32> to vector<1x8xf32>
    %21 = vector.extract_strided_slice %15 {offsets = [0, 0], sizes = [8, 8], strides = [1, 1]} : vector<8x32xf32> to vector<8x8xf32>
    %22 = arith.truncf %21 : vector<8x8xf32> to vector<8x8xbf16>
    %23 = vector.extract_strided_slice %8 {offsets = [0, 0], sizes = [8, 8], strides = [1, 1]} : vector<8x32xf32> to vector<8x8xf32>
    %24 = arith.truncf %23 : vector<8x8xf32> to vector<8x8xbf16>
    %25 = vector.extract_strided_slice %18 {offsets = [0, 0], sizes = [8, 8], strides = [1, 1]} : vector<8x32xf32> to vector<8x8xf32>
    %26 = arith.truncf %25 : vector<8x8xf32> to vector<8x8xbf16>
    %27 = tpu.transpose %24, [1, 0] : vector<8x8xbf16> -> vector<8x8xbf16>
    %cst_11 = arith.constant dense<0.000000e+00> : vector<8x8xf32>
    %28 = tpu.matmul %22, %27, %cst_11 {dimension_numbers = #tpu.dot_dimension_numbers<[1], [0], [0], [1], [0, 0, 1, 1], [], []>} : vector<8x8xbf16>, vector<8x8xbf16>, vector<8x8xf32> -> vector<8x8xf32>
    %cst_12 = arith.constant 0.353553385 : f32
    %29 = vector.broadcast %cst_12 : f32 to vector<8x8xf32>
    %30 = arith.mulf %28, %29 : vector<8x8xf32>
    %cst_13 = arith.constant 0.000000e+00 : f32
    %31 = vector.broadcast %cst_13 : f32 to vector<1x8xf32>
    %32 = arith.cmpf ogt, %20, %31 : vector<1x8xf32>
    %cst_14 = arith.constant -1.000000e+30 : f32
    %33 = vector.shape_cast %32 : vector<1x8xi1> to vector<1x8xi1>
    %34 = vector.broadcast %33 : vector<1x8xi1> to vector<8x8xi1>
    %35 = vector.broadcast %cst_14 : f32 to vector<8x8xf32>
    %36 = arith.select %34, %30, %35 : vector<8x8xi1>, vector<8x8xf32>
    %cst_15 = arith.constant dense<0xFF800000> : vector<8xf32>
    %37 = vector.multi_reduction <maximumf>, %36, %cst_15 [1] : vector<8x8xf32> to vector<8xf32>
    %38 = vector.shape_cast %37 : vector<8xf32> to vector<8x1xf32>
    %39 = vector.broadcast %38 : vector<8x1xf32> to vector<8x8xf32>
    %40 = arith.subf %36, %39 : vector<8x8xf32>
    %41 = math.exp %40 : vector<8x8xf32>
    %cst_16 = arith.constant dense<0.000000e+00> : vector<8xf32>
    %42 = vector.multi_reduction <add>, %41, %cst_16 [1] : vector<8x8xf32> to vector<8xf32>
    %43 = vector.shape_cast %42 : vector<8xf32> to vector<8x1xf32>
    %44 = tpu.reciprocal %43 {approx = true} : vector<8x1xf32> -> vector<8x1xf32>
    %45 = vector.broadcast %44 : vector<8x1xf32> to vector<8x8xf32>
    %46 = arith.mulf %41, %45 : vector<8x8xf32>
    %47 = arith.truncf %46 : vector<8x8xf32> to vector<8x8xbf16>
    %cst_17 = arith.constant dense<0.000000e+00> : vector<8x8xf32>
    %48 = tpu.matmul %47, %26, %cst_17 {dimension_numbers = #tpu.dot_dimension_numbers<[1], [0], [0], [1], [0, 0, 1, 1], [], []>} : vector<8x8xbf16>, vector<8x8xbf16>, vector<8x8xf32> -> vector<8x8xf32>
    %49 = vector.extract_strided_slice %15 {offsets = [0, 8], sizes = [8, 8], strides = [1, 1]} : vector<8x32xf32> to vector<8x8xf32>
    %50 = arith.truncf %49 : vector<8x8xf32> to vector<8x8xbf16>
    %51 = vector.extract_strided_slice %8 {offsets = [0, 8], sizes = [8, 8], strides = [1, 1]} : vector<8x32xf32> to vector<8x8xf32>
    %52 = arith.truncf %51 : vector<8x8xf32> to vector<8x8xbf16>
    %53 = vector.extract_strided_slice %18 {offsets = [0, 8], sizes = [8, 8], strides = [1, 1]} : vector<8x32xf32> to vector<8x8xf32>
    %54 = arith.truncf %53 : vector<8x8xf32> to vector<8x8xbf16>
    %55 = tpu.transpose %52, [1, 0] : vector<8x8xbf16> -> vector<8x8xbf16>
    %cst_18 = arith.constant dense<0.000000e+00> : vector<8x8xf32>
    %56 = tpu.matmul %50, %55, %cst_18 {dimension_numbers = #tpu.dot_dimension_numbers<[1], [0], [0], [1], [0, 0, 1, 1], [], []>} : vector<8x8xbf16>, vector<8x8xbf16>, vector<8x8xf32> -> vector<8x8xf32>
    %cst_19 = arith.constant 0.353553385 : f32
    %57 = vector.broadcast %cst_19 : f32 to vector<8x8xf32>
    %58 = arith.mulf %56, %57 : vector<8x8xf32>
    %cst_20 = arith.constant 0.000000e+00 : f32
    %59 = vector.broadcast %cst_20 : f32 to vector<1x8xf32>
    %60 = arith.cmpf ogt, %20, %59 : vector<1x8xf32>
    %cst_21 = arith.constant -1.000000e+30 : f32
    %61 = vector.shape_cast %60 : vector<1x8xi1> to vector<1x8xi1>
    %62 = vector.broadcast %61 : vector<1x8xi1> to vector<8x8xi1>
    %63 = vector.broadcast %cst_21 : f32 to vector<8x8xf32>
    %64 = arith.select %62, %58, %63 : vector<8x8xi1>, vector<8x8xf32>
    %cst_22 = arith.constant dense<0xFF800000> : vector<8xf32>
    %65 = vector.multi_reduction <maximumf>, %64, %cst_22 [1] : vector<8x8xf32> to vector<8xf32>
    %66 = vector.shape_cast %65 : vector<8xf32> to vector<8x1xf32>
    %67 = vector.broadcast %66 : vector<8x1xf32> to vector<8x8xf32>
    %68 = arith.subf %64, %67 : vector<8x8xf32>
    %69 = math.exp %68 : vector<8x8xf32>
    %cst_23 = arith.constant dense<0.000000e+00> : vector<8xf32>
    %70 = vector.multi_reduction <add>, %69, %cst_23 [1] : vector<8x8xf32> to vector<8xf32>
    %71 = vector.shape_cast %70 : vector<8xf32> to vector<8x1xf32>
    %72 = tpu.reciprocal %71 {approx = true} : vector<8x1xf32> -> vector<8x1xf32>
    %73 = vector.broadcast %72 : vector<8x1xf32> to vector<8x8xf32>
    %74 = arith.mulf %69, %73 : vector<8x8xf32>
    %75 = arith.truncf %74 : vector<8x8xf32> to vector<8x8xbf16>
    %cst_24 = arith.constant dense<0.000000e+00> : vector<8x8xf32>
    %76 = tpu.matmul %75, %54, %cst_24 {dimension_numbers = #tpu.dot_dimension_numbers<[1], [0], [0], [1], [0, 0, 1, 1], [], []>} : vector<8x8xbf16>, vector<8x8xbf16>, vector<8x8xf32> -> vector<8x8xf32>
    %77 = vector.extract_strided_slice %15 {offsets = [0, 16], sizes = [8, 8], strides = [1, 1]} : vector<8x32xf32> to vector<8x8xf32>
    %78 = arith.truncf %77 : vector<8x8xf32> to vector<8x8xbf16>
    %79 = vector.extract_strided_slice %8 {offsets = [0, 16], sizes = [8, 8], strides = [1, 1]} : vector<8x32xf32> to vector<8x8xf32>
    %80 = arith.truncf %79 : vector<8x8xf32> to vector<8x8xbf16>
    %81 = vector.extract_strided_slice %18 {offsets = [0, 16], sizes = [8, 8], strides = [1, 1]} : vector<8x32xf32> to vector<8x8xf32>
    %82 = arith.truncf %81 : vector<8x8xf32> to vector<8x8xbf16>
    %83 = tpu.transpose %80, [1, 0] : vector<8x8xbf16> -> vector<8x8xbf16>
    %cst_25 = arith.constant dense<0.000000e+00> : vector<8x8xf32>
    %84 = tpu.matmul %78, %83, %cst_25 {dimension_numbers = #tpu.dot_dimension_numbers<[1], [0], [0], [1], [0, 0, 1, 1], [], []>} : vector<8x8xbf16>, vector<8x8xbf16>, vector<8x8xf32> -> vector<8x8xf32>
    %cst_26 = arith.constant 0.353553385 : f32
    %85 = vector.broadcast %cst_26 : f32 to vector<8x8xf32>
    %86 = arith.mulf %84, %85 : vector<8x8xf32>
    %cst_27 = arith.constant 0.000000e+00 : f32
    %87 = vector.broadcast %cst_27 : f32 to vector<1x8xf32>
    %88 = arith.cmpf ogt, %20, %87 : vector<1x8xf32>
    %cst_28 = arith.constant -1.000000e+30 : f32
    %89 = vector.shape_cast %88 : vector<1x8xi1> to vector<1x8xi1>
    %90 = vector.broadcast %89 : vector<1x8xi1> to vector<8x8xi1>
    %91 = vector.broadcast %cst_28 : f32 to vector<8x8xf32>
    %92 = arith.select %90, %86, %91 : vector<8x8xi1>, vector<8x8xf32>
    %cst_29 = arith.constant dense<0xFF800000> : vector<8xf32>
    %93 = vector.multi_reduction <maximumf>, %92, %cst_29 [1] : vector<8x8xf32> to vector<8xf32>
    %94 = vector.shape_cast %93 : vector<8xf32> to vector<8x1xf32>
    %95 = vector.broadcast %94 : vector<8x1xf32> to vector<8x8xf32>
    %96 = arith.subf %92, %95 : vector<8x8xf32>
    %97 = math.exp %96 : vector<8x8xf32>
    %cst_30 = arith.constant dense<0.000000e+00> : vector<8xf32>
    %98 = vector.multi_reduction <add>, %97, %cst_30 [1] : vector<8x8xf32> to vector<8xf32>
    %99 = vector.shape_cast %98 : vector<8xf32> to vector<8x1xf32>
    %100 = tpu.reciprocal %99 {approx = true} : vector<8x1xf32> -> vector<8x1xf32>
    %101 = vector.broadcast %100 : vector<8x1xf32> to vector<8x8xf32>
    %102 = arith.mulf %97, %101 : vector<8x8xf32>
    %103 = arith.truncf %102 : vector<8x8xf32> to vector<8x8xbf16>
    %cst_31 = arith.constant dense<0.000000e+00> : vector<8x8xf32>
    %104 = tpu.matmul %103, %82, %cst_31 {dimension_numbers = #tpu.dot_dimension_numbers<[1], [0], [0], [1], [0, 0, 1, 1], [], []>} : vector<8x8xbf16>, vector<8x8xbf16>, vector<8x8xf32> -> vector<8x8xf32>
    %105 = vector.extract_strided_slice %15 {offsets = [0, 24], sizes = [8, 8], strides = [1, 1]} : vector<8x32xf32> to vector<8x8xf32>
    %106 = arith.truncf %105 : vector<8x8xf32> to vector<8x8xbf16>
    %107 = vector.extract_strided_slice %8 {offsets = [0, 24], sizes = [8, 8], strides = [1, 1]} : vector<8x32xf32> to vector<8x8xf32>
    %108 = arith.truncf %107 : vector<8x8xf32> to vector<8x8xbf16>
    %109 = vector.extract_strided_slice %18 {offsets = [0, 24], sizes = [8, 8], strides = [1, 1]} : vector<8x32xf32> to vector<8x8xf32>
    %110 = arith.truncf %109 : vector<8x8xf32> to vector<8x8xbf16>
    %111 = tpu.transpose %108, [1, 0] : vector<8x8xbf16> -> vector<8x8xbf16>
    %cst_32 = arith.constant dense<0.000000e+00> : vector<8x8xf32>
    %112 = tpu.matmul %106, %111, %cst_32 {dimension_numbers = #tpu.dot_dimension_numbers<[1], [0], [0], [1], [0, 0, 1, 1], [], []>} : vector<8x8xbf16>, vector<8x8xbf16>, vector<8x8xf32> -> vector<8x8xf32>
    %cst_33 = arith.constant 0.353553385 : f32
    %113 = vector.broadcast %cst_33 : f32 to vector<8x8xf32>
    %114 = arith.mulf %112, %113 : vector<8x8xf32>
    %cst_34 = arith.constant 0.000000e+00 : f32
    %115 = vector.broadcast %cst_34 : f32 to vector<1x8xf32>
    %116 = arith.cmpf ogt, %20, %115 : vector<1x8xf32>
    %cst_35 = arith.constant -1.000000e+30 : f32
    %117 = vector.shape_cast %116 : vector<1x8xi1> to vector<1x8xi1>
    %118 = vector.broadcast %117 : vector<1x8xi1> to vector<8x8xi1>
    %119 = vector.broadcast %cst_35 : f32 to vector<8x8xf32>
    %120 = arith.select %118, %114, %119 : vector<8x8xi1>, vector<8x8xf32>
    %cst_36 = arith.constant dense<0xFF800000> : vector<8xf32>
    %121 = vector.multi_reduction <maximumf>, %120, %cst_36 [1] : vector<8x8xf32> to vector<8xf32>
    %122 = vector.shape_cast %121 : vector<8xf32> to vector<8x1xf32>
    %123 = vector.broadcast %122 : vector<8x1xf32> to vector<8x8xf32>
    %124 = arith.subf %120, %123 : vector<8x8xf32>
    %125 = math.exp %124 : vector<8x8xf32>
    %cst_37 = arith.constant dense<0.000000e+00> : vector<8xf32>
    %126 = vector.multi_reduction <add>, %125, %cst_37 [1] : vector<8x8xf32> to vector<8xf32>
    %127 = vector.shape_cast %126 : vector<8xf32> to vector<8x1xf32>
    %128 = tpu.reciprocal %127 {approx = true} : vector<8x1xf32> -> vector<8x1xf32>
    %129 = vector.broadcast %128 : vector<8x1xf32> to vector<8x8xf32>
    %130 = arith.mulf %125, %129 : vector<8x8xf32>
    %131 = arith.truncf %130 : vector<8x8xf32> to vector<8x8xbf16>
    %cst_38 = arith.constant dense<0.000000e+00> : vector<8x8xf32>
    %132 = tpu.matmul %131, %110, %cst_38 {dimension_numbers = #tpu.dot_dimension_numbers<[1], [0], [0], [1], [0, 0, 1, 1], [], []>} : vector<8x8xbf16>, vector<8x8xbf16>, vector<8x8xf32> -> vector<8x8xf32>
    %133 = tpu.concatenate %48, %76, %104, %132 in 1 : vector<8x8xf32>, vector<8x8xf32>, vector<8x8xf32>, vector<8x8xf32> -> vector<8x32xf32>
    %c0_39 = arith.constant 0 : index
    %c0_40 = arith.constant 0 : index
    %c0_41 = arith.constant 0 : index
    %134 = vector.load %arg9[%c0_39, %c0_40, %c0_41] : memref<1x8x8xf32, #tpu.memory_space<vmem>>, vector<1x8x8xf32>
    %135 = vector.shape_cast %134 : vector<1x8x8xf32> to vector<8x8xf32>
    %136 = vector.shape_cast %130 : vector<8x8xf32> to vector<1x8x8xf32>
    tpu.vector_store %arg9[%c0_39, %c0_40, %c0_41], %136 {strides = array<i32>} : memref<1x8x8xf32, #tpu.memory_space<vmem>>, vector<1x8x8xf32>,
    %c0_42 = arith.constant 0 : index
    %c0_43 = arith.constant 0 : index
    %c0_44 = arith.constant 0 : index
    %137 = vector.load %arg5[%c0_42, %c0_43, %c0_44] : memref<1x8x32xf32, #tpu.memory_space<vmem>>, vector<1x8x32xf32>
    %138 = vector.shape_cast %137 : vector<1x8x32xf32> to vector<8x32xf32>
    %139 = arith.addf %138, %133 : vector<8x32xf32>
    %140 = arith.truncf %139 : vector<8x32xf32> to vector<8x32xbf16>
    %c0_45 = arith.constant 0 : index
    %c0_46 = arith.constant 0 : index
    %141 = vector.load %arg6[%c0_45, %c0_46] : memref<32x32xbf16, #tpu.memory_space<vmem>>, vector<32x32xbf16>
    %cst_47 = arith.constant dense<0.000000e+00> : vector<8x32xf32>
    %142 = tpu.matmul %140, %141, %cst_47 {dimension_numbers = #tpu.dot_dimension_numbers<[1], [0], [0], [1], [0, 0, 1, 1], [], []>} : vector<8x32xbf16>, vector<32x32xbf16>, vector<8x32xf32> -> vector<8x32xf32>
    %c0_48 = arith.constant 0 : index
    %c0_49 = arith.constant 0 : index
    %143 = vector.load %arg7[%c0_48, %c0_49] : memref<1x32xf32, #tpu.memory_space<vmem>>, vector<1x32xf32>
    %144 = vector.broadcast %143 : vector<1x32xf32> to vector<8x32xf32>
    %145 = arith.addf %142, %144 : vector<8x32xf32>
    %c0_50 = arith.constant 0 : index
    %c0_51 = arith.constant 0 : index
    %c0_52 = arith.constant 0 : index
    %146 = vector.load %arg8[%c0_50, %c0_51, %c0_52] : memref<1x8x32xf32, #tpu.memory_space<vmem>>, vector<1x8x32xf32>
    %147 = vector.shape_cast %146 : vector<1x8x32xf32> to vector<8x32xf32>
    %148 = vector.shape_cast %145 : vector<8x32xf32> to vector<1x8x32xf32>
    tpu.vector_store %arg8[%c0_50, %c0_51, %c0_52], %148 {strides = array<i32>} : memref<1x8x32xf32, #tpu.memory_space<vmem>>, vector<1x8x32xf32>,
    return
  }
  func.func @transform_0(%arg0: i32) -> (i32, i32, i32) {
    %c0_i32 = arith.constant 0 : i32
    %c0_i32_0 = arith.constant 0 : i32
    %c0_i32_1 = arith.constant 0 : i32
    return %arg0, %c0_i32, %c0_i32_0 : i32, i32, i32
  }
  func.func @transform_1(%arg0: i32) -> (i32, i32, i32) {
    %c0_i32 = arith.constant 0 : i32
    %c0_i32_0 = arith.constant 0 : i32
    %c0_i32_1 = arith.constant 0 : i32
    return %arg0, %c0_i32, %c0_i32_0 : i32, i32, i32
  }
  func.func @transform_2(%arg0: i32) -> (i32, i32, i32) {
    %c0_i32 = arith.constant 0 : i32
    %c0_i32_0 = arith.constant 0 : i32
    %c0_i32_1 = arith.constant 0 : i32
    return %arg0, %c0_i32, %c0_i32_0 : i32, i32, i32
  }
  func.func @transform_3(%arg0: i32) -> (i32, i32, i32) {
    %c0_i32 = arith.constant 0 : i32
    %c0_i32_0 = arith.constant 0 : i32
    %c0_i32_1 = arith.constant 0 : i32
    return %arg0, %c0_i32, %c0_i32_0 : i32, i32, i32
  }
  func.func @transform_4(%arg0: i32) -> (i32, i32, i32) {
    %c0_i32 = arith.constant 0 : i32
    %c0_i32_0 = arith.constant 0 : i32
    %c0_i32_1 = arith.constant 0 : i32
    return %arg0, %c0_i32, %c0_i32_0 : i32, i32, i32
  }
  func.func @transform_5(%arg0: i32) -> (i32, i32) {
    %c0_i32 = arith.constant 0 : i32
    %c0_i32_0 = arith.constant 0 : i32
    %c0_i32_1 = arith.constant 0 : i32
    return %c0_i32, %c0_i32_0 : i32, i32
  }
  func.func @transform_6(%arg0: i32) -> (i32, i32) {
    %c0_i32 = arith.constant 0 : i32
    %c0_i32_0 = arith.constant 0 : i32
    %c0_i32_1 = arith.constant 0 : i32
    return %c0_i32, %c0_i32_0 : i32, i32
  }
  func.func @transform_7(%arg0: i32) -> (i32, i32, i32) {
    %c0_i32 = arith.constant 0 : i32
    %c0_i32_0 = arith.constant 0 : i32
    %c0_i32_1 = arith.constant 0 : i32
    return %arg0, %c0_i32, %c0_i32_0 : i32, i32, i32
  }
  func.func @transform_8(%arg0: i32) -> (i32, i32, i32) {
    %c0_i32 = arith.constant 0 : i32
    %c0_i32_0 = arith.constant 0 : i32
    %c0_i32_1 = arith.constant 0 : i32
    return %arg0, %c0_i32, %c0_i32_0 : i32, i32, i32
  }
}

</mosaic_0001>

<bundles_post_ra>
// kernel: _lambda_.28
= control target key start
LH: loop header
LB: loop body
LE: loop exit
PB: predicated region body
PF: predicated region fallthrough
CT: control target
= control target key end

     0   :  { %8 = vsyncpa [#allocation4], 0  ;;  %s236_s0 = inlined_call_operand.hbm [shape: f32[16,32], index: 0, kind: input, shape index: {}]   ;;  %s237_s1 = inlined_call_operand.hbm [shape: bf16[32,32], index: 1, kind: input, shape index: {}]   ;;  %s238_s2 = inlined_call_operand.vmem [shape: f32[1,32], index: 2, kind: input, shape index: {}]   ;;  %s239_s3 = inlined_call_operand.vmem [shape: f32[16,32], index: 3, kind: output, shape index: {}]  }
   0x1   :  { %s14_s14 = sshll.u32 %s236_s0, 4  ;;  %s15_s14 = int_to_ptr.hbm [resolvable:$true] %s14_s14 }
   0x2   :  { %9 = vsyncpa [#allocation6], 0  ;;  %s187_s15 = smov [#allocation3]   ;;  %s27_s19 = sshll.u32 %s237_s1, 4  ;;  %s28_s19 = int_to_ptr.hbm [resolvable:$true] %s27_s19 }
   0x3   :  { %s16_s16 = sshll.u32 %s187_s15, 4  ;;  %s188_s20 = smov 128   ;;  %s17_s16 = int_to_ptr.vmem [resolvable:$true] %s16_s16 }
   0x4   :  { %s189_s21 = smov 8   ;;  %s190_s22 = smov [#allocation5]  }
   0x5   :  { %22 = dma.hbm_to_vmem [thread:$0]  %s15_s14, 256, %s17_s16, [#allocation4], %s188_s20, %s188_s20, %s189_s21  }
   0x6   :  { %s29_s23 = sshll.u32 %s190_s22, 4  ;;  %s191_s24 = smov 64   ;;  %s30_s23 = int_to_ptr.vmem [resolvable:$true] %s29_s23 }
   0x7   :  { %s192_s25 = smov 4  }
   0x8   :  { %35 = dma.hbm_to_vmem [thread:$0]  %s28_s19, 256, %s30_s23, [#allocation6], %s191_s24, %s191_s24, %s192_s25  }
   0x9   :  { %183 = dma.done.wait [#allocation4], 256  }
   0xa   :  { %184 = vsyncadd [#allocation4], 4294967040 }
   0xb   :  { %185 = dma.done.wait [#allocation6], 256  }
   0xc   :  { %186 = vsyncadd [#allocation6], 4294967040  ;;  %vm51_vm0 = vcmask 261120   ;;  %v193_v0 = vmov 0.0   ;;  %v126_v1 = vld [vmem:[#allocation5 + $0x8] sm:$0xff]  ;;  %v125_v2 = vld [vmem:[#allocation5] sm:$0xff] }
   0xd   :  { %52 = vst.msk [vmem:[#allocation2] sm:$0xff] %vm51_vm0, %v193_v0  ;;  %85 = vmatpush.bf16.msra.mxu0 %v126_v1  ;;  %v56_v3 = vld [vmem:[#allocation3] sm:$0xff]  ;;  %v57_v4 = vld [vmem:[#allocation3 + $0x8] sm:$0xff]  ;;  %v134_v10 = vld [vmem:[%s238_s2] ss:$0 sm:$0xff] }
   0xe   :  { %53 = vst.msk [vmem:[#allocation2 + $0x8] sm:$0xff] %vm51_vm0, %v193_v0  ;;  %v58_v5 = vpack.c.bf16 %v57_v4, %v56_v3 }
  0x11   :  { %86 = vmatpush.bf16.msra.mxu0 %v125_v2 }
  0x14   :  { %124 = vmatmul.msk.bf16.vlgmr.msra.gmra.mxu0 %vm51_vm0, %v58_v5  ;;  %v54_v6 = vld [vmem:[#allocation2] sm:$0xff] }
  0x15   :  { %v55_v9 = vld [vmem:[#allocation2 + $0x8] sm:$0xff] }
  0x91   :  { %v88_v7 = vpop.f32.mrf.mxu0 }
  0x92   :  { %v93_v8 = vadd.f32 %v88_v7, %v54_v6 }
  0x94   :  { %95 = vst.msk [vmem:[#allocation2] sm:$0xff] %vm51_vm0, %v93_v8 }
  0x99   :  { %v90_v11 = vpop.f32.mrf.mxu0 }
  0x9a   :  { %v94_v12 = vadd.f32 %v90_v11, %v55_v9 }
  0x9b   :  { %v100_v13 = vld [vmem:[#allocation2] sm:$0xff] }
  0x9c   :  { %v106_v14 = vadd.f32 %v134_v10, %v100_v13  ;;  %96 = vst.msk [vmem:[#allocation2 + $0x8] sm:$0xff] %vm51_vm0, %v94_v12 }
  0x9e   :  { %108 = vst.msk [vmem:[%s239_s3] sm:$0xff] %vm51_vm0, %v106_v14 }
  0xa3   :  { %v101_v15 = vld [vmem:[#allocation2 + $0x8] sm:$0xff] }
  0xa4   :  { %v107_v16 = vadd.f32 %v134_v10, %v101_v15 }
  0xa6   :  { %109 = vst.msk [vmem:[%s239_s3 + $0x8] sm:$0xff] %vm51_vm0, %v107_v16 }
  0xa7   :  { %114 = vsyncpa [#allocation4], 1 }
  0xa8   :  { %115 = vsyncpa [#allocation6], 1 }

// kernel: _lambda_.30
= control target key start
LH: loop header
LB: loop body
LE: loop exit
PB: predicated region body
PF: predicated region fallthrough
CT: control target
= control target key end

     0   :  { %8 = vsyncpa [#allocation4], 0  ;;  %s142_s15 = smov [#allocation3]   ;;  %s143_s17 = smov 64   ;;  %s190_s0 = inlined_call_operand.vmem [shape: f32[16,32], index: 0, kind: input, shape index: {}]   ;;  %s191_s1 = inlined_call_operand.hbm [shape: bf16[32,64], index: 1, kind: input, shape index: {}]   ;;  %s192_s2 = inlined_call_operand.vmem [shape: f32[1,64], index: 2, kind: input, shape index: {}]   ;;  %s193_s3 = inlined_call_operand.vmem [shape: f32[16,64], index: 3, kind: output, shape index: {}]  }
   0x1   :  { %s15_s14 = sshll.u32 %s191_s1, 4  ;;  %s17_s16 = sshll.u32 %s142_s15, 4  ;;  %s16_s14 = int_to_ptr.hbm [resolvable:$true] %s15_s14  ;;  %s18_s16 = int_to_ptr.vmem [resolvable:$true] %s17_s16 }
   0x2   :  { %s144_s18 = smov 4  }
   0x3   :  { %23 = dma.hbm_to_vmem [thread:$0]  %s16_s14, 256, %s18_s16, [#allocation4], %s143_s17, %s143_s17, %s144_s18  }
   0x4   :  { %140 = dma.done.wait [#allocation4], 256  }
   0x5   :  { %141 = vsyncadd [#allocation4], 4294967040  ;;  %vm35_vm0 = vcmask 523264   ;;  %v145_v0 = vmov 0.0   ;;  %v110_v1 = vld [vmem:[#allocation3 + $0x8] sm:$0xff]  ;;  %v109_v2 = vld [vmem:[#allocation3] sm:$0xff] }
   0x6   :  { %36 = vst.msk [vmem:[#allocation2] sm:$0xff] %vm35_vm0, %v145_v0  ;;  %69 = vmatpush.bf16.msra.mxu0 %v110_v1  ;;  %v40_v3 = vld [vmem:[%s190_s0] sm:$0xff]  ;;  %v41_v4 = vld [vmem:[%s190_s0 + $0x8] sm:$0xff]  ;;  %vm59_vm1 = vcmask 261120  }
   0x7   :  { %37 = vst.msk [vmem:[#allocation2 + $0x8] sm:$0xff] %vm35_vm0, %v145_v0  ;;  %v42_v5 = vpack.c.bf16 %v41_v4, %v40_v3  ;;  %v115_v10 = vld [vmem:[%s192_s2] ss:$0 sm:$0xff] }
   0xa   :  { %70 = vmatpush.bf16.msra.mxu0 %v109_v2 }
   0xd   :  { %108 = vmatmul.msk.bf16.vlgmr.msra.gmra.mxu0 %vm59_vm1, %v42_v5  ;;  %v38_v6 = vld [vmem:[#allocation2] sm:$0xff] }
   0xe   :  { %v39_v9 = vld [vmem:[#allocation2 + $0x8] sm:$0xff] }
  0x8a   :  { %v72_v7 = vpop.f32.mrf.mxu0 }
  0x8b   :  { %v77_v8 = vadd.f32 %v72_v7, %v38_v6 }
  0x8d   :  { %80 = vst.msk [vmem:[#allocation2] sm:$0xff] %vm35_vm0, %v77_v8 }
  0x92   :  { %v74_v11 = vpop.f32.mrf.mxu0 }
  0x93   :  { %v78_v12 = vadd.f32 %v74_v11, %v39_v9 }
  0x94   :  { %v85_v13 = vld [vmem:[#allocation2] sm:$0xff] }
  0x95   :  { %v91_v14 = vadd.f32 %v115_v10, %v85_v13  ;;  %81 = vst.msk [vmem:[#allocation2 + $0x8] sm:$0xff] %vm35_vm0, %v78_v12 }
  0x97   :  { %93 = vst.msk [vmem:[%s193_s3] sm:$0xff] %vm35_vm0, %v91_v14 }
  0x9c   :  { %v86_v15 = vld [vmem:[#allocation2 + $0x8] sm:$0xff] }
  0x9d   :  { %v92_v16 = vadd.f32 %v115_v10, %v86_v15 }
  0x9f   :  { %94 = vst.msk [vmem:[%s193_s3 + $0x8] sm:$0xff] %vm35_vm0, %v92_v16 }
  0xa0   :  { %99 = vsyncpa [#allocation4], 1 }

// kernel: _lambda_.29
= control target key start
LH: loop header
LB: loop body
LE: loop exit
PB: predicated region body
PF: predicated region fallthrough
CT: control target
= control target key end

     0   :  { %vm19_vm0 = vcmask 261120   ;;  %v95_v1 = vmov 0.0   ;;  %s144_s1 = inlined_call_operand.vmem [shape: bf16[32,32], index: 1, kind: input, shape index: {}]   ;;  %s145_s0 = inlined_call_operand.vmem [shape: f32[16,32], index: 0, kind: input, shape index: {}]   ;;  %s146_s2 = inlined_call_operand.vmem [shape: f32[1,32], index: 2, kind: input, shape index: {}]   ;;  %s147_s3 = inlined_call_operand.vmem [shape: f32[16,32], index: 3, kind: output, shape index: {}]  }
   0x1   :  { %v92_v0 = vld [vmem:[%s144_s1 + $0x8] sm:$0xff]  ;;  %20 = vst.msk [vmem:[#allocation2] sm:$0xff] %vm19_vm0, %v95_v1  ;;  %v91_v2 = vld [vmem:[%s144_s1] sm:$0xff] }
   0x2   :  { %21 = vst.msk [vmem:[#allocation2 + $0x8] sm:$0xff] %vm19_vm0, %v95_v1  ;;  %53 = vmatpush.bf16.msra.mxu0 %v92_v0  ;;  %v24_v3 = vld [vmem:[%s145_s0] sm:$0xff]  ;;  %v25_v4 = vld [vmem:[%s145_s0 + $0x8] sm:$0xff] }
   0x3   :  { %v26_v5 = vpack.c.bf16 %v25_v4, %v24_v3  ;;  %v94_v10 = vld [vmem:[%s146_s2] ss:$0 sm:$0xff] }
   0x6   :  { %54 = vmatpush.bf16.msra.mxu0 %v91_v2 }
   0x8   :  { %v22_v6 = vld [vmem:[#allocation2] sm:$0xff] }
   0x9   :  { %90 = vmatmul.msk.bf16.vlgmr.msra.gmra.mxu0 %vm19_vm0, %v26_v5  ;;  %v23_v9 = vld [vmem:[#allocation2 + $0x8] sm:$0xff] }
  0x86   :  { %v56_v7 = vpop.f32.mrf.mxu0 }
  0x87   :  { %v61_v8 = vadd.f32 %v56_v7, %v22_v6 }
  0x89   :  { %63 = vst.msk [vmem:[#allocation2] sm:$0xff] %vm19_vm0, %v61_v8 }
  0x8e   :  { %v58_v11 = vpop.f32.mrf.mxu0 }
  0x8f   :  { %v62_v12 = vadd.f32 %v58_v11, %v23_v9 }
  0x90   :  { %v68_v13 = vld [vmem:[#allocation2] sm:$0xff] }
  0x91   :  { %v74_v14 = vadd.f32 %v94_v10, %v68_v13  ;;  %64 = vst.msk [vmem:[#allocation2 + $0x8] sm:$0xff] %vm19_vm0, %v62_v12 }
  0x93   :  { %76 = vst.msk [vmem:[%s147_s3] sm:$0xff] %vm19_vm0, %v74_v14 }
  0x98   :  { %v69_v15 = vld [vmem:[#allocation2 + $0x8] sm:$0xff] }
  0x99   :  { %v75_v16 = vadd.f32 %v94_v10, %v69_v15 }
  0x9b   :  { %77 = vst.msk [vmem:[%s147_s3 + $0x8] sm:$0xff] %vm19_vm0, %v75_v16 }

// kernel: _lambda_.33
= control target key start
LH: loop header
LB: loop body
LE: loop exit
PB: predicated region body
PF: predicated region fallthrough
CT: control target
= control target key end

     0   :  { %vm19_vm0 = vcmask 523264   ;;  %v96_v1 = vmov 0.0   ;;  %vm43_vm1 = vcmask 261120   ;;  %s144_s1 = inlined_call_operand.vmem [shape: bf16[32,64], index: 1, kind: input, shape index: {}]   ;;  %s145_s0 = inlined_call_operand.vmem [shape: f32[16,32], index: 0, kind: input, shape index: {}]   ;;  %s146_s2 = inlined_call_operand.vmem [shape: f32[1,64], index: 2, kind: input, shape index: {}]   ;;  %s147_s3 = inlined_call_operand.vmem [shape: f32[16,64], index: 3, kind: output, shape index: {}]  }
   0x1   :  { %v93_v0 = vld [vmem:[%s144_s1 + $0x8] sm:$0xff]  ;;  %20 = vst.msk [vmem:[#allocation2] sm:$0xff] %vm19_vm0, %v96_v1  ;;  %v92_v2 = vld [vmem:[%s144_s1] sm:$0xff] }
   0x2   :  { %21 = vst.msk [vmem:[#allocation2 + $0x8] sm:$0xff] %vm19_vm0, %v96_v1  ;;  %53 = vmatpush.bf16.msra.mxu0 %v93_v0  ;;  %v24_v3 = vld [vmem:[%s145_s0] sm:$0xff]  ;;  %v25_v4 = vld [vmem:[%s145_s0 + $0x8] sm:$0xff] }
   0x3   :  { %v26_v5 = vpack.c.bf16 %v25_v4, %v24_v3  ;;  %v95_v10 = vld [vmem:[%s146_s2] ss:$0 sm:$0xff] }
   0x6   :  { %54 = vmatpush.bf16.msra.mxu0 %v92_v2 }
   0x8   :  { %v22_v6 = vld [vmem:[#allocation2] sm:$0xff] }
   0x9   :  { %91 = vmatmul.msk.bf16.vlgmr.msra.gmra.mxu0 %vm43_vm1, %v26_v5  ;;  %v23_v9 = vld [vmem:[#allocation2 + $0x8] sm:$0xff] }
  0x86   :  { %v56_v7 = vpop.f32.mrf.mxu0 }
  0x87   :  { %v61_v8 = vadd.f32 %v56_v7, %v22_v6 }
  0x89   :  { %64 = vst.msk [vmem:[#allocation2] sm:$0xff] %vm19_vm0, %v61_v8 }
  0x8e   :  { %v58_v11 = vpop.f32.mrf.mxu0 }
  0x8f   :  { %v62_v12 = vadd.f32 %v58_v11, %v23_v9 }
  0x90   :  { %v69_v13 = vld [vmem:[#allocation2] sm:$0xff] }
  0x91   :  { %v75_v14 = vadd.f32 %v95_v10, %v69_v13  ;;  %65 = vst.msk [vmem:[#allocation2 + $0x8] sm:$0xff] %vm19_vm0, %v62_v12 }
  0x93   :  { %77 = vst.msk [vmem:[%s147_s3] sm:$0xff] %vm19_vm0, %v75_v14 }
  0x98   :  { %v70_v15 = vld [vmem:[#allocation2 + $0x8] sm:$0xff] }
  0x99   :  { %v76_v16 = vadd.f32 %v95_v10, %v70_v15 }
  0x9b   :  { %78 = vst.msk [vmem:[%s147_s3 + $0x8] sm:$0xff] %vm19_vm0, %v76_v16 }

// kernel: _lambda_.27
= control target key start
LH: loop header
LB: loop body
LE: loop exit
PB: predicated region body
PF: predicated region fallthrough
CT: control target
= control target key end

     0   :  { %vm19_vm0 = vcmask 257024   ;;  %v87_v1 = vmov 0.0   ;;  %vm40_vm1 = vcmask 261120   ;;  %s126_s1 = inlined_call_operand.vmem [shape: bf16[32,32], index: 1, kind: input, shape index: {}]   ;;  %s127_s0 = inlined_call_operand.vmem [shape: f32[4,32], index: 0, kind: input, shape index: {}]   ;;  %s128_s2 = inlined_call_operand.vmem [shape: f32[1,32], index: 2, kind: input, shape index: {}]   ;;  %s129_s3 = inlined_call_operand.vmem [shape: f32[4,32], index: 3, kind: output, shape index: {}]  }
   0x1   :  { %v84_v0 = vld [vmem:[%s126_s1 + $0x8] sm:$0xff]  ;;  %20 = vst.msk [vmem:[#allocation2] sm:$0xf] %vm19_vm0, %v87_v1  ;;  %v83_v2 = vld [vmem:[%s126_s1] sm:$0xff] }
   0x2   :  { %50 = vmatpush.bf16.msra.mxu0 %v84_v0  ;;  %v22_v3 = vld [vmem:[%s127_s0] sm:$0xf] }
   0x3   :  { %v23_v4 = vpack.c.bf16 %v22_v3, %v22_v3  ;;  %v86_v8 = vld [vmem:[%s128_s2] ss:$0 sm:$0xff] }
   0x6   :  { %51 = vmatpush.bf16.msra.mxu0 %v83_v2 }
   0x8   :  { %v21_v5 = vld [vmem:[#allocation2] sm:$0xf] }
   0x9   :  { %82 = vmatmul.msk.bf16.vlgmr.msra.gmra.mxu0 %vm40_vm1, %v23_v4 }
  0x86   :  { %v53_v6 = vpop.f32.mrf.mxu0 }
  0x87   :  { %v57_v7 = vadd.f32 %v53_v6, %v21_v5 }
  0x89   :  { %59 = vst.msk [vmem:[#allocation2] sm:$0xf] %vm19_vm0, %v57_v7 }
  0x8e   :  { %v55_v9 = vpop.f32.mrf.mxu0 }
  0x90   :  { %v63_v10 = vld [vmem:[#allocation2] sm:$0xf] }
  0x91   :  { %v68_v11 = vadd.f32 %v86_v8, %v63_v10 }
  0x93   :  { %69 = vst.msk [vmem:[%s129_s3] sm:$0xf] %vm19_vm0, %v68_v11 }

// kernel: _lambda_.38
= control target key start
LH: loop header
LB: loop body
LE: loop exit
PB: predicated region body
PF: predicated region fallthrough
CT: control target
= control target key end

     0   :  { %vm19_vm0 = vcmask 785408   ;;  %v96_v1 = vmov 0.0   ;;  %vm43_vm1 = vcmask 261120   ;;  %s144_s1 = inlined_call_operand.vmem [shape: bf16[32,96], index: 1, kind: input, shape index: {}]   ;;  %s145_s0 = inlined_call_operand.vmem [shape: f32[16,32], index: 0, kind: input, shape index: {}]   ;;  %s146_s2 = inlined_call_operand.vmem [shape: f32[1,96], index: 2, kind: input, shape index: {}]   ;;  %s147_s3 = inlined_call_operand.vmem [shape: f32[16,96], index: 3, kind: output, shape index: {}]  }
   0x1   :  { %v93_v0 = vld [vmem:[%s144_s1 + $0x8] sm:$0xff]  ;;  %20 = vst.msk [vmem:[#allocation2] sm:$0xff] %vm19_vm0, %v96_v1  ;;  %v92_v2 = vld [vmem:[%s144_s1] sm:$0xff] }
   0x2   :  { %21 = vst.msk [vmem:[#allocation2 + $0x8] sm:$0xff] %vm19_vm0, %v96_v1  ;;  %53 = vmatpush.bf16.msra.mxu0 %v93_v0  ;;  %v24_v3 = vld [vmem:[%s145_s0] sm:$0xff]  ;;  %v25_v4 = vld [vmem:[%s145_s0 + $0x8] sm:$0xff] }
   0x3   :  { %v26_v5 = vpack.c.bf16 %v25_v4, %v24_v3  ;;  %v95_v10 = vld [vmem:[%s146_s2] ss:$0 sm:$0xff] }
   0x6   :  { %54 = vmatpush.bf16.msra.mxu0 %v92_v2 }
   0x8   :  { %v22_v6 = vld [vmem:[#allocation2] sm:$0xff] }
   0x9   :  { %91 = vmatmul.msk.bf16.vlgmr.msra.gmra.mxu0 %vm43_vm1, %v26_v5  ;;  %v23_v9 = vld [vmem:[#allocation2 + $0x8] sm:$0xff] }
  0x86   :  { %v56_v7 = vpop.f32.mrf.mxu0 }
  0x87   :  { %v61_v8 = vadd.f32 %v56_v7, %v22_v6 }
  0x89   :  { %64 = vst.msk [vmem:[#allocation2] sm:$0xff] %vm19_vm0, %v61_v8 }
  0x8e   :  { %v58_v11 = vpop.f32.mrf.mxu0 }
  0x8f   :  { %v62_v12 = vadd.f32 %v58_v11, %v23_v9 }
  0x90   :  { %v69_v13 = vld [vmem:[#allocation2] sm:$0xff] }
  0x91   :  { %v75_v14 = vadd.f32 %v95_v10, %v69_v13  ;;  %65 = vst.msk [vmem:[#allocation2 + $0x8] sm:$0xff] %vm19_vm0, %v62_v12 }
  0x93   :  { %77 = vst.msk [vmem:[%s147_s3] sm:$0xff] %vm19_vm0, %v75_v14 }
  0x98   :  { %v70_v15 = vld [vmem:[#allocation2 + $0x8] sm:$0xff] }
  0x99   :  { %v76_v16 = vadd.f32 %v95_v10, %v70_v15 }
  0x9b   :  { %78 = vst.msk [vmem:[%s147_s3 + $0x8] sm:$0xff] %vm19_vm0, %v76_v16 }

// kernel: _lambda_.32
= control target key start
LH: loop header
LB: loop body
LE: loop exit
PB: predicated region body
PF: predicated region fallthrough
CT: control target
= control target key end

     0   :  { %s1276_s0 = inlined_call_operand.vmem [shape: f32[2,8,32], index: 0, kind: input, shape index: {}]   ;;  %s1277_s1 = inlined_call_operand.vmem [shape: f32[2,8,64], index: 1, kind: input, shape index: {}]   ;;  %s1278_s2 = inlined_call_operand.vmem [shape: f32[2,8,1], index: 2, kind: input, shape index: {}]   ;;  %s1279_s3 = inlined_call_operand.vmem [shape: f32[2,1,8], index: 3, kind: input, shape index: {}]   ;;  %s1280_s4 = inlined_call_operand.vmem [shape: f32[2,8,32], index: 4, kind: input, shape index: {}]   ;;  %s1281_s5 = inlined_call_operand.vmem [shape: bf16[64,32], index: 5, kind: input, shape index: {}]   ;;  %s1282_s6 = inlined_call_operand.vmem [shape: f32[1,32], index: 6, kind: input, shape index: {}]   ;;  %s1283_s7 = inlined_call_operand.vmem [shape: f32[2,8,32], index: 7, kind: output, shape index: {0}]   ;;  %s1284_s8 = inlined_call_operand.hbm [shape: f32[2,8,8], index: 8, kind: output, shape index: {1}]  }
   0x1   :  { %1285 = sst [smem:[#allocation5_spill]] %s1276_s0 }
   0x2   :  { %1286 = sst [smem:[#allocation6_spill]] %s1277_s1 }
   0x3   :  { %14 = vsyncpa [#allocation3], 0 }
   0x4   :  { %16 = vsyncpa [#allocation3 + $0x1], 0  ;;  %s1090_s27 = smov 0   ;;  %s1092_s28 = smov 0  }
   0x5   :  { %s1094_s29 = smov 0   ;;  %s1096_s30 = smov 0  }
   0x6 LB: > { %s1111_s9 = sadd.s32 4294967295, %s1031_s30   ;;  %s857_s10 = sadd.s32 4294967294, %s1031_s30   ;;  %s1031_s30 = sphi %s1096_s30, %s1296_s30   ;;  %s1027_s29 = sphi %s1094_s29, %s1295_s29   ;;  %s1023_s28 = sphi %s1092_s28, %s1294_s28   ;;  %s1019_s27 = sphi %s1090_s27, %s1293_s27  }
   0x7   : > { %s1115_s11 = sadd.s32 1, %s1031_s30   ;;  %s227_s12 = sadd.s32 1, %s1027_s29 }
   0x8   : > { %s224_s13 = ssub.s32 %s1031_s30, %s1115_s11  ;;  %p237_p0 = scmp.ne.s32.totalorder %s1027_s29, %s1023_s28 }
   0x9   : > { %p225_p1 = scmp.eq.s32.totalorder %s224_s13, 0  ;;  %p238_p2 = scmp.eq.s32.totalorder %s1111_s9, 1 }
   0xa   : > { %p243_p3 = scmp.ne.s32.totalorder %s1023_s28, %s1019_s27  ;;  %p244_p4 = scmp.eq.s32.totalorder %s857_s10, 1 }
   0xb   : > { %s1126_s14 = scalar_select %p225_p1, %s1027_s29, %s227_s12  }
   0xc   : > { %p1128_p5 = por %p238_p2, %p237_p0  ;;  %p1132_p6 = por %p244_p4, %p243_p3 }
   0xd   : > { %p860_p7 = scmp.ge.s32.totalorder %s1031_s30, 1  ;;  %p302_p8 = scmp.lt.s32.totalorder %s1031_s30, 3 }
   0xf   : > { %p303_p9 = pnand %p860_p7, %p302_p8 }
  0x10   : > { %p354_p10 = scmp.lt.s32.totalorder (!%p303_p9), %s1111_s9, 1  ;;  %s1289_s1 = sld [smem:[#allocation6_spill]] (!%p303_p9) }
  0x11   : > { %306 = sbr.rel (%p303_p9) target bundleno = 1452 (0x5ac), region = 48  ;;  %s1034_s12 = smov (!%p303_p9), 120  }
  0x12   : > { %s1290_s0 = sld [smem:[#allocation5_spill]] (!%p303_p9)  ;;  %s1035_s19 = smov (!%p303_p9), 96  }
  0x13   : > { %s1037_s22 = smov (!%p303_p9), 104   ;;  %s351_s23 = sand.u32 (!%p303_p9), 1, %s1023_s28  }
  0x14   : > { %s1038_s26 = smov (!%p303_p9), 88   ;;  %s1041_s13 = smov (!%p303_p9), 8  }
  0x16   : > { %v1033_v0 = vmov 0   ;;  %s355_s17 = scalar_select %p354_p10, %s1111_s9, 1  ;;  %vm390_vm1 = vcmask 64512   ;;  %vm434_vm3 = vcmask 1043456   ;;  %vm639_vm4 = vcmask 130048  }
  0x17   : > { %951 = vset.pattern.permute.xlu0 %v1033_v0  ;;  %vm641_vm5 = vcmask 195584   ;;  %vm649_vm6 = vcmask 261120   ;;  %vm688_vm7 = vcmask 523264  }
  0x18   : > { %s368_s20 = scalar_lea.vmem %s1279_s3, %s355_s17  ;;  %s1143_s21 = sshll.u32 %s355_s17, 3 }
  0x19   : > { %v387_v1 = vld [vmem:[%s368_s20] sm:$0x1]  ;;  %s365_s24 = scalar_lea.vmem %s1278_s2, %s1143_s21  ;;  %s361_s10 = scalar_lea.vmem %s1289_s1, %s1143_s21 }
  0x1a   : > { %vm411_vm0 = vcmp.gt.f32.partialorder %v387_v1, 0.0  ;;  %v379_v2 = vld [vmem:[%s365_s24] sm:$0xff]  ;;  %s357_s18 = scalar_lea.vmem %s1290_s0, %s1143_s21  ;;  %s1036_s20 = smov 112  }
  0x1b   : > { %v386_v3 = vld [vmem:[%s361_s10] sm:$0xff]  ;;  %v412_v4 = vsel %vm411_vm0, 1, %v1033_v0  ;;  %382 = vperm.xlu0 %951, %v379_v2   ;;  %s1183_s24 = sshll.u32 %s351_s23, 3  ;;  %s1039_s10 = smov 72  }
  0x1c   : > { %v1153_v5 = vpack.c.bf16 %v386_v3, %v386_v3  ;;  %v378_v7 = vld [vmem:[%s357_s18] sm:$0xff]  ;;  %v413_v18 = vperm.slane %v412_v4, 0  ;;  %s353_s25 = scalar_lea.vmem [#allocation2], %s1183_s24  ;;  %s1042_s17 = smov 16  }
  0x1d   : > { %s1043_s18 = smov 24   ;;  %s989_s1 = scalar_lea.hbm %s1284_s8, 16 }
  0x1e   : > { %454 = vrot.lane.b32.xlu1 %v1153_v5, %s1034_s12  ;;  %v395_v6 = vsel %vm390_vm1, %v1153_v5, 0  ;;  %vm1169_vm2 = vcmp.eq.s32.totalorder %v413_v18, 1 }
  0x1f   : > { %404 = vmatpush.bf16.xpose.msra.mxu0 %v395_v6 }
  0x8d   : > { %v383_v8 = vpop.permute.xlu0 %382 }
  0x8e   : > { %v385_v9 = vmul.f32 %v383_v8, %v378_v7 }
  0x90   : > { %v388_v10 = vpack.c.bf16 %v385_v9, %v385_v9  ;;  %v455_v11 = vpop.permute.xlu1 %454 }
  0x91   : > { %v460_v12 = vsel %vm390_vm1, %v455_v11, 0 }
  0x92   : > { %452 = vrot.lane.b32.xlu2 %v388_v10, %s1034_s12  ;;  %867 = vmatmul.msk.bf16.vlgmr.msra.gmra.mxu0 %vm390_vm1, %v388_v10  ;;  %s1040_s12 = smov 80  }
  0x93   : > { %469 = vmatpush.bf16.xpose.msra.mxu2 %v460_v12 }
  0x9a   : > { %429 = vrot.lane.b32.xlu2 %v1153_v5, %s1035_s19  ;;  %s711_s19 = scalar_lea.sflag [#allocation3], %s351_s23 }
  0xa2   : > { %512 = vrot.lane.b32.xlu2 %v1153_v5, %s1036_s20 }
  0xaa   : > { %570 = vrot.lane.b32.xlu2 %v1153_v5, %s1037_s22 }
  0xb2   : > { %510 = vrot.lane.b32.xlu2 %v388_v10, %s1036_s20 }
  0xba   : > { %568 = vrot.lane.b32.xlu2 %v388_v10, %s1037_s22  ;;  %s372_s22 = scalar_lea.vmem %s1280_s4, %s1143_s21 }
  0xec   : > { %v453_v13 = vpop.permute.xlu2 %452 }
  0xed   : > { %869 = vmatmul.msk.bf16.vlgmr.msra.gmra.mxu2 %vm390_vm1, %v453_v13 }
  0xf4   : > { %v430_v14 = vpop.permute.xlu2 %429 }
  0xf5   : > { %v436_v43 = vsel %vm434_vm3, %v430_v14, 0 }
  0xf6   : > { %445 = vmatpush.bf16.msra.mxu1 %v436_v43 }
  0xfc   : > { %v513_v15 = vpop.permute.xlu2 %512 }
  0xfd   : > { %v518_v42 = vsel %vm390_vm1, %v513_v15, 0 }
  0xfe   : > { %527 = vmatpush.bf16.xpose.msrb.mxu1 %v518_v42 }
 0x104   : > { %v571_v16 = vpop.permute.xlu2 %570 }
 0x105   : > { %v576_v17 = vsel %vm390_vm1, %v571_v16, 0 }
 0x106   : > { %585 = vmatpush.bf16.xpose.msrb.mxu0 %v576_v17 }
 0x10c   : > { %v511_v19 = vpop.permute.xlu2 %510 }
 0x10f   : > { %v406_v21 = vpop.f32.mrf.mxu0 }
 0x110   : > { %v410_v22 = vmul.f32 0.35355338, %v406_v21 }
 0x112   : > { %v415_v23 = vsel %vm1169_vm2, %v410_v22, -1e+30 }
 0x113   : > { %v416_v24 = vsel %vm390_vm1, %v415_v23, -inf }
 0x114   : > { %v569_v25 = vpop.permute.xlu2 %568  ;;  %417 = vmax.xlane.f32.xlu0 %v416_v24 }
 0x115   : > { %873 = vmatmul.msk.bf16.vlgmr.msrb.gmra.mxu0 %vm390_vm1, %v569_v25 }
 0x117   : > { %v408_v26 = vpop.f32.mrf.mxu0 }
 0x170   : > { %v471_v27 = vpop.f32.mrf.mxu2 }
 0x171   : > { %v475_v28 = vmul.f32 0.35355338, %v471_v27 }
 0x173   : > { %v476_v29 = vsel %vm1169_vm2, %v475_v28, -1e+30 }
 0x174   : > { %v477_v30 = vsel %vm390_vm1, %v476_v29, -inf }
 0x175   : > { %478 = vmax.xlane.f32.xlu2 %v477_v30  ;;  %v899_v30 = vld [vmem:[%s1281_s5 + $0x18] sm:$0xff] }
 0x178   : > { %v473_v31 = vpop.f32.mrf.mxu2 }
 0x179   : > { %v898_v31 = vld [vmem:[%s1281_s5 + $0x10] sm:$0xff] }
 0x187   : > { %v418_v32 = vpop.xlane.xlu0 %417 }
 0x188   : > { %v419_v33 = vsub.f32 %v415_v23, %v418_v32  ;;  %v897_v32 = vld [vmem:[%s1281_s5 + $0x8] sm:$0xff] }
 0x18a   : > { %v420_v34 = vmul.f32 1.442695, %v419_v33 }
 0x18c   : > { %953 = vpow2.f32 %v420_v34 }
 0x192   : > { %v954_v35 = vpop.eup %953  ;;  %v587_v36 = vpop.f32.mrf.mxu0 }
 0x193   : > { %v591_v37 = vmul.f32 0.35355338, %v587_v36  ;;  %v422_v38 = vsel %vm390_vm1, %v954_v35, 0.0 }
 0x194   : > { %423 = vadd.xlane.f32.xlu1 %v422_v38 }
 0x195   : > { %v592_v39 = vsel %vm1169_vm2, %v591_v37, -1e+30 }
 0x196   : > { %643 = vst.msk [vmem:[%s353_s25] sm:$0xff] %vm390_vm1, %v592_v39  ;;  %v593_v41 = vsel %vm390_vm1, %v592_v39, -inf }
 0x19a   : > { %v589_v40 = vpop.f32.mrf.mxu0 }
 0x19b   : > { %v644_v40 = vld [vmem:[%s372_s22] sm:$0xff] }
 0x19c   : > { %594 = vmax.xlane.f32.xlu1 %v593_v41 }
 0x1b5   : > { %489 = vrot.lane.b32.xlu1 %v1153_v5, %s1038_s26  ;;  %s893_s26 = sshll.u32 %s1111_s9, 3 }
 0x1bd   : > { %605 = vrot.lane.b32.xlu1 %v1153_v5, %s1039_s10 }
 0x1e8   : > { %v479_v49 = vpop.xlane.xlu2 %478 }
 0x1e9   : > { %v480_v51 = vsub.f32 %v476_v29, %v479_v49 }
 0x1eb   : > { %v481_v52 = vmul.f32 1.442695, %v480_v51 }
 0x207   : > { %v424_v44 = vpop.xlane.xlu1 %423 }
 0x208   : > { %955 = vrcp.f32 %v424_v44 }
 0x209   : > { %957 = vpow2.f32 %v481_v52 }
 0x20e   : > { %v956_v45 = vpop.eup %955 }
 0x20f   : > { %v426_v46 = vmul.f32 %v956_v45, %v954_v35  ;;  %v595_v53 = vpop.xlane.xlu1 %594  ;;  %v958_v61 = vpop.eup %957 }
 0x210   : > { %v596_v56 = vsub.f32 %v592_v39, %v595_v53  ;;  %v483_v62 = vsel %vm390_vm1, %v958_v61, 0.0  ;;  %v896_v39 = vld [vmem:[%s1281_s5] sm:$0xff] }
 0x211   : > { %v427_v47 = vpack.c.bf16 %v426_v46, %v426_v46 }
 0x212   : > { %v597_v59 = vmul.f32 1.442695, %v596_v56 }
 0x213   : > { %868 = vmatmul.msk.bf16.vlgmr.msra.gmra.mxu1 %vm390_vm1, %v427_v47 }
 0x214   : > { %959 = vpow2.f32 %v597_v59  ;;  %696 = vmatpush.bf16.msra.mxu1 %v899_v30 }
 0x218   : > { %697 = vmatpush.bf16.msra.mxu1 %v898_v31 }
 0x21a   : > { %v960_v63 = vpop.eup %959 }
 0x21b   : > { %v599_v0 = vsel %vm390_vm1, %v960_v63, 0.0 }
 0x21c   : > { %698 = vmatpush.bf16.msra.mxu1 %v897_v32 }
 0x220   : > { %699 = vmatpush.bf16.msra.mxu1 %v896_v39 }
 0x223   : > { %871 = vmatmul.msk.bf16.vlgmr.msrb.gmra.mxu1 %vm390_vm1, %v511_v19 }
 0x227   : > { %v490_v1 = vpop.permute.xlu1 %489 }
 0x228   : > { %v495_v2 = vsel %vm434_vm3, %v490_v1, 0 }
 0x229   : > { %504 = vmatpush.bf16.msra.mxu3 %v495_v2 }
 0x22f   : > { %v606_v3 = vpop.permute.xlu1 %605 }
 0x230   : > { %v611_v4 = vsel %vm434_vm3, %v606_v3, 0 }
 0x231   : > { %620 = vmatpush.bf16.msrb.mxu2 %v611_v4 }
 0x290   : > { %v1199_v48 = vpop.f32.mrf.mxu1 }
 0x298   : > { %v449_v50 = vpop.f32.mrf.mxu1 }
 0x2a0   : > { %v529_v54 = vpop.f32.mrf.mxu1 }
 0x2a1   : > { %v533_v55 = vmul.f32 0.35355338, %v529_v54 }
 0x2a3   : > { %v534_v57 = vsel %vm1169_vm2, %v533_v55, -1e+30 }
 0x2a4   : > { %v535_v58 = vsel %vm390_vm1, %v534_v57, -inf }
 0x2a5   : > { %536 = vmax.xlane.f32.xlu0 %v535_v58 }
 0x2a8   : > { %v531_v60 = vpop.f32.mrf.mxu1 }
 0x2ad   : > { %484 = vadd.xlane.f32.xlu0 %v483_v62 }
 0x2b5   : > { %600 = vadd.xlane.f32.xlu0 %v599_v0 }
 0x318   : > { %v537_v6 = vpop.xlane.xlu0 %536 }
 0x319   : > { %v538_v7 = vsub.f32 %v534_v57, %v537_v6 }
 0x31b   : > { %v539_v8 = vmul.f32 1.442695, %v538_v7 }
 0x31d   : > { %961 = vpow2.f32 %v539_v8 }
 0x320   : > { %v485_v9 = vpop.xlane.xlu0 %484 }
 0x321   : > { %963 = vrcp.f32 %v485_v9 }
 0x323   : > { %v962_v10 = vpop.eup %961 }
 0x324   : > { %v541_v11 = vsel %vm390_vm1, %v962_v10, 0.0 }
 0x325   : > { %542 = vadd.xlane.f32.xlu0 %v541_v11 }
 0x327   : > { %v964_v12 = vpop.eup %963 }
 0x328   : > { %v601_v13 = vpop.xlane.xlu0 %600  ;;  %v487_v14 = vmul.f32 %v964_v12, %v958_v61 }
 0x329   : > { %965 = vrcp.f32 %v601_v13 }
 0x32a   : > { %v488_v15 = vpack.c.bf16 %v487_v14, %v487_v14 }
 0x32c   : > { %870 = vmatmul.msk.bf16.vlgmr.msra.gmra.mxu3 %vm390_vm1, %v488_v15 }
 0x32f   : > { %v966_v16 = vpop.eup %965 }
 0x330   : > { %v603_v17 = vmul.f32 %v966_v16, %v960_v63 }
 0x332   : > { %v604_v18 = vpack.c.bf16 %v603_v17, %v603_v17 }
 0x334   : > { %874 = vmatmul.msk.bf16.vlgmr.msrb.gmra.mxu2 %vm390_vm1, %v604_v18 }
 0x339   : > { %547 = vrot.lane.b32.xlu0 %v1153_v5, %s1040_s12 }
 0x398   : > { %v543_v19 = vpop.xlane.xlu0 %542 }
 0x399   : > { %967 = vrcp.f32 %v543_v19 }
 0x39f   : > { %v968_v20 = vpop.eup %967 }
 0x3a0   : > { %v545_v21 = vmul.f32 %v968_v20, %v962_v10 }
 0x3a2   : > { %v546_v24 = vpack.c.bf16 %v545_v21, %v545_v21 }
 0x3ab   : > { %v548_v22 = vpop.permute.xlu0 %547 }
 0x3ac   : > { %v553_v23 = vsel %vm434_vm3, %v548_v22, 0 }
 0x3ad   : > { %562 = vmatpush.bf16.msrb.mxu3 %v553_v23 }
 0x3af   : > { %v506_v25 = vpop.f32.mrf.mxu3 }
 0x3b0   : > { %872 = vmatmul.msk.bf16.vlgmr.msrb.gmra.mxu3 %vm390_vm1, %v546_v24  ;;  %627 = vrot.lane.b32.xlu2 %v506_v25, %s1041_s13  ;;  %s1044_s13 = smov 32  }
 0x3b7   : > { %v508_v26 = vpop.f32.mrf.mxu3  ;;  %v622_v27 = vpop.f32.mrf.mxu2 }
 0x3bf   : > { %v624_v28 = vpop.f32.mrf.mxu2 }
 0x40a   : > { %v628_v34 = vpop.permute.xlu2 %627 }
 0x40b   : > { %v638_v35 = vsel %vm390_vm1, %v1199_v48, %v628_v34 }
 0x433   : > { %v564_v29 = vpop.f32.mrf.mxu3 }
 0x434   : > { %631 = vrot.lane.b32.xlu1 %v564_v29, %s1042_s17  ;;  %s726_s17 = sshll.u32 %s353_s25, 4  ;;  %s727_s17 = int_to_ptr.vmem [resolvable:$true] %s726_s17 }
 0x43b   : > { %v566_v5 = vpop.f32.mrf.mxu3 }
 0x43c   : > { %635 = vrot.lane.b32.xlu1 %v622_v27, %s1043_s18 }
 0x4a6   : > { %v632_v33 = vpop.permute.xlu1 %631 }
 0x4a7   : > { %v640_v36 = vsel %vm639_vm4, %v638_v35, %v632_v33 }
 0x4ae   : > { %v636_v37 = vpop.permute.xlu1 %635 }
 0x4af   : > { %v642_v38 = vsel %vm641_vm5, %v640_v36, %v636_v37 }
 0x4b0   : > { %646 = vrot.lane.b32.xlu0 %v642_v38, %s1044_s13  ;;  %s724_s13 = scalar_lea.hbm %s1284_s8, %s893_s26 }
 0x4b1   : > { %s728_s18 = sshll.u32 %s724_s13, 4  ;;  %s729_s18 = int_to_ptr.hbm [resolvable:$true] %s728_s18 }
 0x4b2   : > { %s983_s20 = sshra.s32 %s729_s18, 4  ;;  %s984_s20 = int_to_ptr.hbm [resolvable:$true] %s983_s20 }
 0x4b3   : > { %s985_s22 = scalar_lea.hbm %s984_s20, 8  ;;  %p990_p0 = scmp.lt.s32.totalorder %s984_s20, %s1284_s8 }
 0x4b4   : > { %p986_p11 = scmp.ne.s32.totalorder %s984_s20, %s985_s22  ;;  %p991_p1 = scmp.lt.s32.totalorder %s989_s1, %s985_s22 }
 0x4b6   : > { %p987_p12 = pnand %p986_p11, %p1128_p5  ;;  %p992_p2 = por %p991_p1, %p990_p0 }
 0x4b8   : > { %p988_p13 = pneg %p987_p12 }
 0x4ba   : > { %p993_p3 = pnand %p992_p2, %p988_p13 }
 0x522   : > { %v647_v41 = vpop.permute.xlu0 %646 }
 0x523   : > { %v650_v42 = vsel %vm649_vm6, %v644_v40, %v647_v41 }
 0x524   : > { %v651_v43 = vpack.c.bf16 %v650_v42, %v650_v42 }
 0x526   : > { %891 = vmatmul.msk.bf16.vlgmr.msra.gmra.mxu1 %vm688_vm7, %v651_v43 }
 0x527   : > { %996 = shalt.err (!%p993_p3)
}
 0x528   : > { %900 = dma.vmem_to_hbm [thread:$0]  (%p1128_p5), %s727_s17, 128, %s729_s18, %s711_s19   ;;  %v952_v44 = vld [vmem:[%s1282_s6] ss:$0 sm:$0xff] }
 0x529   : > { %s376_s0 = scalar_lea.vmem %s1283_s7, %s1143_s21 }
 0x5a3   : > { %v701_v45 = vpop.f32.mrf.mxu1 }
 0x5a4   : > { %v702_v46 = vadd.f32 %v952_v44, %v701_v45 }
 0x5a6   : > { %705 = vst.msk [vmem:[%s376_s0] sm:$0xff] %vm649_vm6, %v702_v46 }
 0x5ab   : > { %v703_v47 = vpop.f32.mrf.mxu1 }
 0x5ac PF: > { %p906_p4 = scmp.ge.s32.totalorder %s1031_s30, 2  ;;  %s747_s1 = sand.u32 1, %s1019_s27  }
 0x5ad   : > { %s748_s15 = scalar_lea.sflag [#allocation3], %s747_s1 }
 0x5ae   : > { %p903_p5 = pnand %p906_p4, %p1132_p6 }
 0x5b0   : > { %p904_p7 = pneg %p903_p5 }
 0x5b2   : > { %1014 = dma.done.wait (%p904_p7), %s748_s15, 128  }
 0x5b3   : > { %1016 = vsyncadd (%p904_p7), %s748_s15, 4294967168  ;;  %p19_p8 = scmp.ge.s32.totalorder %s1115_s11, 4   ;;  %s1293_s27 = smov %s1023_s28 }
 0x5b4   : > { %s1294_s28 = smov %s1027_s29  ;;  %s1295_s29 = smov %s1126_s14 }
 0x5b5   : > { %s1296_s30 = smov %s1115_s11  ;;  %21 = sbr.rel (!%p19_p8) target bundleno = 6 (0x6), region = 107 }
 0x5ba   :  { %754 = vsyncpa [#allocation3], 1 }
 0x5bb   :  { %756 = vsyncpa [#allocation3 + $0x1], 1 }

// kernel: _lambda_.37
= control target key start
LH: loop header
LB: loop body
LE: loop exit
PB: predicated region body
PF: predicated region fallthrough
CT: control target
= control target key end

     0   :  { %vm19_vm0 = vcmask 254976   ;;  %v87_v1 = vmov 0.0   ;;  %vm40_vm1 = vcmask 261120   ;;  %s126_s1 = inlined_call_operand.vmem [shape: bf16[32,32], index: 1, kind: input, shape index: {}]   ;;  %s127_s0 = inlined_call_operand.vmem [shape: f32[2,32], index: 0, kind: input, shape index: {}]   ;;  %s128_s2 = inlined_call_operand.vmem [shape: f32[1,32], index: 2, kind: input, shape index: {}]   ;;  %s129_s3 = inlined_call_operand.vmem [shape: f32[2,32], index: 3, kind: output, shape index: {}]  }
   0x1   :  { %v84_v0 = vld [vmem:[%s126_s1 + $0x8] sm:$0xff]  ;;  %20 = vst.msk [vmem:[#allocation2] sm:$0x3] %vm19_vm0, %v87_v1  ;;  %v83_v2 = vld [vmem:[%s126_s1] sm:$0xff] }
   0x2   :  { %50 = vmatpush.bf16.msra.mxu0 %v84_v0  ;;  %v22_v3 = vld [vmem:[%s127_s0] sm:$0x3] }
   0x3   :  { %v23_v4 = vpack.c.bf16 %v22_v3, %v22_v3  ;;  %v86_v8 = vld [vmem:[%s128_s2] ss:$0 sm:$0xff] }
   0x6   :  { %51 = vmatpush.bf16.msra.mxu0 %v83_v2 }
   0x8   :  { %v21_v5 = vld [vmem:[#allocation2] sm:$0x3] }
   0x9   :  { %82 = vmatmul.msk.bf16.vlgmr.msra.gmra.mxu0 %vm40_vm1, %v23_v4 }
  0x86   :  { %v53_v6 = vpop.f32.mrf.mxu0 }
  0x87   :  { %v57_v7 = vadd.f32 %v53_v6, %v21_v5 }
  0x89   :  { %59 = vst.msk [vmem:[#allocation2] sm:$0x3] %vm19_vm0, %v57_v7 }
  0x8e   :  { %v55_v9 = vpop.f32.mrf.mxu0 }
  0x90   :  { %v63_v10 = vld [vmem:[#allocation2] sm:$0x3] }
  0x91   :  { %v68_v11 = vadd.f32 %v86_v8, %v63_v10 }
  0x93   :  { %69 = vst.msk [vmem:[%s129_s3] sm:$0x3] %vm19_vm0, %v68_v11 }

// kernel: _lambda_.40
= control target key start
LH: loop header
LB: loop body
LE: loop exit
PB: predicated region body
PF: predicated region fallthrough
CT: control target
= control target key end

     0   :  { %s967_s27 = smov 0   ;;  %s1062_s0 = inlined_call_operand.vmem [shape: f32[2,8,96], index: 0, kind: input, shape index: {}]   ;;  %s1063_s1 = inlined_call_operand.vmem [shape: f32[2,1,32], index: 1, kind: input, shape index: {}]   ;;  %s1064_s2 = inlined_call_operand.vmem [shape: f32[2,8,1], index: 2, kind: input, shape index: {}]   ;;  %s1065_s3 = inlined_call_operand.vmem [shape: f32[2,1,8], index: 3, kind: input, shape index: {}]   ;;  %s1066_s4 = inlined_call_operand.vmem [shape: f32[2,8,32], index: 4, kind: input, shape index: {}]   ;;  %s1067_s5 = inlined_call_operand.vmem [shape: bf16[32,32], index: 5, kind: input, shape index: {}]   ;;  %s1068_s6 = inlined_call_operand.vmem [shape: f32[1,32], index: 6, kind: input, shape index: {}]   ;;  %s1069_s7 = inlined_call_operand.vmem [shape: f32[2,8,32], index: 7, kind: output, shape index: {0}]   ;;  %s1070_s8 = inlined_call_operand.vmem [shape: f32[2,8,8], index: 8, kind: output, shape index: {1}]  }
   0x1 LB: > { %s825_s28 = sadd.s32 4294967295, %s904_s27   ;;  %p829_p0 = scmp.ge.s32.totalorder %s904_s27, 1  ;;  %s904_s27 = sphi %s967_s27, %s19_s27  }
   0x2   : > { %p298_p1 = scmp.lt.s32.totalorder %s904_s27, 3 }
   0x4   : > { %p299_p2 = pnand %p829_p0, %p298_p1 }
   0x5   : > { %p348_p3 = scmp.lt.s32.totalorder (!%p299_p2), %s825_s28, 1  ;;  %s907_s14 = smov (!%p299_p2), 32  }
   0x6   : > { %302 = sbr.rel (%p299_p2) target bundleno = 1410 (0x582), region = 48  ;;  %s908_s15 = smov (!%p299_p2), 64  }
   0x7   : > { %s909_s22 = smov (!%p299_p2), 120   ;;  %s910_s23 = smov (!%p299_p2), 88  }
   0x8   : > { %s911_s24 = smov (!%p299_p2), 96   ;;  %s912_s25 = smov (!%p299_p2), 112  }
   0x9   : > { %s913_s26 = smov (!%p299_p2), 104   ;;  %s915_s29 = smov (!%p299_p2), 80  }
   0xa   : > { %s916_s30 = smov (!%p299_p2), 56   ;;  %s920_s16 = smov (!%p299_p2), 24  }
   0xb   : > { %v906_v0 = vmov 0   ;;  %s1074_s28 = smov (!%p348_p3, %s825_s28), 1  ;;  %vm404_vm1 = vcmask 64512   ;;  %vm448_vm3 = vcmask 1043456   ;;  %s921_s19 = smov 16   ;;  %vm653_vm4 = vcmask 130048  }
   0xc   : > { %880 = vset.pattern.permute.xlu0 %v906_v0  ;;  %s354_s9 = scalar_lea.vmem %s1063_s1, %s1074_s28  ;;  %s361_s12 = scalar_lea.vmem %s1065_s3, %s1074_s28  ;;  %vm655_vm5 = vcmask 195584   ;;  %vm681_vm6 = vcmask 261120  }
   0xd   : > { %v375_v1 = vld [vmem:[%s354_s9] sm:$0x1]  ;;  %s981_s13 = sshll.u32 %s1074_s28, 3  ;;  %s914_s28 = smov 72  }
   0xe   : > { %v397_v2 = vld [vmem:[%s361_s12] sm:$0x1]  ;;  %v376_v3 = vadd.f32 1.0, %v375_v1  ;;  %s358_s18 = scalar_lea.vmem %s1064_s2, %s981_s13  ;;  %s351_s21 = scalar_lea.vmem %s1062_s0, %s981_s13 }
   0xf   : > { %vm425_vm0 = vcmp.gt.f32.partialorder %v397_v2, 0.0  ;;  %v386_v6 = vld [vmem:[%s358_s18] sm:$0xff]  ;;  %s373_s11 = scalar_lea.vmem %s1070_s8, %s981_s13  ;;  %s917_s12 = smov 40  }
  0x10   : > { %v426_v4 = vsel %vm425_vm0, 1, %v906_v0  ;;  %v379_v5 = vperm.slane %v376_v3, 0  ;;  %v377_v7 = vld [vmem:[%s351_s21] sm:$0xff] }
  0x11   : > { %v427_v28 = vperm.slane %v426_v4, 0 }
  0x12   : > { %382 = vrot.lane.b32.xlu0 %v379_v5, %s907_s14  ;;  %393 = vrot.lane.b32.xlu2 %v379_v5, %s908_s15  ;;  %v381_v8 = vmul.f32 %v379_v5, %v377_v7  ;;  %s918_s14 = smov 48  }
  0x13   : > { %vm1000_vm2 = vcmp.eq.s32.totalorder %v427_v28, 1 }
  0x14   : > { %v399_v9 = vpack.c.bf16 %v381_v8, %v381_v8 }
  0x16   : > { %v409_v18 = vsel %vm404_vm1, %v399_v9, 0 }
  0x17   : > { %418 = vmatpush.bf16.xpose.msra.mxu0 %v409_v18 }
  0x1a   : > { %389 = vperm.xlu0 %880, %v386_v6   ;;  %468 = vrot.lane.b32.xlu2 %v399_v9, %s909_s22 }
  0x6c   : > { %v394_v14 = vpop.permute.xlu2 %393 }
  0x6d   : > { %v396_v16 = vmul.f32 %v394_v14, %v377_v7 }
  0x6f   : > { %v991_v17 = vpack.c.bf16 %v396_v16, %v396_v16 }
  0x74   : > { %v469_v19 = vpop.permute.xlu2 %468 }
  0x75   : > { %v474_v20 = vsel %vm404_vm1, %v469_v19, 0 }
  0x76   : > { %483 = vmatpush.bf16.xpose.msra.mxu2 %v474_v20 }
  0x84   : > { %v383_v10 = vpop.permute.xlu0 %382 }
  0x85   : > { %v385_v11 = vmul.f32 %v383_v10, %v377_v7 }
  0x8c   : > { %v390_v12 = vpop.permute.xlu0 %389 }
  0x8d   : > { %v392_v13 = vmul.f32 %v390_v12, %v385_v11 }
  0x8f   : > { %v398_v15 = vpack.c.bf16 %v392_v13, %v392_v13 }
  0x91   : > { %465 = vrot.lane.b32.xlu0 %v398_v15, %s910_s23  ;;  %402 = vrot.lane.b32.xlu1 %v398_v15, %s911_s24  ;;  %s365_s24 = scalar_lea.vmem %s1066_s4, %s981_s13 }
  0x99   : > { %443 = vrot.lane.b32.xlu0 %v991_v17, %s908_s15  ;;  %s919_s15 = smov 8  }
  0xa1   : > { %526 = vrot.lane.b32.xlu0 %v399_v9, %s912_s25 }
  0xa9   : > { %584 = vrot.lane.b32.xlu0 %v399_v9, %s913_s26 }
  0xb1   : > { %582 = vrot.lane.b32.xlu0 %v398_v15, %s914_s28 }
 0x103   : > { %v466_v21 = vpop.permute.xlu0 %465  ;;  %v403_v22 = vpop.permute.xlu1 %402 }
 0x104   : > { %835 = vmatmul.msk.bf16.vlgmr.msra.gmra.mxu0 %vm404_vm1, %v403_v22  ;;  %837 = vmatmul.msk.bf16.vlgmr.msra.gmra.mxu2 %vm404_vm1, %v466_v21 }
 0x10b   : > { %v444_v23 = vpop.permute.xlu0 %443 }
 0x10c   : > { %v450_v41 = vsel %vm448_vm3, %v444_v23, 0 }
 0x10d   : > { %459 = vmatpush.bf16.msra.mxu1 %v450_v41 }
 0x113   : > { %v527_v24 = vpop.permute.xlu0 %526 }
 0x114   : > { %v532_v42 = vsel %vm404_vm1, %v527_v24, 0 }
 0x115   : > { %541 = vmatpush.bf16.xpose.msrb.mxu1 %v532_v42 }
 0x11b   : > { %v585_v25 = vpop.permute.xlu0 %584 }
 0x11c   : > { %v590_v26 = vsel %vm404_vm1, %v585_v25, 0 }
 0x11d   : > { %599 = vmatpush.bf16.xpose.msrb.mxu0 %v590_v26 }
 0x123   : > { %v583_v27 = vpop.permute.xlu0 %582 }
 0x124   : > { %841 = vmatmul.msk.bf16.vlgmr.msrb.gmra.mxu0 %vm404_vm1, %v583_v27 }
 0x181   : > { %v420_v30 = vpop.f32.mrf.mxu0 }
 0x182   : > { %v424_v31 = vmul.f32 0.35355338, %v420_v30 }
 0x184   : > { %v429_v32 = vsel %vm1000_vm2, %v424_v31, -1e+30 }
 0x185   : > { %v430_v33 = vsel %vm404_vm1, %v429_v32, -inf }
 0x186   : > { %431 = vmax.xlane.f32.xlu1 %v430_v33 }
 0x187   : > { %v485_v34 = vpop.f32.mrf.mxu2 }
 0x188   : > { %v489_v46 = vmul.f32 0.35355338, %v485_v34 }
 0x189   : > { %v422_v35 = vpop.f32.mrf.mxu0 }
 0x18a   : > { %v490_v47 = vsel %vm1000_vm2, %v489_v46, -1e+30 }
 0x18b   : > { %v491_v48 = vsel %vm404_vm1, %v490_v47, -inf }
 0x18f   : > { %v487_v36 = vpop.f32.mrf.mxu2 }
 0x19f   : > { %524 = vrot.lane.b32.xlu1 %v398_v15, %s915_s29 }
 0x1a1   : > { %v601_v37 = vpop.f32.mrf.mxu0 }
 0x1a2   : > { %v605_v49 = vmul.f32 0.35355338, %v601_v37 }
 0x1a4   : > { %v606_v51 = vsel %vm1000_vm2, %v605_v49, -1e+30 }
 0x1a5   : > { %v607_v52 = vsel %vm404_vm1, %v606_v51, -inf }
 0x1a7   : > { %503 = vrot.lane.b32.xlu1 %v991_v17, %s916_s30  ;;  %s369_s30 = scalar_lea.vmem %s1069_s7, %s981_s13 }
 0x1a9   : > { %v603_v38 = vpop.f32.mrf.mxu0 }
 0x1f9   : > { %v432_v39 = vpop.xlane.xlu1 %431 }
 0x1fa   : > { %v433_v40 = vsub.f32 %v429_v32, %v432_v39 }
 0x1fc   : > { %v434_v43 = vmul.f32 1.442695, %v433_v40  ;;  %v854_v40 = vld [vmem:[%s1067_s5] sm:$0xff] }
 0x1fe   : > { %882 = vpow2.f32 %v434_v43  ;;  %v658_v43 = vld [vmem:[%s365_s24] sm:$0xff] }
 0x204   : > { %v883_v44 = vpop.eup %882 }
 0x205   : > { %v436_v45 = vsel %vm404_vm1, %v883_v44, 0.0 }
 0x206   : > { %437 = vadd.xlane.f32.xlu2 %v436_v45 }
 0x20e   : > { %492 = vmax.xlane.f32.xlu2 %v491_v48 }
 0x211   : > { %v525_v50 = vpop.permute.xlu1 %524 }
 0x216   : > { %608 = vmax.xlane.f32.xlu2 %v607_v52 }
 0x219   : > { %v504_v53 = vpop.permute.xlu1 %503 }
 0x21a   : > { %v509_v54 = vsel %vm448_vm3, %v504_v53, 0 }
 0x21b   : > { %518 = vmatpush.bf16.msra.mxu3 %v509_v54 }
 0x279   : > { %v438_v55 = vpop.xlane.xlu2 %437 }
 0x27a   : > { %884 = vrcp.f32 %v438_v55 }
 0x280   : > { %v885_v56 = vpop.eup %884 }
 0x281   : > { %v493_v57 = vpop.xlane.xlu2 %492  ;;  %v440_v58 = vmul.f32 %v885_v56, %v883_v44 }
 0x282   : > { %v494_v59 = vsub.f32 %v490_v47, %v493_v57 }
 0x283   : > { %v441_v60 = vpack.c.bf16 %v440_v58, %v440_v58 }
 0x284   : > { %v495_v61 = vmul.f32 1.442695, %v494_v59 }
 0x285   : > { %836 = vmatmul.msk.bf16.vlgmr.msra.gmra.mxu1 %vm404_vm1, %v441_v60 }
 0x286   : > { %886 = vpow2.f32 %v495_v61 }
 0x289   : > { %v609_v62 = vpop.xlane.xlu2 %608 }
 0x28a   : > { %v610_v63 = vsub.f32 %v606_v51, %v609_v62 }
 0x28c   : > { %v887_v0 = vpop.eup %886  ;;  %v611_v1 = vmul.f32 1.442695, %v610_v63 }
 0x28d   : > { %v497_v2 = vsel %vm404_vm1, %v887_v0, 0.0 }
 0x28e   : > { %888 = vpow2.f32 %v611_v1  ;;  %498 = vadd.xlane.f32.xlu2 %v497_v2 }
 0x294   : > { %v889_v3 = vpop.eup %888 }
 0x295   : > { %839 = vmatmul.msk.bf16.vlgmr.msrb.gmra.mxu1 %vm404_vm1, %v525_v50  ;;  %v613_v4 = vsel %vm404_vm1, %v889_v3, 0.0  ;;  %v881_v50 = vld [vmem:[%s1068_s6] ss:$0 sm:$0xff] }
 0x296   : > { %614 = vadd.xlane.f32.xlu1 %v613_v4 }
 0x301   : > { %v499_v5 = vpop.xlane.xlu2 %498 }
 0x302   : > { %890 = vrcp.f32 %v499_v5  ;;  %v1022_v6 = vpop.f32.mrf.mxu1 }
 0x308   : > { %v891_v7 = vpop.eup %890 }
 0x309   : > { %v615_v8 = vpop.xlane.xlu1 %614  ;;  %v501_v9 = vmul.f32 %v891_v7, %v887_v0 }
 0x30a   : > { %892 = vrcp.f32 %v615_v8  ;;  %v463_v10 = vpop.f32.mrf.mxu1 }
 0x30b   : > { %v502_v11 = vpack.c.bf16 %v501_v9, %v501_v9 }
 0x30d   : > { %838 = vmatmul.msk.bf16.vlgmr.msra.gmra.mxu3 %vm404_vm1, %v502_v11 }
 0x310   : > { %v893_v12 = vpop.eup %892 }
 0x311   : > { %v617_v13 = vmul.f32 %v893_v12, %v889_v3 }
 0x312   : > { %v543_v14 = vpop.f32.mrf.mxu1 }
 0x313   : > { %657 = vst.msk [vmem:[%s373_s11] sm:$0xff] %vm404_vm1, %v617_v13  ;;  %v547_v15 = vmul.f32 0.35355338, %v543_v14  ;;  %v618_v29 = vpack.c.bf16 %v617_v13, %v617_v13 }
 0x315   : > { %v548_v16 = vsel %vm1000_vm2, %v547_v15, -1e+30 }
 0x316   : > { %v549_v18 = vsel %vm404_vm1, %v548_v16, -inf }
 0x317   : > { %550 = vmax.xlane.f32.xlu0 %v549_v18 }
 0x31a   : > { %v545_v19 = vpop.f32.mrf.mxu1 }
 0x32b   : > { %619 = vrot.lane.b32.xlu0 %v991_v17, %s917_s12 }
 0x38a   : > { %v551_v20 = vpop.xlane.xlu0 %550 }
 0x38b   : > { %v552_v21 = vsub.f32 %v548_v16, %v551_v20 }
 0x38d   : > { %v553_v22 = vmul.f32 1.442695, %v552_v21 }
 0x38f   : > { %894 = vpow2.f32 %v553_v22 }
 0x390   : > { %v520_v23 = vpop.f32.mrf.mxu3 }
 0x395   : > { %v895_v24 = vpop.eup %894 }
 0x396   : > { %v555_v25 = vsel %vm404_vm1, %v895_v24, 0.0 }
 0x397   : > { %556 = vadd.xlane.f32.xlu2 %v555_v25 }
 0x398   : > { %v522_v26 = vpop.f32.mrf.mxu3 }
 0x39d   : > { %v620_v27 = vpop.permute.xlu0 %619 }
 0x39e   : > { %v625_v28 = vsel %vm448_vm3, %v620_v27, 0 }
 0x39f   : > { %634 = vmatpush.bf16.msrb.mxu2 %v625_v28 }
 0x3a2   : > { %842 = vmatmul.msk.bf16.vlgmr.msrb.gmra.mxu2 %vm404_vm1, %v618_v29 }
 0x3af   : > { %561 = vrot.lane.b32.xlu2 %v991_v17, %s918_s14  ;;  %v855_v17 = vld [vmem:[%s1067_s5 + $0x8] sm:$0xff] }
 0x3b0   : > { %691 = vmatpush.bf16.msra.mxu1 %v855_v17 }
 0x3b4   : > { %692 = vmatpush.bf16.msra.mxu1 %v854_v40 }
 0x3b7   : > { %641 = vrot.lane.b32.xlu2 %v520_v23, %s919_s15 }
 0x40a   : > { %v557_v30 = vpop.xlane.xlu2 %556 }
 0x40b   : > { %896 = vrcp.f32 %v557_v30 }
 0x411   : > { %v897_v31 = vpop.eup %896 }
 0x412   : > { %v559_v32 = vmul.f32 %v897_v31, %v895_v24  ;;  %v562_v33 = vpop.permute.xlu2 %561 }
 0x413   : > { %v567_v34 = vsel %vm448_vm3, %v562_v33, 0 }
 0x414   : > { %576 = vmatpush.bf16.msrb.mxu3 %v567_v34  ;;  %v560_v35 = vpack.c.bf16 %v559_v32, %v559_v32 }
 0x417   : > { %840 = vmatmul.msk.bf16.vlgmr.msrb.gmra.mxu3 %vm404_vm1, %v560_v35 }
 0x41a   : > { %v642_v41 = vpop.permute.xlu2 %641 }
 0x41b   : > { %v652_v42 = vsel %vm404_vm1, %v1022_v6, %v642_v41 }
 0x425   : > { %v636_v36 = vpop.f32.mrf.mxu2 }
 0x426   : > { %649 = vrot.lane.b32.xlu1 %v636_v36, %s920_s16 }
 0x42d   : > { %v638_v37 = vpop.f32.mrf.mxu2 }
 0x498   : > { %v650_v45 = vpop.permute.xlu1 %649 }
 0x49a   : > { %v578_v38 = vpop.f32.mrf.mxu3 }
 0x49b   : > { %645 = vrot.lane.b32.xlu2 %v578_v38, %s921_s19 }
 0x4a2   : > { %v580_v39 = vpop.f32.mrf.mxu3 }
 0x4f5   : > { %v646_v44 = vpop.permute.xlu2 %645 }
 0x4f6   : > { %v654_v46 = vsel %vm653_vm4, %v652_v42, %v646_v44 }
 0x4f7   : > { %v656_v47 = vsel %vm655_vm5, %v654_v46, %v650_v45 }
 0x4f8   : > { %v659_v48 = vadd.f32 %v658_v43, %v656_v47 }
 0x4fa   : > { %v660_v49 = vpack.c.bf16 %v659_v48, %v659_v48 }
 0x4fc   : > { %851 = vmatmul.msk.bf16.vlgmr.msra.gmra.mxu1 %vm681_vm6, %v660_v49 }
 0x579   : > { %v694_v51 = vpop.f32.mrf.mxu1 }
 0x57a   : > { %v695_v52 = vadd.f32 %v881_v50, %v694_v51 }
 0x57c   : > { %698 = vst.msk [vmem:[%s369_s30] sm:$0xff] %vm681_vm6, %v695_v52 }
 0x581   : > { %v696_v53 = vpop.f32.mrf.mxu1 }
 0x582 PF: > { %s19_s27 = sadd.s32 1, %s904_s27  }
 0x583   : > { %p16_p4 = scmp.ge.s32.totalorder %s19_s27, 4  }
 0x585   :  { %18 = sbr.rel (!%p16_p4) target bundleno = 1 (0x1), region = 102 }

// kernel: _lambda_.41
= control target key start
LH: loop header
LB: loop body
LE: loop exit
PB: predicated region body
PF: predicated region fallthrough
CT: control target
= control target key end

     0   :  { %s1252_s0 = inlined_call_operand.vmem [shape: f32[2,8,96], index: 0, kind: input, shape index: {}]   ;;  %s1253_s1 = inlined_call_operand.vmem [shape: f32[2,1,32], index: 1, kind: input, shape index: {}]   ;;  %s1254_s2 = inlined_call_operand.vmem [shape: f32[2,8,1], index: 2, kind: input, shape index: {}]   ;;  %s1255_s3 = inlined_call_operand.vmem [shape: f32[2,1,8], index: 3, kind: input, shape index: {}]   ;;  %s1256_s4 = inlined_call_operand.vmem [shape: f32[2,8,32], index: 4, kind: input, shape index: {}]   ;;  %s1257_s5 = inlined_call_operand.vmem [shape: bf16[32,32], index: 5, kind: input, shape index: {}]   ;;  %s1258_s6 = inlined_call_operand.vmem [shape: f32[1,32], index: 6, kind: input, shape index: {}]   ;;  %s1259_s7 = inlined_call_operand.vmem [shape: f32[2,8,32], index: 7, kind: output, shape index: {0}]   ;;  %s1260_s8 = inlined_call_operand.hbm [shape: f32[2,8,8], index: 8, kind: output, shape index: {1}]  }
   0x1   :  { %1261 = sst [smem:[#allocation5_spill]] %s1252_s0 }
   0x2   :  { %1262 = sst [smem:[#allocation6_spill]] %s1253_s1 }
   0x3   :  { %14 = vsyncpa [#allocation3], 0 }
   0x4   :  { %16 = vsyncpa [#allocation3 + $0x1], 0  ;;  %s1077_s27 = smov 0   ;;  %s1079_s28 = smov 0  }
   0x5   :  { %s1081_s29 = smov 0   ;;  %s1083_s30 = smov 0  }
   0x6 LB: > { %s1098_s9 = sadd.s32 4294967295, %s1014_s30   ;;  %s847_s10 = sadd.s32 4294967294, %s1014_s30   ;;  %s1014_s30 = sphi %s1083_s30, %s1272_s30   ;;  %s1010_s29 = sphi %s1081_s29, %s1271_s29   ;;  %s1006_s28 = sphi %s1079_s28, %s1270_s28   ;;  %s1002_s27 = sphi %s1077_s27, %s1269_s27  }
   0x7   : > { %s1102_s11 = sadd.s32 1, %s1014_s30   ;;  %s227_s12 = sadd.s32 1, %s1010_s29 }
   0x8   : > { %s224_s13 = ssub.s32 %s1014_s30, %s1102_s11  ;;  %p237_p0 = scmp.ne.s32.totalorder %s1010_s29, %s1006_s28 }
   0x9   : > { %p225_p1 = scmp.eq.s32.totalorder %s224_s13, 0  ;;  %p238_p2 = scmp.eq.s32.totalorder %s1098_s9, 1 }
   0xa   : > { %p243_p3 = scmp.ne.s32.totalorder %s1006_s28, %s1002_s27  ;;  %p244_p4 = scmp.eq.s32.totalorder %s847_s10, 1 }
   0xb   : > { %s1113_s14 = scalar_select %p225_p1, %s1010_s29, %s227_s12  }
   0xc   : > { %p1115_p5 = por %p238_p2, %p237_p0  ;;  %p1119_p6 = por %p244_p4, %p243_p3 }
   0xd   : > { %p850_p7 = scmp.ge.s32.totalorder %s1014_s30, 1  ;;  %p301_p8 = scmp.lt.s32.totalorder %s1014_s30, 3 }
   0xf   : > { %p302_p9 = pnand %p850_p7, %p301_p8 }
  0x10   : > { %p352_p10 = scmp.lt.s32.totalorder (!%p302_p9), %s1098_s9, 1  ;;  %s1265_s1 = sld [smem:[#allocation6_spill]] (!%p302_p9) }
  0x11   : > { %305 = sbr.rel (%p302_p9) target bundleno = 1422 (0x58e), region = 48  ;;  %s1017_s25 = smov (!%p302_p9), 32  }
  0x12   : > { %s1018_s26 = smov (!%p302_p9), 64   ;;  %s1266_s0 = sld [smem:[#allocation5_spill]] (!%p302_p9) }
  0x13   : > { %s1020_s21 = smov (!%p302_p9), 88   ;;  %s1021_s22 = smov (!%p302_p9), 96  }
  0x14   : > { %s1024_s10 = smov (!%p302_p9), 72   ;;  %s1026_s12 = smov (!%p302_p9), 56  }
  0x16   : > { %v1016_v0 = vmov 0   ;;  %s353_s17 = scalar_select %p352_p10, %s1098_s9, 1  ;;  %vm404_vm1 = vcmask 64512   ;;  %vm448_vm3 = vcmask 1043456   ;;  %vm653_vm4 = vcmask 130048  }
  0x17   : > { %934 = vset.pattern.permute.xlu0 %v1016_v0  ;;  %vm655_vm5 = vcmask 195584   ;;  %vm681_vm6 = vcmask 261120  }
  0x18   : > { %s358_s20 = scalar_lea.vmem %s1265_s1, %s353_s17  ;;  %s365_s23 = scalar_lea.vmem %s1255_s3, %s353_s17 }
  0x19   : > { %v375_v1 = vld [vmem:[%s358_s20] sm:$0x1]  ;;  %s1133_s24 = sshll.u32 %s353_s17, 3  ;;  %s1019_s17 = smov 120  }
  0x1a   : > { %v397_v2 = vld [vmem:[%s365_s23] sm:$0x1]  ;;  %v376_v3 = vadd.f32 1.0, %v375_v1  ;;  %s362_s13 = scalar_lea.vmem %s1254_s2, %s1133_s24  ;;  %s355_s20 = scalar_lea.vmem %s1266_s0, %s1133_s24 }
  0x1b   : > { %vm425_vm0 = vcmp.gt.f32.partialorder %v397_v2, 0.0  ;;  %v386_v6 = vld [vmem:[%s362_s13] sm:$0xff]  ;;  %s1022_s23 = smov 112   ;;  %s349_s13 = sand.u32 1, %s1006_s28  }
  0x1c   : > { %v426_v4 = vsel %vm425_vm0, 1, %v1016_v0  ;;  %v379_v5 = vperm.slane %v376_v3, 0  ;;  %v377_v7 = vld [vmem:[%s355_s20] sm:$0xff]  ;;  %s1180_s18 = sshll.u32 %s349_s13, 3  ;;  %s1027_s20 = smov 40  }
  0x1d   : > { %v427_v28 = vperm.slane %v426_v4, 0  ;;  %s351_s19 = scalar_lea.vmem [#allocation2], %s1180_s18  ;;  %s972_s1 = scalar_lea.hbm %s1260_s8, 16 }
  0x1e   : > { %382 = vrot.lane.b32.xlu0 %v379_v5, %s1017_s25  ;;  %393 = vrot.lane.b32.xlu2 %v379_v5, %s1018_s26  ;;  %v381_v8 = vmul.f32 %v379_v5, %v377_v7  ;;  %s1023_s25 = smov 104  }
  0x1f   : > { %vm1152_vm2 = vcmp.eq.s32.totalorder %v427_v28, 1 }
  0x20   : > { %v399_v9 = vpack.c.bf16 %v381_v8, %v381_v8 }
  0x22   : > { %v409_v18 = vsel %vm404_vm1, %v399_v9, 0 }
  0x23   : > { %418 = vmatpush.bf16.xpose.msra.mxu0 %v409_v18 }
  0x26   : > { %389 = vperm.xlu0 %934, %v386_v6   ;;  %468 = vrot.lane.b32.xlu2 %v399_v9, %s1019_s17  ;;  %s1028_s17 = smov 48  }
  0x78   : > { %v394_v14 = vpop.permute.xlu2 %393 }
  0x79   : > { %v396_v16 = vmul.f32 %v394_v14, %v377_v7 }
  0x7b   : > { %v1143_v17 = vpack.c.bf16 %v396_v16, %v396_v16 }
  0x80   : > { %v469_v19 = vpop.permute.xlu2 %468 }
  0x81   : > { %v474_v20 = vsel %vm404_vm1, %v469_v19, 0 }
  0x82   : > { %483 = vmatpush.bf16.xpose.msra.mxu2 %v474_v20 }
  0x90   : > { %v383_v10 = vpop.permute.xlu0 %382 }
  0x91   : > { %v385_v11 = vmul.f32 %v383_v10, %v377_v7 }
  0x98   : > { %v390_v12 = vpop.permute.xlu0 %389 }
  0x99   : > { %v392_v13 = vmul.f32 %v390_v12, %v385_v11 }
  0x9b   : > { %v398_v15 = vpack.c.bf16 %v392_v13, %v392_v13 }
  0x9d   : > { %465 = vrot.lane.b32.xlu0 %v398_v15, %s1020_s21  ;;  %402 = vrot.lane.b32.xlu1 %v398_v15, %s1021_s22  ;;  %s1029_s21 = smov 8   ;;  %s1030_s22 = smov 24  }
  0xa5   : > { %443 = vrot.lane.b32.xlu0 %v1143_v17, %s1018_s26  ;;  %s1025_s26 = smov 80  }
  0xad   : > { %526 = vrot.lane.b32.xlu0 %v399_v9, %s1022_s23 }
  0xb5   : > { %584 = vrot.lane.b32.xlu0 %v399_v9, %s1023_s25 }
  0xbd   : > { %582 = vrot.lane.b32.xlu0 %v398_v15, %s1024_s10  ;;  %s1031_s10 = smov 16  }
 0x10f   : > { %v466_v21 = vpop.permute.xlu0 %465  ;;  %v403_v22 = vpop.permute.xlu1 %402 }
 0x110   : > { %856 = vmatmul.msk.bf16.vlgmr.msra.gmra.mxu0 %vm404_vm1, %v403_v22  ;;  %858 = vmatmul.msk.bf16.vlgmr.msra.gmra.mxu2 %vm404_vm1, %v466_v21 }
 0x117   : > { %v444_v23 = vpop.permute.xlu0 %443 }
 0x118   : > { %v450_v41 = vsel %vm448_vm3, %v444_v23, 0 }
 0x119   : > { %459 = vmatpush.bf16.msra.mxu1 %v450_v41 }
 0x11f   : > { %v527_v24 = vpop.permute.xlu0 %526 }
 0x120   : > { %v532_v42 = vsel %vm404_vm1, %v527_v24, 0 }
 0x121   : > { %541 = vmatpush.bf16.xpose.msrb.mxu1 %v532_v42 }
 0x127   : > { %v585_v25 = vpop.permute.xlu0 %584 }
 0x128   : > { %v590_v26 = vsel %vm404_vm1, %v585_v25, 0 }
 0x129   : > { %599 = vmatpush.bf16.xpose.msrb.mxu0 %v590_v26 }
 0x12f   : > { %v583_v27 = vpop.permute.xlu0 %582 }
 0x130   : > { %862 = vmatmul.msk.bf16.vlgmr.msrb.gmra.mxu0 %vm404_vm1, %v583_v27 }
 0x18d   : > { %v420_v30 = vpop.f32.mrf.mxu0 }
 0x18e   : > { %v424_v31 = vmul.f32 0.35355338, %v420_v30 }
 0x190   : > { %v429_v32 = vsel %vm1152_vm2, %v424_v31, -1e+30 }
 0x191   : > { %v430_v33 = vsel %vm404_vm1, %v429_v32, -inf }
 0x192   : > { %431 = vmax.xlane.f32.xlu1 %v430_v33 }
 0x193   : > { %v485_v34 = vpop.f32.mrf.mxu2 }
 0x194   : > { %v489_v46 = vmul.f32 0.35355338, %v485_v34 }
 0x195   : > { %v422_v35 = vpop.f32.mrf.mxu0 }
 0x196   : > { %v490_v47 = vsel %vm1152_vm2, %v489_v46, -1e+30 }
 0x197   : > { %v491_v48 = vsel %vm404_vm1, %v490_v47, -inf }
 0x19b   : > { %v487_v36 = vpop.f32.mrf.mxu2 }
 0x1ab   : > { %524 = vrot.lane.b32.xlu1 %v398_v15, %s1025_s26  ;;  %s719_s26 = sshll.u32 %s351_s19, 4  ;;  %s720_s26 = int_to_ptr.vmem [resolvable:$true] %s719_s26 }
 0x1ad   : > { %v601_v37 = vpop.f32.mrf.mxu0 }
 0x1ae   : > { %v605_v49 = vmul.f32 0.35355338, %v601_v37 }
 0x1b0   : > { %v606_v51 = vsel %vm1152_vm2, %v605_v49, -1e+30 }
 0x1b1   : > { %v607_v52 = vsel %vm404_vm1, %v606_v51, -inf }
 0x1b3   : > { %503 = vrot.lane.b32.xlu1 %v1143_v17, %s1026_s12 }
 0x1b5   : > { %v603_v38 = vpop.f32.mrf.mxu0 }
 0x205   : > { %v432_v39 = vpop.xlane.xlu1 %431 }
 0x206   : > { %v433_v40 = vsub.f32 %v429_v32, %v432_v39 }
 0x208   : > { %v434_v43 = vmul.f32 1.442695, %v433_v40  ;;  %v877_v40 = vld [vmem:[%s1257_s5] sm:$0xff] }
 0x20a   : > { %936 = vpow2.f32 %v434_v43 }
 0x210   : > { %v937_v44 = vpop.eup %936 }
 0x211   : > { %v436_v45 = vsel %vm404_vm1, %v937_v44, 0.0 }
 0x212   : > { %437 = vadd.xlane.f32.xlu2 %v436_v45 }
 0x21a   : > { %492 = vmax.xlane.f32.xlu2 %v491_v48 }
 0x21d   : > { %v525_v50 = vpop.permute.xlu1 %524 }
 0x222   : > { %608 = vmax.xlane.f32.xlu2 %v607_v52 }
 0x225   : > { %v504_v53 = vpop.permute.xlu1 %503 }
 0x226   : > { %v509_v54 = vsel %vm448_vm3, %v504_v53, 0 }
 0x227   : > { %518 = vmatpush.bf16.msra.mxu3 %v509_v54 }
 0x285   : > { %v438_v55 = vpop.xlane.xlu2 %437 }
 0x286   : > { %938 = vrcp.f32 %v438_v55 }
 0x28c   : > { %v939_v56 = vpop.eup %938 }
 0x28d   : > { %v493_v57 = vpop.xlane.xlu2 %492  ;;  %v440_v58 = vmul.f32 %v939_v56, %v937_v44 }
 0x28e   : > { %v494_v59 = vsub.f32 %v490_v47, %v493_v57 }
 0x28f   : > { %v441_v60 = vpack.c.bf16 %v440_v58, %v440_v58 }
 0x290   : > { %v495_v61 = vmul.f32 1.442695, %v494_v59 }
 0x291   : > { %857 = vmatmul.msk.bf16.vlgmr.msra.gmra.mxu1 %vm404_vm1, %v441_v60 }
 0x292   : > { %940 = vpow2.f32 %v495_v61 }
 0x295   : > { %v609_v62 = vpop.xlane.xlu2 %608 }
 0x296   : > { %v610_v63 = vsub.f32 %v606_v51, %v609_v62 }
 0x298   : > { %v941_v0 = vpop.eup %940  ;;  %v611_v1 = vmul.f32 1.442695, %v610_v63 }
 0x299   : > { %v497_v2 = vsel %vm404_vm1, %v941_v0, 0.0 }
 0x29a   : > { %942 = vpow2.f32 %v611_v1  ;;  %498 = vadd.xlane.f32.xlu2 %v497_v2 }
 0x2a0   : > { %v943_v3 = vpop.eup %942 }
 0x2a1   : > { %860 = vmatmul.msk.bf16.vlgmr.msrb.gmra.mxu1 %vm404_vm1, %v525_v50  ;;  %v613_v4 = vsel %vm404_vm1, %v943_v3, 0.0 }
 0x2a2   : > { %614 = vadd.xlane.f32.xlu1 %v613_v4 }
 0x30d   : > { %v499_v5 = vpop.xlane.xlu2 %498 }
 0x30e   : > { %944 = vrcp.f32 %v499_v5  ;;  %v1174_v6 = vpop.f32.mrf.mxu1 }
 0x314   : > { %v945_v7 = vpop.eup %944 }
 0x315   : > { %v615_v8 = vpop.xlane.xlu1 %614  ;;  %v501_v9 = vmul.f32 %v945_v7, %v941_v0 }
 0x316   : > { %946 = vrcp.f32 %v615_v8  ;;  %v463_v10 = vpop.f32.mrf.mxu1 }
 0x317   : > { %v502_v11 = vpack.c.bf16 %v501_v9, %v501_v9 }
 0x319   : > { %859 = vmatmul.msk.bf16.vlgmr.msra.gmra.mxu3 %vm404_vm1, %v502_v11 }
 0x31c   : > { %v947_v12 = vpop.eup %946 }
 0x31d   : > { %v617_v13 = vmul.f32 %v947_v12, %v943_v3 }
 0x31e   : > { %v543_v14 = vpop.f32.mrf.mxu1 }
 0x31f   : > { %v547_v15 = vmul.f32 0.35355338, %v543_v14  ;;  %657 = vst.msk [vmem:[%s351_s19] sm:$0xff] %vm404_vm1, %v617_v13  ;;  %v618_v29 = vpack.c.bf16 %v617_v13, %v617_v13 }
 0x321   : > { %v548_v16 = vsel %vm1152_vm2, %v547_v15, -1e+30 }
 0x322   : > { %v549_v18 = vsel %vm404_vm1, %v548_v16, -inf }
 0x323   : > { %550 = vmax.xlane.f32.xlu0 %v549_v18 }
 0x326   : > { %v545_v19 = vpop.f32.mrf.mxu1 }
 0x337   : > { %619 = vrot.lane.b32.xlu0 %v1143_v17, %s1027_s20  ;;  %s704_s20 = scalar_lea.sflag [#allocation3], %s349_s13 }
 0x396   : > { %v551_v20 = vpop.xlane.xlu0 %550 }
 0x397   : > { %v552_v21 = vsub.f32 %v548_v16, %v551_v20 }
 0x399   : > { %v553_v22 = vmul.f32 1.442695, %v552_v21 }
 0x39b   : > { %948 = vpow2.f32 %v553_v22 }
 0x39c   : > { %v520_v23 = vpop.f32.mrf.mxu3 }
 0x3a1   : > { %v949_v24 = vpop.eup %948 }
 0x3a2   : > { %v555_v25 = vsel %vm404_vm1, %v949_v24, 0.0 }
 0x3a3   : > { %556 = vadd.xlane.f32.xlu2 %v555_v25 }
 0x3a4   : > { %v522_v26 = vpop.f32.mrf.mxu3 }
 0x3a9   : > { %v620_v27 = vpop.permute.xlu0 %619 }
 0x3aa   : > { %v625_v28 = vsel %vm448_vm3, %v620_v27, 0 }
 0x3ab   : > { %634 = vmatpush.bf16.msrb.mxu2 %v625_v28 }
 0x3ae   : > { %863 = vmatmul.msk.bf16.vlgmr.msrb.gmra.mxu2 %vm404_vm1, %v618_v29 }
 0x3bb   : > { %561 = vrot.lane.b32.xlu2 %v1143_v17, %s1028_s17  ;;  %v878_v17 = vld [vmem:[%s1257_s5 + $0x8] sm:$0xff] }
 0x3bc   : > { %691 = vmatpush.bf16.msra.mxu1 %v878_v17 }
 0x3c0   : > { %692 = vmatpush.bf16.msra.mxu1 %v877_v40 }
 0x3c3   : > { %641 = vrot.lane.b32.xlu2 %v520_v23, %s1029_s21  ;;  %s369_s21 = scalar_lea.vmem %s1256_s4, %s1133_s24 }
 0x3c4   : > { %v658_v43 = vld [vmem:[%s369_s21] sm:$0xff] }
 0x416   : > { %v557_v30 = vpop.xlane.xlu2 %556 }
 0x417   : > { %950 = vrcp.f32 %v557_v30 }
 0x41d   : > { %v951_v31 = vpop.eup %950 }
 0x41e   : > { %v559_v32 = vmul.f32 %v951_v31, %v949_v24  ;;  %v562_v33 = vpop.permute.xlu2 %561 }
 0x41f   : > { %v567_v34 = vsel %vm448_vm3, %v562_v33, 0 }
 0x420   : > { %576 = vmatpush.bf16.msrb.mxu3 %v567_v34  ;;  %v560_v35 = vpack.c.bf16 %v559_v32, %v559_v32 }
 0x423   : > { %861 = vmatmul.msk.bf16.vlgmr.msrb.gmra.mxu3 %vm404_vm1, %v560_v35 }
 0x426   : > { %v642_v41 = vpop.permute.xlu2 %641 }
 0x427   : > { %v652_v42 = vsel %vm404_vm1, %v1174_v6, %v642_v41 }
 0x431   : > { %v636_v36 = vpop.f32.mrf.mxu2 }
 0x432   : > { %649 = vrot.lane.b32.xlu1 %v636_v36, %s1030_s22  ;;  %s874_s22 = sshll.u32 %s1098_s9, 3 }
 0x439   : > { %v638_v37 = vpop.f32.mrf.mxu2 }
 0x4a4   : > { %v650_v45 = vpop.permute.xlu1 %649 }
 0x4a6   : > { %v578_v38 = vpop.f32.mrf.mxu3 }
 0x4a7   : > { %645 = vrot.lane.b32.xlu2 %v578_v38, %s1031_s10  ;;  %s717_s10 = scalar_lea.hbm %s1260_s8, %s874_s22 }
 0x4a8   : > { %s721_s12 = sshll.u32 %s717_s10, 4  ;;  %s722_s12 = int_to_ptr.hbm [resolvable:$true] %s721_s12 }
 0x4a9   : > { %s966_s17 = sshra.s32 %s722_s12, 4  ;;  %s967_s17 = int_to_ptr.hbm [resolvable:$true] %s966_s17 }
 0x4aa   : > { %s968_s21 = scalar_lea.hbm %s967_s17, 8  ;;  %p973_p0 = scmp.lt.s32.totalorder %s967_s17, %s1260_s8 }
 0x4ab   : > { %p969_p11 = scmp.ne.s32.totalorder %s967_s17, %s968_s21  ;;  %p974_p1 = scmp.lt.s32.totalorder %s972_s1, %s968_s21 }
 0x4ad   : > { %p970_p12 = pnand %p969_p11, %p1115_p5  ;;  %p975_p2 = por %p974_p1, %p973_p0 }
 0x4ae   : > { %v580_v39 = vpop.f32.mrf.mxu3 }
 0x4af   : > { %p971_p13 = pneg %p970_p12 }
 0x4b1   : > { %p976_p3 = pnand %p975_p2, %p971_p13 }
 0x501   : > { %v646_v44 = vpop.permute.xlu2 %645 }
 0x502   : > { %v654_v46 = vsel %vm653_vm4, %v652_v42, %v646_v44 }
 0x503   : > { %v656_v47 = vsel %vm655_vm5, %v654_v46, %v650_v45 }
 0x504   : > { %v659_v48 = vadd.f32 %v658_v43, %v656_v47 }
 0x506   : > { %v660_v49 = vpack.c.bf16 %v659_v48, %v659_v48 }
 0x508   : > { %872 = vmatmul.msk.bf16.vlgmr.msra.gmra.mxu1 %vm681_vm6, %v660_v49 }
 0x509   : > { %979 = shalt.err (!%p976_p3)
}
 0x50a   : > { %879 = dma.vmem_to_hbm [thread:$0]  (%p1115_p5), %s720_s26, 128, %s722_s12, %s704_s20   ;;  %v935_v50 = vld [vmem:[%s1258_s6] ss:$0 sm:$0xff] }
 0x50b   : > { %s373_s0 = scalar_lea.vmem %s1259_s7, %s1133_s24 }
 0x585   : > { %v694_v51 = vpop.f32.mrf.mxu1 }
 0x586   : > { %v695_v52 = vadd.f32 %v935_v50, %v694_v51 }
 0x588   : > { %698 = vst.msk [vmem:[%s373_s0] sm:$0xff] %vm681_vm6, %v695_v52 }
 0x58d   : > { %v696_v53 = vpop.f32.mrf.mxu1 }
 0x58e PF: > { %p885_p4 = scmp.ge.s32.totalorder %s1014_s30, 2  ;;  %s740_s1 = sand.u32 1, %s1002_s27  }
 0x58f   : > { %s741_s15 = scalar_lea.sflag [#allocation3], %s740_s1 }
 0x590   : > { %p882_p5 = pnand %p885_p4, %p1119_p6 }
 0x592   : > { %p883_p7 = pneg %p882_p5 }
 0x594   : > { %997 = dma.done.wait (%p883_p7), %s741_s15, 128  }
 0x595   : > { %999 = vsyncadd (%p883_p7), %s741_s15, 4294967168  ;;  %p19_p8 = scmp.ge.s32.totalorder %s1102_s11, 4   ;;  %s1269_s27 = smov %s1006_s28 }
 0x596   : > { %s1270_s28 = smov %s1010_s29  ;;  %s1271_s29 = smov %s1113_s14 }
 0x597   : > { %s1272_s30 = smov %s1102_s11  ;;  %21 = sbr.rel (!%p19_p8) target bundleno = 6 (0x6), region = 107 }
 0x59c   :  { %747 = vsyncpa [#allocation3], 1 }
 0x59d   :  { %749 = vsyncpa [#allocation3 + $0x1], 1 }

</bundles_post_ra>
